<compile_context>
chip_gen: v5e
topology: v5e:2x2
jax: 0.10.0
libtpu: 0.0.40
codegen_flags: <defaults>
</compile_context>

<pallas_src>
import functools

import jax
import jax.numpy as jnp
from jax.experimental import pallas as pl
from jax.experimental.pallas import tpu as pltpu

_VMEM_LIMIT = 32 * 1024 * 1024   # explicit scoped-VMEM ceiling (safe on v5e/v6e/v7x)
_LANE = 128
_SUBLANE = 8


def _pick_tile(dim, pref, quantum):
    """Largest tile <= pref that divides `dim` and is a multiple of `quantum`.
    Falls back to the full dim when dim <= pref (allowed by BlockSpec rules),
    so huge dims can never produce whole-dimension blocks."""
    if dim <= pref:
        return dim
    assert dim % quantum == 0, (dim, quantum)
    t = (pref // quantum) * quantum
    while dim % t:
        t -= quantum
    return t


# ----------------------------------------------------------------------------
# Fused backbone kernel: 3x3 conv + bias + ReLU + 1x1 conv + bias, per image.
# ----------------------------------------------------------------------------
def _fused_conv_kernel(x_ref, w1_ref, b1_ref, w2_ref, b2_ref, o_ref, h_ref,
                       *, wp2, n_joints):
    """Channel-major fused conv stack for one image.

    x_ref : [Cin, Lx]        f32   padded image, Lx = (H+3)*(W+2)
    w1_ref: [9, Cmid_p, Cin] bf16  3x3 weights, tap-major, transposed
    b1_ref: [Cmid_p, 1]      f32
    w2_ref: [Jp, Cmid_p]     bf16  1x1 weights, transposed
    b2_ref: [Jp, 1]          f32
    o_ref : [J, L]           f32   channel-major heatmaps, L = H*(W+2)
    h_ref : [Cmid_p, L]      f32   VMEM scratch (hidden layer never hits HBM)
    """
    _, L = h_ref.shape
    # 3x3 conv as 9 shifted-slice dots (im2col stays in VMEM / vregs).
    for k in range(9):
        off = (k // 3) * wp2 + (k % 3)
        patch = x_ref[:, off:off + L].astype(jnp.bfloat16)          # [Cin, L]
        prod = jnp.dot(w1_ref[k], patch,
                       preferred_element_type=jnp.float32)          # [Cmid_p, L]
        if k == 0:
            h_ref[...] = prod
        else:
            h_ref[...] += prod
    h1 = jnp.maximum(h_ref[...] + b1_ref[...], 0.0).astype(jnp.bfloat16)
    out = jnp.dot(w2_ref[...], h1, preferred_element_type=jnp.float32)
    out = out + b2_ref[...]                                          # [Jp, L]
    o_ref[...] = out[:n_joints, :]                                   # drop pad channels


def pose_backbone_forward(params, x):
    """x: [N, Cin, H, W] f32 (NCHW) -> heatmaps [N, J, H, W] f32 (NCHW)."""
    N, Cin, H, W = x.shape
    wp2 = W + 2
    L = H * wp2                      # conv computed over W-padded rows
    Lx = (H + 3) * wp2               # top pad 1, bottom pad 2 (covers the last tap)

    w1, b1, w2, b2 = params["w1"], params["b1"], params["w2"], params["b2"]
    cmid_p = w1.shape[1]
    jp = w2.shape[0]
    J = params["num_joints"]

    # NCHW is already channel-major: pad spatially + flatten, no transpose needed.
    xp = jnp.pad(x.astype(jnp.float32), ((0, 0), (0, 0), (1, 2), (1, 1)))
    x_flat = xp.reshape(N, Cin, Lx)

    kernel = functools.partial(_fused_conv_kernel, wp2=wp2, n_joints=J)
    out = pl.pallas_call(
        kernel,
        out_shape=jax.ShapeDtypeStruct((N, J, L), jnp.float32),
        grid_spec=pltpu.PrefetchScalarGridSpec(
            num_scalar_prefetch=0,
            grid=(N,),
            in_specs=[
                pl.BlockSpec((None, Cin, Lx), lambda n: (n, 0, 0)),
                pl.BlockSpec((9, cmid_p, Cin), lambda n: (0, 0, 0)),
                pl.BlockSpec((cmid_p, 1), lambda n: (0, 0)),
                pl.BlockSpec((jp, cmid_p), lambda n: (0, 0)),
                pl.BlockSpec((jp, 1), lambda n: (0, 0)),
            ],
            out_specs=pl.BlockSpec((None, J, L), lambda n: (n, 0, 0)),
            scratch_shapes=[pltpu.VMEM((cmid_p, L), jnp.float32)],
        ),
        compiler_params=pltpu.CompilerParams(
            dimension_semantics=("parallel",),
            vmem_limit_bytes=_VMEM_LIMIT),
    )(x_flat, w1, b1, w2, b2)

    # Strip the W-padding junk columns (cheap XLA slice; the kernel already
    # emitted channel-major heatmaps so no transpose is needed here).
    return out.reshape(N, J, H, wp2)[:, :, :, :W]


# ----------------------------------------------------------------------------
# Fused Aggre layer: per target view, (V-1) channel-wise FC warps + weighted
# cross-view fusion collapse into one matmul with the identity term folded
# into the accumulator init.
# ----------------------------------------------------------------------------
def _agg_matmul_kernel(a_ref, w_ref, res_ref, o_ref, *, w0):
    """o = w0 * res + sum_k a_k @ w_k, accumulated directly into o_ref (f32)."""
    @pl.when(pl.program_id(2) == 0)
    def _():
        o_ref[...] = w0 * res_ref[...]
    o_ref[...] += jnp.dot(a_ref[...], w_ref[...],
                          preferred_element_type=jnp.float32)


def aggregation_forward(fc_all, fuse_w0, heatmaps, *, tn_pref=256, tk_pref=256):
    """fc_all: [V*(V-1), HW, HW] bf16 (fuse weights pre-folded).
    heatmaps: list of V arrays [N, J, H, W] f32 -> list of V fused heatmaps."""
    V = len(heatmaps)
    N, J, H, W = heatmaps[0].shape
    HW, NC = H * W, N * J
    assert NC % _SUBLANE == 0, "batch*joints must be a multiple of 8"

    flats = [h.reshape(NC, HW) for h in heatmaps]
    a_all = jnp.stack([f.astype(jnp.bfloat16) for f in flats], axis=0)  # [V,NC,HW]

    # 256-wide lane tiles suit v6e/v7x (2x256 MXU); v5e is fine at these sizes.
    tm = _pick_tile(NC, 256, _SUBLANE)
    tn = _pick_tile(HW, tn_pref, _LANE)
    tk = _pick_tile(HW, tk_pref, _LANE)
    kpv = HW // tk                             # K-tiles per source view
    grid = (NC // tm, HW // tn, (V - 1) * kpv)

    outs = []
    for i in range(V):
        def a_map(m, n, k, i=i):
            s = k // kpv
            src = jnp.where(s >= i, s + 1, s)  # skip the target view itself
            return (src, m, k % kpv)

        def w_map(m, n, k, i=i):
            return (i * (V - 1) + k // kpv, k % kpv, n)

        fused = pl.pallas_call(
            functools.partial(_agg_matmul_kernel, w0=float(fuse_w0)),
            out_shape=jax.ShapeDtypeStruct((NC, HW), jnp.float32),
            grid_spec=pltpu.PrefetchScalarGridSpec(
                num_scalar_prefetch=0,
                grid=grid,
                in_specs=[
                    pl.BlockSpec((None, tm, tk), a_map),
                    pl.BlockSpec((None, tk, tn), w_map),
                    pl.BlockSpec((tm, tn), lambda m, n, k: (m, n)),
                ],
                out_specs=pl.BlockSpec((tm, tn), lambda m, n, k: (m, n)),
            ),
            compiler_params=pltpu.CompilerParams(
                dimension_semantics=("parallel", "parallel", "arbitrary"),
                vmem_limit_bytes=_VMEM_LIMIT),
        )(a_all, fc_all, flats[i])
        outs.append(fused.reshape(N, J, H, W))
    return outs


# ----------------------------------------------------------------------------
# MultiViewPose forward (mirrors the PyTorch wrapper semantics)
# ----------------------------------------------------------------------------
def multiview_pose_forward(params, views, aggre=True):
    if isinstance(views, (list, tuple)):
        single_views = [pose_backbone_forward(params["resnet"], v) for v in views]
        multi_views = []
        if aggre:  # config.NETWORK.AGGRE
            multi_views = aggregation_forward(
                params["fc_all"], params["fuse_weights"][0], single_views)
        return single_views, multi_views
    return pose_backbone_forward(params["resnet"], views)


# ----------------------------------------------------------------------------
# Deterministic synthetic parameter init (no checkpoint load)
# ----------------------------------------------------------------------------
def init_params(key, *, in_ch, mid_ch, num_joints, H, W, nviews,
                mid_pad=128, joints_pad=128):
    k1, k2, k3, k4, k5 = jax.random.split(key, 5)
    # conv1 (3x3): tap-major, transposed, hidden channels zero-padded to 128
    # so the MXU output is lane-dense; stored bf16.
    w1 = jnp.zeros((9, mid_pad, in_ch), jnp.float32)
    w1 = w1.at[:, :mid_ch, :].set(
        jax.random.normal(k1, (9, mid_ch, in_ch), jnp.float32) * 0.05)
    b1 = jnp.zeros((mid_pad, 1), jnp.float32)
    b1 = b1.at[:mid_ch, 0].set(jax.random.normal(k2, (mid_ch,), jnp.float32) * 0.01)
    # conv2 (1x1) -> joint heatmaps, joints padded to 128 lanes (sliced in-kernel).
    w2 = jnp.zeros((joints_pad, mid_pad), jnp.float32)
    w2 = w2.at[:num_joints, :mid_ch].set(
        jax.random.normal(k3, (num_joints, mid_ch), jnp.float32) * 0.05)
    b2 = jnp.zeros((joints_pad, 1), jnp.float32)
    b2 = b2.at[:num_joints, 0].set(
        jax.random.normal(k4, (num_joints,), jnp.float32) * 0.01)
    resnet = {"w1": w1.astype(jnp.bfloat16), "b1": b1,
              "w2": w2.astype(jnp.bfloat16), "b2": b2,
              "num_joints": num_joints}

    # Aggre: ChannelWiseFC weights uniform(0, 0.1); cross-view fuse weights are
    # folded in so warp + weighted-sum become a single matmul per target view.
    fuse_weights = [0.4, 0.2, 0.2, 0.2]   # warped[0] (identity path) gets 0.4
    size = H * W
    num_nets = nviews * (nviews - 1)
    fc_keys = jax.random.split(k5, num_nets)
    fc = []
    for idx in range(num_nets):
        s = idx % (nviews - 1)            # position among the (V-1) warped sources
        w = jax.random.uniform(fc_keys[idx], (size, size), jnp.float32, 0.0, 0.1)
        fc.append((fuse_weights[1 + s] * w).astype(jnp.bfloat16))
    fc_all = jnp.stack(fc, axis=0)        # [V*(V-1), HW, HW] bf16
    return {"resnet": resnet, "fc_all": fc_all, "fuse_weights": fuse_weights}


# ----------------------------------------------------------------------------
# Pure-JAX reference (same padded-weight semantics) for a correctness check
# ----------------------------------------------------------------------------
def _reference_forward(params, views):
    r = params["resnet"]
    w1 = r["w1"].astype(jnp.float32)
    w2 = r["w2"].astype(jnp.float32)
    b1 = r["b1"][:, 0]
    b2 = r["b2"][:, 0]
    J = r["num_joints"]
    singles = []
    for x in views:
        N, C, H, W = x.shape
        xp = jnp.pad(x, ((0, 0), (0, 0), (1, 1), (1, 1)))
        acc = jnp.zeros((N, w1.shape[1], H, W), jnp.float32)
        for k in range(9):
            dh, dw = k // 3, k % 3
            patch = xp[:, :, dh:dh + H, dw:dw + W]
            acc = acc + jnp.einsum("mc,nchw->nmhw", w1[k], patch)
        h1 = jnp.maximum(acc + b1[None, :, None, None], 0.0)
        hm = jnp.einsum("jm,nmhw->njhw", w2, h1) + b2[None, :, None, None]
        singles.append(hm[:, :J])
    V = len(views)
    fuse = params["fuse_weights"]
    fc_all = params["fc_all"].astype(jnp.float32)
    multis = []
    for i in range(V):
        N, J_, H, W = singles[i].shape
        out = fuse[0] * singles[i].reshape(N * J_, H * W)
        for s in range(V - 1):
            j = s + 1 if s >= i else s
            out = out + singles[j].reshape(N * J_, H * W) @ fc_all[i * (V - 1) + s]
        multis.append(out.reshape(N, J_, H, W))
    return singles, multis


if __name__ == "__main__":
    # Small shapes: 2 views, batch=2, in channels=4, 16x16, mid=16, joints=8.
    NVIEWS, N, CIN, H, W = 2, 2, 4, 16, 16
    CMID, NJOINTS = 16, 8

    key = jax.random.PRNGKey(0)
    kp, kv = jax.random.split(key)
    params = init_params(kp, in_ch=CIN, mid_ch=CMID, num_joints=NJOINTS,
                         H=H, W=W, nviews=NVIEWS)

    view_keys = jax.random.split(kv, NVIEWS)
    views = [jax.random.normal(k, (N, CIN, H, W), jnp.float32)
             for k in view_keys]

    single_views, multi_views = multiview_pose_forward(params, views, aggre=True)
    for t in single_views + multi_views:
        jax.block_until_ready(t)

    assert len(single_views) == NVIEWS and len(multi_views) == NVIEWS
    for t in single_views + multi_views:
        assert t.shape == (N, NJOINTS, H, W)
        assert bool(jnp.all(jnp.isfinite(t)))

    # Correctness vs pure-JAX reference (tolerance covers bf16 matmul operands).
    ref_single, ref_multi = _reference_forward(params, views)

    def rel_err(a, b):
        return float(jnp.linalg.norm(a - b) / (jnp.linalg.norm(b) + 1e-12))

    for got, ref in zip(single_views + multi_views, ref_single + ref_multi):
        assert rel_err(got, ref) < 0.05, rel_err(got, ref)

    print("KERNEL_OK")
</pallas_src>

<mosaic_0001>
module attributes {stable_mosaic.version = 11 : i64} {
  func.func @_fused_conv_kernel(%arg0: i32, %arg1: memref<1x4x342xf32, #tpu.memory_space<vmem>>, %arg2: memref<9x128x4xbf16, #tpu.memory_space<vmem>>, %arg3: memref<128x1xf32, #tpu.memory_space<vmem>>, %arg4: memref<128x128xbf16, #tpu.memory_space<vmem>>, %arg5: memref<128x1xf32, #tpu.memory_space<vmem>>, %arg6: memref<1x8x288xf32, #tpu.memory_space<vmem>>, %arg7: memref<128x288xf32, #tpu.memory_space<vmem>>) attributes {dimension_semantics = [#tpu.dimension_semantics<parallel>], iteration_bounds = array<i64: 2>, scalar_prefetch = 0 : i64, scratch_operands = 1 : i64, tpu.core_type = #tpu.core_type<tc>, window_params = [{transform_indices = @transform_0, window_bounds = array<i64: 1, 4, 342>}, {pipeline_mode = #tpu.pipeline_mode<synchronous>, transform_indices = @transform_1, window_bounds = array<i64: 9, 128, 4>}, {pipeline_mode = #tpu.pipeline_mode<synchronous>, transform_indices = @transform_2, window_bounds = array<i64: 128, 1>}, {pipeline_mode = #tpu.pipeline_mode<synchronous>, transform_indices = @transform_3, window_bounds = array<i64: 128, 128>}, {pipeline_mode = #tpu.pipeline_mode<synchronous>, transform_indices = @transform_4, window_bounds = array<i64: 128, 1>}, {transform_indices = @transform_5, window_bounds = array<i64: 1, 8, 288>}]} {
    %c0 = arith.constant 0 : index
    %c0_0 = arith.constant 0 : index
    %c0_1 = arith.constant 0 : index
    %0 = vector.load %arg1[%c0, %c0_0, %c0_1] : memref<1x4x342xf32, #tpu.memory_space<vmem>>, vector<1x4x288xf32>
    %1 = vector.shape_cast %0 : vector<1x4x288xf32> to vector<4x288xf32>
    %2 = arith.truncf %1 : vector<4x288xf32> to vector<4x288xbf16>
    %c0_2 = arith.constant 0 : index
    %c0_3 = arith.constant 0 : index
    %c0_4 = arith.constant 0 : index
    %3 = vector.load %arg2[%c0_2, %c0_3, %c0_4] : memref<9x128x4xbf16, #tpu.memory_space<vmem>>, vector<1x128x4xbf16>
    %4 = vector.shape_cast %3 : vector<1x128x4xbf16> to vector<128x4xbf16>
    %cst = arith.constant dense<0.000000e+00> : vector<128x288xf32>
    %5 = tpu.matmul %4, %2, %cst {dimension_numbers = #tpu.dot_dimension_numbers<[1], [0], [0], [1], [0, 0, 1, 1], [], []>} : vector<128x4xbf16>, vector<4x288xbf16>, vector<128x288xf32> -> vector<128x288xf32>
    %c0_5 = arith.constant 0 : index
    %c0_6 = arith.constant 0 : index
    %6 = vector.load %arg7[%c0_5, %c0_6] : memref<128x288xf32, #tpu.memory_space<vmem>>, vector<128x288xf32>
    tpu.vector_store %arg7[%c0_5, %c0_6], %5 {strides = array<i32>} : memref<128x288xf32, #tpu.memory_space<vmem>>, vector<128x288xf32>,
    %c0_7 = arith.constant 0 : index
    %c0_8 = arith.constant 0 : index
    %c1 = arith.constant 1 : index
    %7 = vector.load %arg1[%c0_7, %c0_8, %c1] : memref<1x4x342xf32, #tpu.memory_space<vmem>>, vector<1x4x288xf32>
    %8 = vector.shape_cast %7 : vector<1x4x288xf32> to vector<4x288xf32>
    %9 = arith.truncf %8 : vector<4x288xf32> to vector<4x288xbf16>
    %c1_9 = arith.constant 1 : index
    %c0_10 = arith.constant 0 : index
    %c0_11 = arith.constant 0 : index
    %10 = vector.load %arg2[%c1_9, %c0_10, %c0_11] : memref<9x128x4xbf16, #tpu.memory_space<vmem>>, vector<1x128x4xbf16>
    %11 = vector.shape_cast %10 : vector<1x128x4xbf16> to vector<128x4xbf16>
    %cst_12 = arith.constant dense<0.000000e+00> : vector<128x288xf32>
    %12 = tpu.matmul %11, %9, %cst_12 {dimension_numbers = #tpu.dot_dimension_numbers<[1], [0], [0], [1], [0, 0, 1, 1], [], []>} : vector<128x4xbf16>, vector<4x288xbf16>, vector<128x288xf32> -> vector<128x288xf32>
    %c0_13 = arith.constant 0 : index
    %c0_14 = arith.constant 0 : index
    %13 = vector.load %arg7[%c0_13, %c0_14] : memref<128x288xf32, #tpu.memory_space<vmem>>, vector<128x288xf32>
    %14 = arith.addf %13, %12 : vector<128x288xf32>
    %c0_15 = arith.constant 0 : index
    %c0_16 = arith.constant 0 : index
    %15 = vector.load %arg7[%c0_15, %c0_16] : memref<128x288xf32, #tpu.memory_space<vmem>>, vector<128x288xf32>
    tpu.vector_store %arg7[%c0_15, %c0_16], %14 {strides = array<i32>} : memref<128x288xf32, #tpu.memory_space<vmem>>, vector<128x288xf32>,
    %c0_17 = arith.constant 0 : index
    %c0_18 = arith.constant 0 : index
    %c2 = arith.constant 2 : index
    %16 = vector.load %arg1[%c0_17, %c0_18, %c2] : memref<1x4x342xf32, #tpu.memory_space<vmem>>, vector<1x4x288xf32>
    %17 = vector.shape_cast %16 : vector<1x4x288xf32> to vector<4x288xf32>
    %18 = arith.truncf %17 : vector<4x288xf32> to vector<4x288xbf16>
    %c2_19 = arith.constant 2 : index
    %c0_20 = arith.constant 0 : index
    %c0_21 = arith.constant 0 : index
    %19 = vector.load %arg2[%c2_19, %c0_20, %c0_21] : memref<9x128x4xbf16, #tpu.memory_space<vmem>>, vector<1x128x4xbf16>
    %20 = vector.shape_cast %19 : vector<1x128x4xbf16> to vector<128x4xbf16>
    %cst_22 = arith.constant dense<0.000000e+00> : vector<128x288xf32>
    %21 = tpu.matmul %20, %18, %cst_22 {dimension_numbers = #tpu.dot_dimension_numbers<[1], [0], [0], [1], [0, 0, 1, 1], [], []>} : vector<128x4xbf16>, vector<4x288xbf16>, vector<128x288xf32> -> vector<128x288xf32>
    %c0_23 = arith.constant 0 : index
    %c0_24 = arith.constant 0 : index
    %22 = vector.load %arg7[%c0_23, %c0_24] : memref<128x288xf32, #tpu.memory_space<vmem>>, vector<128x288xf32>
    %23 = arith.addf %22, %21 : vector<128x288xf32>
    %c0_25 = arith.constant 0 : index
    %c0_26 = arith.constant 0 : index
    %24 = vector.load %arg7[%c0_25, %c0_26] : memref<128x288xf32, #tpu.memory_space<vmem>>, vector<128x288xf32>
    tpu.vector_store %arg7[%c0_25, %c0_26], %23 {strides = array<i32>} : memref<128x288xf32, #tpu.memory_space<vmem>>, vector<128x288xf32>,
    %c0_27 = arith.constant 0 : index
    %c0_28 = arith.constant 0 : index
    %c18 = arith.constant 18 : index
    %25 = vector.load %arg1[%c0_27, %c0_28, %c18] : memref<1x4x342xf32, #tpu.memory_space<vmem>>, vector<1x4x288xf32>
    %26 = vector.shape_cast %25 : vector<1x4x288xf32> to vector<4x288xf32>
    %27 = arith.truncf %26 : vector<4x288xf32> to vector<4x288xbf16>
    %c3 = arith.constant 3 : index
    %c0_29 = arith.constant 0 : index
    %c0_30 = arith.constant 0 : index
    %28 = vector.load %arg2[%c3, %c0_29, %c0_30] : memref<9x128x4xbf16, #tpu.memory_space<vmem>>, vector<1x128x4xbf16>
    %29 = vector.shape_cast %28 : vector<1x128x4xbf16> to vector<128x4xbf16>
    %cst_31 = arith.constant dense<0.000000e+00> : vector<128x288xf32>
    %30 = tpu.matmul %29, %27, %cst_31 {dimension_numbers = #tpu.dot_dimension_numbers<[1], [0], [0], [1], [0, 0, 1, 1], [], []>} : vector<128x4xbf16>, vector<4x288xbf16>, vector<128x288xf32> -> vector<128x288xf32>
    %c0_32 = arith.constant 0 : index
    %c0_33 = arith.constant 0 : index
    %31 = vector.load %arg7[%c0_32, %c0_33] : memref<128x288xf32, #tpu.memory_space<vmem>>, vector<128x288xf32>
    %32 = arith.addf %31, %30 : vector<128x288xf32>
    %c0_34 = arith.constant 0 : index
    %c0_35 = arith.constant 0 : index
    %33 = vector.load %arg7[%c0_34, %c0_35] : memref<128x288xf32, #tpu.memory_space<vmem>>, vector<128x288xf32>
    tpu.vector_store %arg7[%c0_34, %c0_35], %32 {strides = array<i32>} : memref<128x288xf32, #tpu.memory_space<vmem>>, vector<128x288xf32>,
    %c0_36 = arith.constant 0 : index
    %c0_37 = arith.constant 0 : index
    %c19 = arith.constant 19 : index
    %34 = vector.load %arg1[%c0_36, %c0_37, %c19] : memref<1x4x342xf32, #tpu.memory_space<vmem>>, vector<1x4x288xf32>
    %35 = vector.shape_cast %34 : vector<1x4x288xf32> to vector<4x288xf32>
    %36 = arith.truncf %35 : vector<4x288xf32> to vector<4x288xbf16>
    %c4 = arith.constant 4 : index
    %c0_38 = arith.constant 0 : index
    %c0_39 = arith.constant 0 : index
    %37 = vector.load %arg2[%c4, %c0_38, %c0_39] : memref<9x128x4xbf16, #tpu.memory_space<vmem>>, vector<1x128x4xbf16>
    %38 = vector.shape_cast %37 : vector<1x128x4xbf16> to vector<128x4xbf16>
    %cst_40 = arith.constant dense<0.000000e+00> : vector<128x288xf32>
    %39 = tpu.matmul %38, %36, %cst_40 {dimension_numbers = #tpu.dot_dimension_numbers<[1], [0], [0], [1], [0, 0, 1, 1], [], []>} : vector<128x4xbf16>, vector<4x288xbf16>, vector<128x288xf32> -> vector<128x288xf32>
    %c0_41 = arith.constant 0 : index
    %c0_42 = arith.constant 0 : index
    %40 = vector.load %arg7[%c0_41, %c0_42] : memref<128x288xf32, #tpu.memory_space<vmem>>, vector<128x288xf32>
    %41 = arith.addf %40, %39 : vector<128x288xf32>
    %c0_43 = arith.constant 0 : index
    %c0_44 = arith.constant 0 : index
    %42 = vector.load %arg7[%c0_43, %c0_44] : memref<128x288xf32, #tpu.memory_space<vmem>>, vector<128x288xf32>
    tpu.vector_store %arg7[%c0_43, %c0_44], %41 {strides = array<i32>} : memref<128x288xf32, #tpu.memory_space<vmem>>, vector<128x288xf32>,
    %c0_45 = arith.constant 0 : index
    %c0_46 = arith.constant 0 : index
    %c20 = arith.constant 20 : index
    %43 = vector.load %arg1[%c0_45, %c0_46, %c20] : memref<1x4x342xf32, #tpu.memory_space<vmem>>, vector<1x4x288xf32>
    %44 = vector.shape_cast %43 : vector<1x4x288xf32> to vector<4x288xf32>
    %45 = arith.truncf %44 : vector<4x288xf32> to vector<4x288xbf16>
    %c5 = arith.constant 5 : index
    %c0_47 = arith.constant 0 : index
    %c0_48 = arith.constant 0 : index
    %46 = vector.load %arg2[%c5, %c0_47, %c0_48] : memref<9x128x4xbf16, #tpu.memory_space<vmem>>, vector<1x128x4xbf16>
    %47 = vector.shape_cast %46 : vector<1x128x4xbf16> to vector<128x4xbf16>
    %cst_49 = arith.constant dense<0.000000e+00> : vector<128x288xf32>
    %48 = tpu.matmul %47, %45, %cst_49 {dimension_numbers = #tpu.dot_dimension_numbers<[1], [0], [0], [1], [0, 0, 1, 1], [], []>} : vector<128x4xbf16>, vector<4x288xbf16>, vector<128x288xf32> -> vector<128x288xf32>
    %c0_50 = arith.constant 0 : index
    %c0_51 = arith.constant 0 : index
    %49 = vector.load %arg7[%c0_50, %c0_51] : memref<128x288xf32, #tpu.memory_space<vmem>>, vector<128x288xf32>
    %50 = arith.addf %49, %48 : vector<128x288xf32>
    %c0_52 = arith.constant 0 : index
    %c0_53 = arith.constant 0 : index
    %51 = vector.load %arg7[%c0_52, %c0_53] : memref<128x288xf32, #tpu.memory_space<vmem>>, vector<128x288xf32>
    tpu.vector_store %arg7[%c0_52, %c0_53], %50 {strides = array<i32>} : memref<128x288xf32, #tpu.memory_space<vmem>>, vector<128x288xf32>,
    %c0_54 = arith.constant 0 : index
    %c0_55 = arith.constant 0 : index
    %c36 = arith.constant 36 : index
    %52 = vector.load %arg1[%c0_54, %c0_55, %c36] : memref<1x4x342xf32, #tpu.memory_space<vmem>>, vector<1x4x288xf32>
    %53 = vector.shape_cast %52 : vector<1x4x288xf32> to vector<4x288xf32>
    %54 = arith.truncf %53 : vector<4x288xf32> to vector<4x288xbf16>
    %c6 = arith.constant 6 : index
    %c0_56 = arith.constant 0 : index
    %c0_57 = arith.constant 0 : index
    %55 = vector.load %arg2[%c6, %c0_56, %c0_57] : memref<9x128x4xbf16, #tpu.memory_space<vmem>>, vector<1x128x4xbf16>
    %56 = vector.shape_cast %55 : vector<1x128x4xbf16> to vector<128x4xbf16>
    %cst_58 = arith.constant dense<0.000000e+00> : vector<128x288xf32>
    %57 = tpu.matmul %56, %54, %cst_58 {dimension_numbers = #tpu.dot_dimension_numbers<[1], [0], [0], [1], [0, 0, 1, 1], [], []>} : vector<128x4xbf16>, vector<4x288xbf16>, vector<128x288xf32> -> vector<128x288xf32>
    %c0_59 = arith.constant 0 : index
    %c0_60 = arith.constant 0 : index
    %58 = vector.load %arg7[%c0_59, %c0_60] : memref<128x288xf32, #tpu.memory_space<vmem>>, vector<128x288xf32>
    %59 = arith.addf %58, %57 : vector<128x288xf32>
    %c0_61 = arith.constant 0 : index
    %c0_62 = arith.constant 0 : index
    %60 = vector.load %arg7[%c0_61, %c0_62] : memref<128x288xf32, #tpu.memory_space<vmem>>, vector<128x288xf32>
    tpu.vector_store %arg7[%c0_61, %c0_62], %59 {strides = array<i32>} : memref<128x288xf32, #tpu.memory_space<vmem>>, vector<128x288xf32>,
    %c0_63 = arith.constant 0 : index
    %c0_64 = arith.constant 0 : index
    %c37 = arith.constant 37 : index
    %61 = vector.load %arg1[%c0_63, %c0_64, %c37] : memref<1x4x342xf32, #tpu.memory_space<vmem>>, vector<1x4x288xf32>
    %62 = vector.shape_cast %61 : vector<1x4x288xf32> to vector<4x288xf32>
    %63 = arith.truncf %62 : vector<4x288xf32> to vector<4x288xbf16>
    %c7 = arith.constant 7 : index
    %c0_65 = arith.constant 0 : index
    %c0_66 = arith.constant 0 : index
    %64 = vector.load %arg2[%c7, %c0_65, %c0_66] : memref<9x128x4xbf16, #tpu.memory_space<vmem>>, vector<1x128x4xbf16>
    %65 = vector.shape_cast %64 : vector<1x128x4xbf16> to vector<128x4xbf16>
    %cst_67 = arith.constant dense<0.000000e+00> : vector<128x288xf32>
    %66 = tpu.matmul %65, %63, %cst_67 {dimension_numbers = #tpu.dot_dimension_numbers<[1], [0], [0], [1], [0, 0, 1, 1], [], []>} : vector<128x4xbf16>, vector<4x288xbf16>, vector<128x288xf32> -> vector<128x288xf32>
    %c0_68 = arith.constant 0 : index
    %c0_69 = arith.constant 0 : index
    %67 = vector.load %arg7[%c0_68, %c0_69] : memref<128x288xf32, #tpu.memory_space<vmem>>, vector<128x288xf32>
    %68 = arith.addf %67, %66 : vector<128x288xf32>
    %c0_70 = arith.constant 0 : index
    %c0_71 = arith.constant 0 : index
    %69 = vector.load %arg7[%c0_70, %c0_71] : memref<128x288xf32, #tpu.memory_space<vmem>>, vector<128x288xf32>
    tpu.vector_store %arg7[%c0_70, %c0_71], %68 {strides = array<i32>} : memref<128x288xf32, #tpu.memory_space<vmem>>, vector<128x288xf32>,
    %c0_72 = arith.constant 0 : index
    %c0_73 = arith.constant 0 : index
    %c38 = arith.constant 38 : index
    %70 = vector.load %arg1[%c0_72, %c0_73, %c38] : memref<1x4x342xf32, #tpu.memory_space<vmem>>, vector<1x4x288xf32>
    %71 = vector.shape_cast %70 : vector<1x4x288xf32> to vector<4x288xf32>
    %72 = arith.truncf %71 : vector<4x288xf32> to vector<4x288xbf16>
    %c8 = arith.constant 8 : index
    %c0_74 = arith.constant 0 : index
    %c0_75 = arith.constant 0 : index
    %73 = vector.load %arg2[%c8, %c0_74, %c0_75] : memref<9x128x4xbf16, #tpu.memory_space<vmem>>, vector<1x128x4xbf16>
    %74 = vector.shape_cast %73 : vector<1x128x4xbf16> to vector<128x4xbf16>
    %cst_76 = arith.constant dense<0.000000e+00> : vector<128x288xf32>
    %75 = tpu.matmul %74, %72, %cst_76 {dimension_numbers = #tpu.dot_dimension_numbers<[1], [0], [0], [1], [0, 0, 1, 1], [], []>} : vector<128x4xbf16>, vector<4x288xbf16>, vector<128x288xf32> -> vector<128x288xf32>
    %c0_77 = arith.constant 0 : index
    %c0_78 = arith.constant 0 : index
    %76 = vector.load %arg7[%c0_77, %c0_78] : memref<128x288xf32, #tpu.memory_space<vmem>>, vector<128x288xf32>
    %77 = arith.addf %76, %75 : vector<128x288xf32>
    %c0_79 = arith.constant 0 : index
    %c0_80 = arith.constant 0 : index
    %78 = vector.load %arg7[%c0_79, %c0_80] : memref<128x288xf32, #tpu.memory_space<vmem>>, vector<128x288xf32>
    tpu.vector_store %arg7[%c0_79, %c0_80], %77 {strides = array<i32>} : memref<128x288xf32, #tpu.memory_space<vmem>>, vector<128x288xf32>,
    %c0_81 = arith.constant 0 : index
    %c0_82 = arith.constant 0 : index
    %79 = vector.load %arg7[%c0_81, %c0_82] : memref<128x288xf32, #tpu.memory_space<vmem>>, vector<128x288xf32>
    %c0_83 = arith.constant 0 : index
    %c0_84 = arith.constant 0 : index
    %80 = vector.load %arg3[%c0_83, %c0_84] : memref<128x1xf32, #tpu.memory_space<vmem>>, vector<128x1xf32>
    %81 = vector.broadcast %80 : vector<128x1xf32> to vector<128x288xf32>
    %82 = arith.addf %79, %81 : vector<128x288xf32>
    %cst_85 = arith.constant 0.000000e+00 : f32
    %83 = vector.broadcast %cst_85 : f32 to vector<128x288xf32>
    %84 = arith.maximumf %82, %83 : vector<128x288xf32>
    %85 = arith.truncf %84 : vector<128x288xf32> to vector<128x288xbf16>
    %c0_86 = arith.constant 0 : index
    %c0_87 = arith.constant 0 : index
    %86 = vector.load %arg4[%c0_86, %c0_87] : memref<128x128xbf16, #tpu.memory_space<vmem>>, vector<128x128xbf16>
    %cst_88 = arith.constant dense<0.000000e+00> : vector<128x288xf32>
    %87 = tpu.matmul %86, %85, %cst_88 {dimension_numbers = #tpu.dot_dimension_numbers<[1], [0], [0], [1], [0, 0, 1, 1], [], []>} : vector<128x128xbf16>, vector<128x288xbf16>, vector<128x288xf32> -> vector<128x288xf32>
    %c0_89 = arith.constant 0 : index
    %c0_90 = arith.constant 0 : index
    %88 = vector.load %arg5[%c0_89, %c0_90] : memref<128x1xf32, #tpu.memory_space<vmem>>, vector<128x1xf32>
    %89 = vector.broadcast %88 : vector<128x1xf32> to vector<128x288xf32>
    %90 = arith.addf %87, %89 : vector<128x288xf32>
    %91 = vector.extract_strided_slice %90 {offsets = [0, 0], sizes = [8, 288], strides = [1, 1]} : vector<128x288xf32> to vector<8x288xf32>
    %c0_91 = arith.constant 0 : index
    %c0_92 = arith.constant 0 : index
    %c0_93 = arith.constant 0 : index
    %92 = vector.load %arg6[%c0_91, %c0_92, %c0_93] : memref<1x8x288xf32, #tpu.memory_space<vmem>>, vector<1x8x288xf32>
    %93 = vector.shape_cast %92 : vector<1x8x288xf32> to vector<8x288xf32>
    %94 = vector.shape_cast %91 : vector<8x288xf32> to vector<1x8x288xf32>
    tpu.vector_store %arg6[%c0_91, %c0_92, %c0_93], %94 {strides = array<i32>} : memref<1x8x288xf32, #tpu.memory_space<vmem>>, vector<1x8x288xf32>,
    return
  }
  func.func @transform_0(%arg0: i32) -> (i32, i32, i32) {
    %c0_i32 = arith.constant 0 : i32
    %c0_i32_0 = arith.constant 0 : i32
    %c0_i32_1 = arith.constant 0 : i32
    return %arg0, %c0_i32, %c0_i32_0 : i32, i32, i32
  }
  func.func @transform_1(%arg0: i32) -> (i32, i32, i32) {
    %c0_i32 = arith.constant 0 : i32
    %c0_i32_0 = arith.constant 0 : i32
    %c0_i32_1 = arith.constant 0 : i32
    %c0_i32_2 = arith.constant 0 : i32
    return %c0_i32, %c0_i32_0, %c0_i32_1 : i32, i32, i32
  }
  func.func @transform_2(%arg0: i32) -> (i32, i32) {
    %c0_i32 = arith.constant 0 : i32
    %c0_i32_0 = arith.constant 0 : i32
    %c0_i32_1 = arith.constant 0 : i32
    return %c0_i32, %c0_i32_0 : i32, i32
  }
  func.func @transform_3(%arg0: i32) -> (i32, i32) {
    %c0_i32 = arith.constant 0 : i32
    %c0_i32_0 = arith.constant 0 : i32
    %c0_i32_1 = arith.constant 0 : i32
    return %c0_i32, %c0_i32_0 : i32, i32
  }
  func.func @transform_4(%arg0: i32) -> (i32, i32) {
    %c0_i32 = arith.constant 0 : i32
    %c0_i32_0 = arith.constant 0 : i32
    %c0_i32_1 = arith.constant 0 : i32
    return %c0_i32, %c0_i32_0 : i32, i32
  }
  func.func @transform_5(%arg0: i32) -> (i32, i32, i32) {
    %c0_i32 = arith.constant 0 : i32
    %c0_i32_0 = arith.constant 0 : i32
    %c0_i32_1 = arith.constant 0 : i32
    return %arg0, %c0_i32, %c0_i32_0 : i32, i32, i32
  }
}

</mosaic_0001>

<bundles_post_ra>
// kernel: tpu_custom_call.1
= control target key start
LH: loop header
LB: loop body
LE: loop exit
PB: predicated region body
PF: predicated region fallthrough
CT: control target
= control target key end

     0   :  { %10 = vsyncpa [#allocation4], 0  ;;  %s7280_s0 = inlined_call_operand.vmem [shape: f32[2,4,342], index: 0, kind: input, shape index: {}]   ;;  %s7281_s1 = inlined_call_operand.vmem [shape: bf16[9,128,4], index: 1, kind: input, shape index: {}]   ;;  %s7282_s2 = inlined_call_operand.vmem [shape: f32[128,1], index: 2, kind: input, shape index: {}]   ;;  %s7283_s3 = inlined_call_operand.vmem [shape: bf16[128,128], index: 3, kind: input, shape index: {}]   ;;  %s7284_s4 = inlined_call_operand.vmem [shape: f32[128,1], index: 4, kind: input, shape index: {}]   ;;  %s7285_s5 = inlined_call_operand.hbm [shape: f32[2,8,288], index: 5, kind: output, shape index: {}]  }
   0x1   :  { %12 = vsyncpa [#allocation4 + $0x1], 0  ;;  %s5300_s18 = smov 0   ;;  %s5302_s19 = smov 0  }
   0x2   :  { %s5304_s20 = smov 0   ;;  %s5306_s21 = smov 0  }
   0x3 LB: > { %s5321_s22 = sadd.s32 4294967295, %s5259_s21   ;;  %s4389_s23 = sadd.s32 4294967294, %s5259_s21   ;;  %s5259_s21 = sphi %s5306_s21, %s7353_s21   ;;  %s5255_s20 = sphi %s5304_s20, %s7352_s20   ;;  %s5251_s19 = sphi %s5302_s19, %s7351_s19   ;;  %s5247_s18 = sphi %s5300_s18, %s7350_s18  }
   0x4   : > { %s5325_s24 = sadd.s32 1, %s5259_s21   ;;  %s135_s25 = sadd.s32 1, %s5255_s20 }
   0x5   : > { %s132_s26 = ssub.s32 %s5259_s21, %s5325_s24  ;;  %p145_p0 = scmp.ne.s32.totalorder %s5255_s20, %s5251_s19 }
   0x6   : > { %p133_p1 = scmp.eq.s32.totalorder %s132_s26, 0  ;;  %p146_p2 = scmp.eq.s32.totalorder %s5321_s22, 1 }
   0x7   : > { %p151_p3 = scmp.ne.s32.totalorder %s5251_s19, %s5247_s18  ;;  %p152_p4 = scmp.eq.s32.totalorder %s4389_s23, 1 }
   0x8   : > { %s5336_s27 = scalar_select %p133_p1, %s5255_s20, %s135_s25  }
   0x9   : > { %p5338_p5 = por %p146_p2, %p145_p0  ;;  %p5342_p6 = por %p152_p4, %p151_p3 }
   0xa   : > { %p4392_p7 = scmp.ge.s32.totalorder %s5259_s21, 1  ;;  %p190_p8 = scmp.lt.s32.totalorder %s5259_s21, 3 }
   0xc   : > { %p191_p9 = pnand %p4392_p7, %p190_p8 }
   0xe   : > { %194 = sbr.rel (%p191_p9) target bundleno = 1418 (0x58a), region = 40 }
  0x13   : > { %p218_p10 = scmp.lt.s32.totalorder %s5321_s22, 1  ;;  %vm321_vm0 = vcmask 1041408   ;;  %v5366_v8 = vld [vmem:[%s7281_s1 + $0x20] sm:$0xff]  ;;  %vm296_vm1 = vcmask 31744   ;;  %s5261_s12 = smov 127   ;;  %v5375_v18 = vld [vmem:[%s7281_s1 + $0x28] sm:$0xff] }
  0x14   : > { %s5262_s15 = smov 126   ;;  %v5061_v20 = vld [vmem:[%s7281_s1] sm:$0xff]  ;;  %v5392_v26 = vld [vmem:[%s7281_s1 + $0x30] sm:$0xff]  ;;  %v5062_v29 = vld [vmem:[%s7281_s1 + $0x8] sm:$0xff]  ;;  %s5263_s13 = smov 110   ;;  %vm609_vm2 = vcmask 1039360  }
  0x15   : > { %s219_s30 = scalar_select %p218_p10, %s5321_s22, 1  ;;  %v5407_v31 = vld [vmem:[%s7281_s1 + $0x38] sm:$0xff]  ;;  %v5063_v32 = vld [vmem:[%s7281_s1 + $0x10] sm:$0xff]  ;;  %v5069_v40 = vld [vmem:[%s7281_s1 + $0x40] sm:$0xff]  ;;  %vm1018_vm3 = vcmask 1031168   ;;  %vm480_vm4 = vcmask 261120  }
  0x16   : > { %v5064_v33 = vld [vmem:[%s7281_s1 + $0x18] sm:$0xff]  ;;  %v5070_v56 = vld [vmem:[%s7281_s1 + $0x48] sm:$0xff]  ;;  %v5071_v62 = vld [vmem:[%s7281_s1 + $0x50] sm:$0xff]  ;;  %vm1427_vm5 = vcmask 900096   ;;  %s5264_s25 = smov 109   ;;  %vm1836_vm6 = vcmask 891904  }
  0x17   : > { %s5144_s6 = smul.u32 12, %s219_s30  ;;  %s5265_s23 = smov 108   ;;  %vm2245_vm7 = vcmask 883712   ;;  %vm2654_vm8 = vcmask 752640   ;;  %vm3063_vm9 = vcmask 744448   ;;  %vm3472_vm10 = vcmask 736256  }
  0x18   : > { %s5266_s7 = smov 92   ;;  %s5217_s10 = scalar_lea.hbm %s7285_s5, 48 }
  0x19   : > { %s5353_s9 = scalar_lea.vmem %s7280_s0, %s5144_s6  ;;  %s215_s6 = sand.u32 1, %s5251_s19  }
  0x1a   : > { %v5356_v0 = vld [vmem:[%s5353_s9] sm:$0xff]  ;;  %v225_v1 = vld [vmem:[%s5353_s9 + $0x8] sm:$0xf] }
  0x1b   : > { %228 = vst [vmem:[#allocation1] ss:$2 sm:$0xff] %v5356_v0  ;;  %v528_v2 = vld [vmem:[%s5353_s9 + $0x8] sm:$0xf] }
  0x1c   : > { %230 = vst [vmem:[#allocation1 + $0x10] ss:$2 sm:$0xff] %v225_v1  ;;  %v937_v9 = vld [vmem:[%s5353_s9 + $0x8] sm:$0xf]  ;;  %v5072_v1 = vld [vmem:[%s7281_s1 + $0x58] sm:$0xff] }
  0x1d   : > { %v1346_v28 = vld [vmem:[%s5353_s9 + $0x8] sm:$0xf] }
  0x1e   : > { %v1755_v59 = vld [vmem:[%s5353_s9 + $0x8] sm:$0xf] }
  0x22   : > { %v231_v3 = vld.sshfl [vmem:[#allocation1] sm:$0xff pattern:$0x75316420]  ;;  %v232_v4 = vld.sshfl [vmem:[#allocation1 + $0x8] sm:$0xff pattern:$0x75316420] }
  0x23   : > { %v237_v5 = vpack.c.bf16 %v231_v3, %v231_v3  ;;  %531 = vst [vmem:[#allocation1] ss:$2 sm:$0xff] %v5356_v0  ;;  %v233_v6 = vld.sshfl [vmem:[#allocation1 + $0x10] sm:$0xff pattern:$0x75316420]  ;;  %v238_v19 = vpack.c.bf16 %v232_v4, %v232_v4 }
  0x24   : > { %533 = vst [vmem:[#allocation1 + $0x10] ss:$2 sm:$0xff] %v528_v2  ;;  %v239_v22 = vpack.c.bf16 %v233_v6, %v233_v6 }
  0x25   : > { %v323_v7 = vsel %vm321_vm0, %v237_v5, 0  ;;  %v326_v24 = vsel %vm321_vm0, %v238_v19, 0 }
  0x26   : > { %5141 = vmatpush.bf16.msra.mxu2 %v323_v7  ;;  %338 = vmatpush.bf16.msra.mxu0 %v323_v7  ;;  %v329_v25 = vsel %vm321_vm0, %v239_v22, 0 }
  0x27   : > { %387 = vmatpush.bf16.msra.mxu1 %v326_v24  ;;  %5142 = vmatpush.bf16.msra.mxu3 %v326_v24 }
  0x29   : > { %4430 = vmatmul.msk.bf16.vlgmr.msra.gmra.mxu2 %vm296_vm1, %v5366_v8  ;;  %4426 = vmatmul.msk.bf16.vlgmr.msra.gmra.mxu0 %vm296_vm1, %v5061_v20 }
  0x2a   : > { %v534_v10 = vld.sshfl [vmem:[#allocation1] sm:$0xff pattern:$0x75316420]  ;;  %v535_v11 = vld.sshfl [vmem:[#allocation1 + $0x8] sm:$0xff pattern:$0x75316420]  ;;  %436 = vmatpush.bf16.msrb.mxu2 %v329_v25  ;;  %4434 = vmatmul.msk.bf16.vlgmr.msra.gmra.mxu1 %vm296_vm1, %v5061_v20 }
  0x2b   : > { %v536_v12 = vld.sshfl [vmem:[#allocation1 + $0x10] sm:$0xff pattern:$0x75316420]  ;;  %v540_v13 = vpack.c.bf16 %v534_v10, %v534_v10  ;;  %940 = vst [vmem:[#allocation1] ss:$2 sm:$0xff] %v5356_v0  ;;  %v541_v15 = vpack.c.bf16 %v535_v11, %v535_v11  ;;  %4438 = vmatmul.msk.bf16.vlgmr.msra.gmra.mxu3 %vm296_vm1, %v5366_v8  ;;  %v5505_v11 = vld [vmem:[%s7281_s1 + $0x80] sm:$0xff] }
  0x2c   : > { %v542_v14 = vpack.c.bf16 %v536_v12, %v536_v12  ;;  %942 = vst [vmem:[#allocation1 + $0x10] ss:$2 sm:$0xff] %v937_v9 }
  0x2d   : > { %603 = vrot.lane.b32.xlu0 %v540_v13, %s5261_s12 }
  0x2e   : > { %607 = vrot.lane.b32.xlu1 %v542_v14, %s5261_s12 }
  0x32   : > { %v943_v16 = vld.sshfl [vmem:[#allocation1] sm:$0xff pattern:$0x75316420]  ;;  %v944_v21 = vld.sshfl [vmem:[#allocation1 + $0x8] sm:$0xff pattern:$0x75316420] }
  0x33   : > { %v949_v17 = vpack.c.bf16 %v943_v16, %v943_v16  ;;  %v950_v23 = vpack.c.bf16 %v944_v21, %v944_v21  ;;  %1349 = vst [vmem:[#allocation1] ss:$2 sm:$0xff] %v5356_v0  ;;  %v945_v27 = vld.sshfl [vmem:[#allocation1 + $0x10] sm:$0xff pattern:$0x75316420] }
  0x34   : > { %v951_v30 = vpack.c.bf16 %v945_v27, %v945_v27  ;;  %1351 = vst [vmem:[#allocation1 + $0x10] ss:$2 sm:$0xff] %v1346_v28  ;;  %v5075_v28 = vld [vmem:[%s7281_s1 + $0x70] sm:$0xff] }
  0x35   : > { %605 = vrot.lane.b32.xlu0 %v541_v15, %s5261_s12  ;;  %1014 = vrot.lane.b32.xlu2 %v950_v23, %s5262_s15 }
  0x36   : > { %1012 = vrot.lane.b32.xlu1 %v949_v17, %s5262_s15  ;;  %v5074_v17 = vld [vmem:[%s7281_s1 + $0x68] sm:$0xff] }
  0x39   : > { %4431 = vmatmul.msk.bf16.gmra.mxu2 %vm296_vm1, %v5375_v18  ;;  %4427 = vmatmul.msk.bf16.gmra.mxu0 %vm296_vm1, %v5062_v29 }
  0x3a   : > { %4435 = vmatmul.msk.bf16.gmra.mxu1 %vm296_vm1, %v5062_v29  ;;  %v1353_v34 = vld.sshfl [vmem:[#allocation1 + $0x8] sm:$0xff pattern:$0x75316420]  ;;  %v1352_v41 = vld.sshfl [vmem:[#allocation1] sm:$0xff pattern:$0x75316420] }
  0x3b   : > { %4439 = vmatmul.msk.bf16.gmra.mxu3 %vm296_vm1, %v5375_v18  ;;  %v1359_v35 = vpack.c.bf16 %v1353_v34, %v1353_v34  ;;  %v1358_v42 = vpack.c.bf16 %v1352_v41, %v1352_v41  ;;  %1758 = vst [vmem:[#allocation1] ss:$2 sm:$0xff] %v5356_v0  ;;  %v1354_v58 = vld.sshfl [vmem:[#allocation1 + $0x10] sm:$0xff pattern:$0x75316420] }
  0x3c   : > { %v1360_v60 = vpack.c.bf16 %v1354_v58, %v1354_v58  ;;  %1760 = vst [vmem:[#allocation1 + $0x10] ss:$2 sm:$0xff] %v1755_v59 }
  0x3d   : > { %1016 = vrot.lane.b32.xlu2 %v951_v30, %s5262_s15  ;;  %1423 = vrot.lane.b32.xlu0 %v1359_v35, %s5263_s13 }
  0x3e   : > { %1425 = vrot.lane.b32.xlu1 %v1360_v60, %s5263_s13  ;;  %v5611_v60 = vld [vmem:[%s7281_s1 + $0xa0] sm:$0xff] }
  0x42   : > { %v1762_v35 = vld.sshfl [vmem:[#allocation1 + $0x8] sm:$0xff pattern:$0x75316420] }
  0x45   : > { %1421 = vrot.lane.b32.xlu2 %v1358_v42, %s5263_s13  ;;  %v1761_v42 = vld.sshfl [vmem:[#allocation1] sm:$0xff pattern:$0x75316420]  ;;  %s5145_s13 = smul.u32 24, %s5321_s22 }
  0x47   : > { %s4325_s16 = scalar_lea.hbm %s7285_s5, %s5145_s13 }
  0x49   : > { %4432 = vmatmul.msk.bf16.gmra.mxu2 %vm296_vm1, %v5392_v26  ;;  %4428 = vmatmul.msk.bf16.gmra.mxu0 %vm296_vm1, %v5063_v32 }
  0x4a   : > { %4436 = vmatmul.msk.bf16.gmra.mxu1 %vm296_vm1, %v5063_v32 }
  0x4b   : > { %4440 = vmatmul.msk.bf16.gmra.mxu3 %vm296_vm1, %v5392_v26 }
  0x59   : > { %4433 = vmatmul.msk.bf16.gmra.mxu2 %vm296_vm1, %v5407_v31  ;;  %4429 = vmatmul.msk.bf16.gmra.mxu0 %vm296_vm1, %v5064_v33 }
  0x5a   : > { %4437 = vmatmul.msk.bf16.gmra.mxu1 %vm296_vm1, %v5064_v33 }
  0x5b   : > { %4441 = vmatmul.msk.bf16.gmra.mxu3 %vm296_vm1, %v5407_v31 }
  0x69   : > { %4442 = vmatmul.msk.bf16.vlgmr.msrb.gmra.mxu2 %vm296_vm1, %v5061_v20  ;;  %v5530_v20 = vld [vmem:[%s7281_s1 + $0x88] sm:$0xff] }
  0x79   : > { %4443 = vmatmul.msk.bf16.gmra.mxu2 %vm296_vm1, %v5062_v29 }
  0x89   : > { %4444 = vmatmul.msk.bf16.gmra.mxu2 %vm296_vm1, %v5063_v32 }
  0x8f   : > { %v1015_v36 = vpop.permute.xlu2 %1014 }
  0x97   : > { %v1017_v43 = vpop.permute.xlu2 %1016 }
  0x98   : > { %v1020_v45 = vsel %vm1018_vm3, %v1015_v36, %v1017_v43  ;;  %v1052_v52 = vsel %vm321_vm0, %v1017_v43, 0 }
  0x99   : > { %4445 = vmatmul.msk.bf16.gmra.mxu2 %vm296_vm1, %v5064_v33  ;;  %v1049_v48 = vsel %vm321_vm0, %v1020_v45, 0  ;;  %v5560_v33 = vld [vmem:[%s7281_s1 + $0x90] sm:$0xff]  ;;  %v5584_v45 = vld [vmem:[%s7281_s1 + $0x98] sm:$0xff] }
  0x9f   : > { %v604_v37 = vpop.permute.xlu0 %603  ;;  %v1422_v25 = vpop.permute.xlu2 %1421 }
  0xa0   : > { %v608_v38 = vpop.permute.xlu1 %607 }
  0xa1   : > { %v643_v39 = vsel %vm321_vm0, %v608_v38, 0 }
  0xa2   : > { %750 = vmatpush.bf16.msrb.mxu1 %v643_v39 }
  0xa5   : > { %4514 = vmatmul.msk.bf16.vlgmr.msrb.gmra.mxu1 %vm296_vm1, %v5069_v40 }
  0xa6   : > { %v5484_v4 = vpop.f32.mrf.mxu0 }
  0xa7   : > { %v606_v44 = vpop.permute.xlu0 %605  ;;  %v5477_v2 = vpop.f32.mrf.mxu1 }
  0xa8   : > { %v610_v46 = vsel %vm609_vm2, %v604_v37, %v606_v44  ;;  %v611_v47 = vsel %vm609_vm2, %v606_v44, %v608_v38  ;;  %v1013_v49 = vpop.permute.xlu1 %1012  ;;  %v1767_v44 = vpack.c.bf16 %v1761_v42, %v1761_v42 }
  0xa9   : > { %4446 = vmatmul.msk.bf16.gmra.mxu2 %vm296_vm1, %v5366_v8  ;;  %v637_v50 = vsel %vm321_vm0, %v610_v46, 0  ;;  %v640_v51 = vsel %vm321_vm0, %v611_v47, 0  ;;  %v1019_v53 = vsel %vm1018_vm3, %v1013_v49, %v1015_v36  ;;  %v5073_v8 = vld [vmem:[%s7281_s1 + $0x60] sm:$0xff]  ;;  %v1768_v36 = vpack.c.bf16 %v1762_v35, %v1762_v35 }
  0xaa   : > { %652 = vmatpush.bf16.msrb.mxu3 %v637_v50  ;;  %701 = vmatpush.bf16.msrb.mxu0 %v640_v51  ;;  %v1046_v54 = vsel %vm321_vm0, %v1019_v53, 0  ;;  %v5603_v51 = vld [vmem:[%s7281_s1 + $0xc0] sm:$0xff] }
  0xab   : > { %1061 = vmatpush.bf16.msra.mxu2 %v1046_v54  ;;  %1832 = vrot.lane.b32.xlu1 %v1768_v36, %s5264_s25  ;;  %v1763_v54 = vld.sshfl [vmem:[#allocation1 + $0x10] sm:$0xff pattern:$0x75316420] }
  0xac   : > { %v5444_v55 = vpop.f32.mrf.mxu2  ;;  %1830 = vrot.lane.b32.xlu0 %v1767_v44, %s5264_s25  ;;  %v1769_v58 = vpack.c.bf16 %v1763_v54, %v1763_v54 }
  0xad   : > { %4498 = vmatmul.msk.bf16.vlgmr.msrb.gmra.mxu3 %vm296_vm1, %v5069_v40  ;;  %4506 = vmatmul.msk.bf16.vlgmr.msrb.gmra.mxu0 %vm296_vm1, %v5069_v40  ;;  %v5076_v40 = vld [vmem:[%s7281_s1 + $0x78] sm:$0xff] }
  0xae   : > { %1110 = vmatpush.bf16.msra.mxu3 %v1049_v48  ;;  %1159 = vmatpush.bf16.msra.mxu0 %v1052_v52  ;;  %v5492_v7 = vpop.f32.mrf.mxu3  ;;  %v5499_v10 = vpop.f32.mrf.mxu0 }
  0xaf   : > { %v5488_v6 = vpop.f32.mrf.mxu1  ;;  %1834 = vrot.lane.b32.xlu2 %v1769_v58, %s5264_s25  ;;  %v5667_v58 = vld [vmem:[%s7281_s1 + $0xd0] sm:$0xff]  ;;  %s5267_s25 = smov 91  }
  0xb4   : > { %v5451_v57 = vpop.f32.mrf.mxu2 }
  0xb5   : > { %4515 = vmatmul.msk.bf16.gmra.mxu1 %vm296_vm1, %v5070_v56 }
  0xb6   : > { %v5511_v13 = vpop.f32.mrf.mxu3  ;;  %v5516_v15 = vpop.f32.mrf.mxu0 }
  0xb7   : > { %v5507_v12 = vpop.f32.mrf.mxu1 }
  0xb9   : > { %4447 = vmatmul.msk.bf16.gmra.mxu2 %vm296_vm1, %v5375_v18 }
  0xbc   : > { %v5458_v61 = vpop.f32.mrf.mxu2 }
  0xbd   : > { %4499 = vmatmul.msk.bf16.gmra.mxu3 %vm296_vm1, %v5070_v56  ;;  %4507 = vmatmul.msk.bf16.gmra.mxu0 %vm296_vm1, %v5070_v56 }
  0xbe   : > { %v5523_v19 = vpop.f32.mrf.mxu3  ;;  %v5532_v21 = vpop.f32.mrf.mxu0 }
  0xbf   : > { %v5518_v16 = vpop.f32.mrf.mxu1  ;;  %7292 = vst [vmem:[#allocation6_spill] sm:$0xff] %v5523_v19 }
  0xc4   : > { %v5465_v63 = vpop.f32.mrf.mxu2 }
  0xc5   : > { %4516 = vmatmul.msk.bf16.gmra.mxu1 %vm296_vm1, %v5071_v62 }
  0xc6   : > { %v5541_v24 = vpop.f32.mrf.mxu3  ;;  %v5551_v30 = vpop.f32.mrf.mxu0 }
  0xc7   : > { %v5536_v22 = vpop.f32.mrf.mxu1  ;;  %7293 = vst [vmem:[#allocation7_spill] sm:$0xff] %v5541_v24 }
  0xc9   : > { %4448 = vmatmul.msk.bf16.gmra.mxu2 %vm296_vm1, %v5392_v26  ;;  %v5543_v26 = vpop.permute.xlu0 %1423 }
  0xca   : > { %v1428_v27 = vsel %vm1427_vm5, %v1422_v25, %v5543_v26 }
  0xcb   : > { %v1455_v29 = vsel %vm321_vm0, %v1428_v27, 0 }
  0xcc   : > { %v5470_v0 = vpop.f32.mrf.mxu2  ;;  %1470 = vmatpush.bf16.msra.mxu1 %v1455_v29 }
  0xcd   : > { %4500 = vmatmul.msk.bf16.gmra.mxu3 %vm296_vm1, %v5071_v62  ;;  %4508 = vmatmul.msk.bf16.gmra.mxu0 %vm296_vm1, %v5071_v62  ;;  %v2164_v62 = vld [vmem:[%s5353_s9 + $0x8] sm:$0xf] }
  0xce   : > { %v5562_v34 = vpop.f32.mrf.mxu3  ;;  %v5566_v38 = vpop.f32.mrf.mxu0  ;;  %2169 = vst [vmem:[#allocation1 + $0x10] ss:$2 sm:$0xff] %v2164_v62 }
  0xcf   : > { %v5553_v32 = vpop.f32.mrf.mxu1  ;;  %7294 = vst [vmem:[#allocation8_spill] sm:$0xff] %v5562_v34 }
  0xd4   : > { %v5479_v3 = vpop.f32.mrf.mxu2 }
  0xd5   : > { %4517 = vmatmul.msk.bf16.gmra.mxu1 %vm296_vm1, %v5072_v1 }
  0xd6   : > { %v5577_v41 = vpop.f32.mrf.mxu3  ;;  %v5586_v46 = vpop.f32.mrf.mxu0 }
  0xd7   : > { %v5571_v39 = vpop.f32.mrf.mxu1  ;;  %7295 = vst [vmem:[#allocation9_spill] sm:$0xff] %v5577_v41 }
  0xd9   : > { %4449 = vmatmul.msk.bf16.gmra.mxu2 %vm296_vm1, %v5407_v31 }
  0xdc   : > { %v5486_v5 = vpop.f32.mrf.mxu2 }
  0xdd   : > { %4501 = vmatmul.msk.bf16.gmra.mxu3 %vm296_vm1, %v5072_v1  ;;  %4509 = vmatmul.msk.bf16.gmra.mxu0 %vm296_vm1, %v5072_v1 }
  0xde   : > { %v5593_v49 = vpop.f32.mrf.mxu3  ;;  %v5598_v50 = vpop.f32.mrf.mxu0 }
  0xdf   : > { %v5589_v47 = vpop.f32.mrf.mxu1  ;;  %7296 = vst [vmem:[#allocation10_spill] sm:$0xff] %v5593_v49 }
  0xe4   : > { %v5497_v9 = vpop.f32.mrf.mxu2 }
  0xe5   : > { %4518 = vmatmul.msk.bf16.gmra.mxu1 %vm296_vm1, %v5073_v8 }
  0xe6   : > { %v5616_v1 = vpop.f32.mrf.mxu3 }
  0xe7   : > { %7297 = vst [vmem:[#allocation11_spill] sm:$0xff] %v5616_v1 }
  0xe9   : > { %4570 = vmatmul.msk.bf16.vlgmr.msra.gmra.mxu2 %vm296_vm1, %v5505_v11 }
  0xec   : > { %v438_v14 = vpop.f32.mrf.mxu2 }
  0xed   : > { %481 = vst.msk [vmem:[#allocation2 + $0x10] sm:$0xff] %vm480_vm4, %v438_v14  ;;  %4502 = vmatmul.msk.bf16.gmra.mxu3 %vm296_vm1, %v5073_v8  ;;  %4510 = vmatmul.msk.bf16.gmra.mxu0 %vm296_vm1, %v5073_v8 }
  0xf4   : > { %v440_v18 = vpop.f32.mrf.mxu2  ;;  %v794_v53 = vld [vmem:[#allocation2 + $0x10] sm:$0xff] }
  0xf5   : > { %484 = vst.msk [vmem:[#allocation2 + $0x28] sm:$0xff] %vm480_vm4, %v440_v18  ;;  %4519 = vmatmul.msk.bf16.gmra.mxu1 %vm296_vm1, %v5074_v17 }
  0xf9   : > { %4571 = vmatmul.msk.bf16.gmra.mxu2 %vm296_vm1, %v5530_v20 }
  0xfc   : > { %v443_v23 = vpop.f32.mrf.mxu2  ;;  %v797_v14 = vld [vmem:[#allocation2 + $0x28] sm:$0xff] }
  0xfd   : > { %487 = vst.msk [vmem:[#allocation2 + $0x40] sm:$0xff] %vm480_vm4, %v443_v23  ;;  %4503 = vmatmul.msk.bf16.gmra.mxu3 %vm296_vm1, %v5074_v17  ;;  %4511 = vmatmul.msk.bf16.gmra.mxu0 %vm296_vm1, %v5074_v17  ;;  %v1426_v23 = vpop.permute.xlu1 %1425 }
  0xfe   : > { %v1429_v27 = vsel %vm1427_vm5, %v5543_v26, %v1426_v23  ;;  %v5637_v26 = vld [vmem:[%s7281_s1 + $0xc8] sm:$0xff] }
  0xff   : > { %v1458_v29 = vsel %vm321_vm0, %v1429_v27, 0 }
 0x100   : > { %1519 = vmatpush.bf16.msrb.mxu2 %v1458_v29 }
 0x104   : > { %v445_v31 = vpop.f32.mrf.mxu2  ;;  %v800_v36 = vld [vmem:[#allocation2 + $0x40] sm:$0xff] }
 0x105   : > { %490 = vst.msk [vmem:[#allocation2 + $0x58] sm:$0xff] %vm480_vm4, %v445_v31  ;;  %4520 = vmatmul.msk.bf16.gmra.mxu1 %vm296_vm1, %v5075_v28 }
 0x109   : > { %4572 = vmatmul.msk.bf16.gmra.mxu2 %vm296_vm1, %v5560_v33 }
 0x10c   : > { %v448_v37 = vpop.f32.mrf.mxu2 }
 0x10d   : > { %493 = vst.msk [vmem:[#allocation2 + $0x70] sm:$0xff] %vm480_vm4, %v448_v37  ;;  %4504 = vmatmul.msk.bf16.gmra.mxu3 %vm296_vm1, %v5075_v28  ;;  %4512 = vmatmul.msk.bf16.gmra.mxu0 %vm296_vm1, %v5075_v28  ;;  %v1461_v28 = vsel %vm321_vm0, %v1426_v23, 0 }
 0x10e   : > { %1568 = vmatpush.bf16.msrb.mxu3 %v1461_v28 }
 0x114   : > { %v450_v43 = vpop.f32.mrf.mxu2  ;;  %v806_v62 = vld [vmem:[#allocation2 + $0x70] sm:$0xff] }
 0x115   : > { %496 = vst.msk [vmem:[#allocation2 + $0x88] sm:$0xff] %vm480_vm4, %v450_v43  ;;  %4521 = vmatmul.msk.bf16.gmra.mxu1 %vm296_vm1, %v5076_v40 }
 0x119   : > { %4573 = vmatmul.msk.bf16.gmra.mxu2 %vm296_vm1, %v5584_v45 }
 0x11c   : > { %v453_v48 = vpop.f32.mrf.mxu2  ;;  %v809_v27 = vld [vmem:[#allocation2 + $0x88] sm:$0xff] }
 0x11d   : > { %499 = vst.msk [vmem:[#allocation2 + $0xa0] sm:$0xff] %vm480_vm4, %v453_v48  ;;  %4505 = vmatmul.msk.bf16.gmra.mxu3 %vm296_vm1, %v5076_v40  ;;  %4513 = vmatmul.msk.bf16.gmra.mxu0 %vm296_vm1, %v5076_v40  ;;  %v803_v48 = vld [vmem:[#allocation2 + $0x58] sm:$0xff]  ;;  %v1833_v24 = vpop.permute.xlu1 %1832 }
 0x122   : > { %v752_v52 = vpop.f32.mrf.mxu1 }
 0x123   : > { %v842_v56 = vadd.f32 %v794_v53, %v752_v52 }
 0x124   : > { %v455_v59 = vpop.f32.mrf.mxu2 }
 0x125   : > { %890 = vst.msk [vmem:[#allocation2 + $0x10] sm:$0xff] %vm480_vm4, %v842_v56  ;;  %4642 = vmatmul.msk.bf16.vlgmr.msra.gmra.mxu1 %vm296_vm1, %v5603_v51 }
 0x126   : > { %502 = vst.msk [vmem:[#allocation2 + $0xb8] sm:$0xff] %vm480_vm4, %v455_v59 }
 0x129   : > { %4574 = vmatmul.msk.bf16.gmra.mxu2 %vm296_vm1, %v5611_v60 }
 0x12a   : > { %v754_v8 = vpop.f32.mrf.mxu1  ;;  %v5620_v17 = vpop.f32.mrf.mxu0 }
 0x12b   : > { %v845_v18 = vadd.f32 %v797_v14, %v754_v8 }
 0x12c   : > { %v458_v25 = vpop.f32.mrf.mxu2 }
 0x12d   : > { %893 = vst.msk [vmem:[#allocation2 + $0x28] sm:$0xff] %vm480_vm4, %v845_v18  ;;  %4578 = vmatmul.msk.bf16.vlgmr.msra.gmra.mxu3 %vm296_vm1, %v5505_v11  ;;  %4586 = vmatmul.msk.bf16.vlgmr.msra.gmra.mxu0 %vm296_vm1, %v5505_v11  ;;  %v5647_v11 = vld [vmem:[%s7281_s1 + $0xa8] sm:$0xff] }
 0x12e   : > { %505 = vst.msk [vmem:[#allocation2 + $0xd0] sm:$0xff] %vm480_vm4, %v458_v25 }
 0x130   : > { %v5632_v31 = vpop.f32.mrf.mxu3 }
 0x132   : > { %v757_v35 = vpop.f32.mrf.mxu1  ;;  %v5639_v37 = vpop.f32.mrf.mxu0 }
 0x133   : > { %v848_v40 = vadd.f32 %v800_v36, %v757_v35 }
 0x134   : > { %v460_v42 = vpop.f32.mrf.mxu2 }
 0x135   : > { %896 = vst.msk [vmem:[#allocation2 + $0x40] sm:$0xff] %vm480_vm4, %v848_v40  ;;  %4643 = vmatmul.msk.bf16.gmra.mxu1 %vm296_vm1, %v5637_v26  ;;  %v5697_v40 = vld [vmem:[%s7281_s1 + $0xd8] sm:$0xff] }
 0x136   : > { %508 = vst.msk [vmem:[#allocation2 + $0xe8] sm:$0xff] %vm480_vm4, %v460_v42 }
 0x138   : > { %v5650_v43 = vpop.f32.mrf.mxu3 }
 0x139   : > { %4575 = vmatmul.msk.bf16.gmra.mxu2 %vm296_vm1, %v5647_v11 }
 0x13a   : > { %v759_v44 = vpop.f32.mrf.mxu1  ;;  %v5654_v52 = vpop.f32.mrf.mxu0 }
 0x13b   : > { %v851_v53 = vadd.f32 %v803_v48, %v759_v44  ;;  %v812_v44 = vld [vmem:[#allocation2 + $0xa0] sm:$0xff] }
 0x13c   : > { %v463_v54 = vpop.f32.mrf.mxu2 }
 0x13d   : > { %899 = vst.msk [vmem:[#allocation2 + $0x58] sm:$0xff] %vm480_vm4, %v851_v53  ;;  %4579 = vmatmul.msk.bf16.gmra.mxu3 %vm296_vm1, %v5530_v20  ;;  %4587 = vmatmul.msk.bf16.gmra.mxu0 %vm296_vm1, %v5530_v20  ;;  %v5677_v20 = vld [vmem:[%s7281_s1 + $0xb0] sm:$0xff] }
 0x13e   : > { %511 = vst.msk [vmem:[#allocation2 + $0x100] sm:$0xff] %vm480_vm4, %v463_v54 }
 0x140   : > { %v5662_v56 = vpop.f32.mrf.mxu3 }
 0x142   : > { %v762_v59 = vpop.f32.mrf.mxu1  ;;  %v5669_v8 = vpop.f32.mrf.mxu0 }
 0x143   : > { %v854_v14 = vadd.f32 %v806_v62, %v762_v59 }
 0x144   : > { %v465_v18 = vpop.f32.mrf.mxu2 }
 0x145   : > { %902 = vst.msk [vmem:[#allocation2 + $0x70] sm:$0xff] %vm480_vm4, %v854_v14  ;;  %4644 = vmatmul.msk.bf16.gmra.mxu1 %vm296_vm1, %v5667_v58  ;;  %v815_v14 = vld [vmem:[#allocation2 + $0xb8] sm:$0xff] }
 0x146   : > { %514 = vst.msk [vmem:[#allocation2 + $0x118] sm:$0xff] %vm480_vm4, %v465_v18 }
 0x148   : > { %v5680_v23 = vpop.f32.mrf.mxu3 }
 0x149   : > { %4576 = vmatmul.msk.bf16.gmra.mxu2 %vm296_vm1, %v5677_v20 }
 0x14a   : > { %v764_v25 = vpop.f32.mrf.mxu1  ;;  %v5684_v28 = vpop.f32.mrf.mxu0 }
 0x14b   : > { %v857_v29 = vadd.f32 %v809_v27, %v764_v25 }
 0x14c   : > { %v468_v35 = vpop.f32.mrf.mxu2 }
 0x14d   : > { %905 = vst.msk [vmem:[#allocation2 + $0x88] sm:$0xff] %vm480_vm4, %v857_v29  ;;  %4580 = vmatmul.msk.bf16.gmra.mxu3 %vm296_vm1, %v5560_v33  ;;  %4588 = vmatmul.msk.bf16.gmra.mxu0 %vm296_vm1, %v5560_v33  ;;  %v5707_v33 = vld [vmem:[%s7281_s1 + $0xb8] sm:$0xff]  ;;  %v827_v41 = vld [vmem:[#allocation2 + $0x118] sm:$0xff] }
 0x14e   : > { %517 = vst.msk [vmem:[#allocation2 + $0x130] sm:$0xff] %vm480_vm4, %v468_v35  ;;  %v5727_v35 = vld [vmem:[%s7281_s1 + $0xe0] sm:$0xff] }
 0x150   : > { %v5692_v36 = vpop.f32.mrf.mxu3 }
 0x152   : > { %v767_v42 = vpop.f32.mrf.mxu1  ;;  %v5699_v48 = vpop.f32.mrf.mxu0 }
 0x153   : > { %v860_v53 = vadd.f32 %v812_v44, %v767_v42  ;;  %v818_v44 = vld [vmem:[#allocation2 + $0xd0] sm:$0xff] }
 0x154   : > { %v470_v54 = vpop.f32.mrf.mxu2 }
 0x155   : > { %908 = vst.msk [vmem:[#allocation2 + $0xa0] sm:$0xff] %vm480_vm4, %v860_v53  ;;  %4645 = vmatmul.msk.bf16.gmra.mxu1 %vm296_vm1, %v5697_v40 }
 0x156   : > { %520 = vst.msk [vmem:[#allocation2 + $0x148] sm:$0xff] %vm480_vm4, %v470_v54 }
 0x158   : > { %v5710_v59 = vpop.f32.mrf.mxu3 }
 0x159   : > { %4577 = vmatmul.msk.bf16.gmra.mxu2 %vm296_vm1, %v5707_v33 }
 0x15a   : > { %v769_v62 = vpop.f32.mrf.mxu1  ;;  %v5714_v18 = vpop.f32.mrf.mxu0 }
 0x15b   : > { %v863_v25 = vadd.f32 %v815_v14, %v769_v62 }
 0x15c   : > { %v473_v27 = vpop.f32.mrf.mxu2 }
 0x15d   : > { %911 = vst.msk [vmem:[#allocation2 + $0xb8] sm:$0xff] %vm480_vm4, %v863_v25  ;;  %4581 = vmatmul.msk.bf16.gmra.mxu3 %vm296_vm1, %v5584_v45  ;;  %4589 = vmatmul.msk.bf16.gmra.mxu0 %vm296_vm1, %v5584_v45 }
 0x15e   : > { %523 = vst.msk [vmem:[#allocation2 + $0x160] sm:$0xff] %vm480_vm4, %v473_v27  ;;  %v821_v27 = vld [vmem:[#allocation2 + $0xe8] sm:$0xff] }
 0x160   : > { %v5722_v29 = vpop.f32.mrf.mxu3 }
 0x162   : > { %v772_v42 = vpop.f32.mrf.mxu1  ;;  %v5729_v53 = vpop.f32.mrf.mxu0 }
 0x163   : > { %v866_v54 = vadd.f32 %v818_v44, %v772_v42  ;;  %v840_v42 = vadd.f32 %v5632_v31, %v5484_v4  ;;  %v824_v31 = vld [vmem:[#allocation2 + $0x100] sm:$0xff] }
 0x164   : > { %v475_v62 = vpop.f32.mrf.mxu2 }
 0x165   : > { %914 = vst.msk [vmem:[#allocation2 + $0xd0] sm:$0xff] %vm480_vm4, %v866_v54  ;;  %4646 = vmatmul.msk.bf16.gmra.mxu1 %vm296_vm1, %v5727_v35 }
 0x166   : > { %526 = vst.msk [vmem:[#allocation2 + $0x178] sm:$0xff] %vm480_vm4, %v475_v62  ;;  %v5756_v62 = vld [vmem:[%s7281_s1 + $0xe8] sm:$0xff] }
 0x168   : > { %v671_v45 = vpop.f32.mrf.mxu3 }
 0x169   : > { %v5736_v14 = vadd.f32 %v671_v45, %v5598_v50  ;;  %4650 = vmatmul.msk.bf16.vlgmr.msrb.gmra.mxu2 %vm296_vm1, %v5603_v51 }
 0x16a   : > { %v774_v25 = vpop.f32.mrf.mxu1  ;;  %v5740_v1 = vpop.f32.mrf.mxu0 }
 0x16b   : > { %v869_v44 = vadd.f32 %v821_v27, %v774_v25  ;;  %v843_v25 = vadd.f32 %v5650_v43, %v5499_v10  ;;  %v846_v10 = vadd.f32 %v5662_v56, %v5516_v15  ;;  %v5788_v15 = vld [vmem:[%s7281_s1 + $0xf0] sm:$0xff] }
 0x16c   : > { %v1063_v54 = vpop.f32.mrf.mxu2 }
 0x16d   : > { %917 = vst.msk [vmem:[#allocation2 + $0xe8] sm:$0xff] %vm480_vm4, %v869_v44  ;;  %v5745_v49 = vadd.f32 %v1063_v54, %v840_v42  ;;  %4582 = vmatmul.msk.bf16.gmra.mxu3 %vm296_vm1, %v5611_v60  ;;  %4590 = vmatmul.msk.bf16.gmra.mxu0 %vm296_vm1, %v5611_v60 }
 0x170   : > { %v5751_v50 = vpop.f32.mrf.mxu3 }
 0x172   : > { %v777_v4 = vpop.f32.mrf.mxu1  ;;  %v5758_v45 = vpop.f32.mrf.mxu0 }
 0x173   : > { %v872_v27 = vadd.f32 %v824_v31, %v777_v4 }
 0x174   : > { %v1065_v42 = vpop.f32.mrf.mxu2 }
 0x175   : > { %920 = vst.msk [vmem:[#allocation2 + $0x100] sm:$0xff] %vm480_vm4, %v872_v27  ;;  %v5763_v44 = vadd.f32 %v1065_v42, %v843_v25  ;;  %4647 = vmatmul.msk.bf16.gmra.mxu1 %vm296_vm1, %v5756_v62  ;;  %v1835_v25 = vpop.permute.xlu2 %1834 }
 0x176   : > { %v1870_v42 = vsel %vm321_vm0, %v1835_v25, 0 }
 0x177   : > { %1977 = vmatpush.bf16.msra.mxu2 %v1870_v42  ;;  %v1831_v42 = vpop.permute.xlu0 %1830 }
 0x178   : > { %v5767_v60 = vpop.f32.mrf.mxu3 }
 0x179   : > { %4651 = vmatmul.msk.bf16.gmra.mxu2 %vm296_vm1, %v5637_v26 }
 0x17a   : > { %v779_v54 = vpop.f32.mrf.mxu1  ;;  %v5771_v34 = vpop.f32.mrf.mxu0 }
 0x17b   : > { %7298 = vst [vmem:[#allocation12_spill] sm:$0xff] %v5771_v34  ;;  %v875_v43 = vadd.f32 %v827_v41, %v779_v54  ;;  %v1838_v41 = vsel %vm1836_vm6, %v1833_v24, %v1835_v25  ;;  %v830_v54 = vld [vmem:[#allocation2 + $0x130] sm:$0xff] }
 0x17c   : > { %v1068_v4 = vpop.f32.mrf.mxu2 }
 0x17d   : > { %923 = vst.msk [vmem:[#allocation2 + $0x118] sm:$0xff] %vm480_vm4, %v875_v43  ;;  %v5776_v31 = vadd.f32 %v1068_v4, %v846_v10  ;;  %4583 = vmatmul.msk.bf16.gmra.mxu3 %vm296_vm1, %v5647_v11  ;;  %4591 = vmatmul.msk.bf16.gmra.mxu0 %vm296_vm1, %v5647_v11  ;;  %v1867_v11 = vsel %vm321_vm0, %v1838_v41, 0  ;;  %v849_v43 = vadd.f32 %v5680_v23, %v5532_v21  ;;  %v833_v23 = vld [vmem:[#allocation2 + $0x148] sm:$0xff] }
 0x17e   : > { %1928 = vmatpush.bf16.msrb.mxu1 %v1867_v11  ;;  %v1837_v41 = vsel %vm1836_vm6, %v1831_v42, %v1833_v24  ;;  %v836_v42 = vld [vmem:[#allocation2 + $0x160] sm:$0xff] }
 0x180   : > { %v5782_v27 = vpop.f32.mrf.mxu3 }
 0x182   : > { %v782_v56 = vpop.f32.mrf.mxu1  ;;  %v5791_v10 = vpop.f32.mrf.mxu0 }
 0x183   : > { %7299 = vst [vmem:[#allocation13_spill] sm:$0xff] %v5791_v10  ;;  %v878_v4 = vadd.f32 %v830_v54, %v782_v56  ;;  %v1864_v54 = vsel %vm321_vm0, %v1837_v41, 0 }
 0x184   : > { %v1070_v34 = vpop.f32.mrf.mxu2  ;;  %1879 = vmatpush.bf16.msrb.mxu0 %v1864_v54 }
 0x185   : > { %926 = vst.msk [vmem:[#allocation2 + $0x130] sm:$0xff] %vm480_vm4, %v878_v4  ;;  %v5797_v19 = vadd.f32 %v1070_v34, %v849_v43  ;;  %4648 = vmatmul.msk.bf16.gmra.mxu1 %vm296_vm1, %v5788_v15  ;;  %v852_v34 = vadd.f32 %v5692_v36, %v5551_v30  ;;  %v5812_v43 = vld [vmem:[%s5353_s9] sm:$0xff]  ;;  %v5827_v30 = vld [vmem:[%s7281_s1 + $0xf8] sm:$0xff] }
 0x186   : > { %2167 = vst [vmem:[#allocation1] ss:$2 sm:$0xff] %v5812_v43 }
 0x188   : > { %v5801_v25 = vpop.f32.mrf.mxu3 }
 0x189   : > { %4652 = vmatmul.msk.bf16.gmra.mxu2 %vm296_vm1, %v5667_v58 }
 0x18a   : > { %v784_v21 = vpop.f32.mrf.mxu1  ;;  %v5806_v56 = vpop.f32.mrf.mxu0 }
 0x18b   : > { %7300 = vst [vmem:[#allocation14_spill] sm:$0xff] %v5806_v56  ;;  %v881_v11 = vadd.f32 %v833_v23, %v784_v21  ;;  %v855_v21 = vadd.f32 %v5710_v59, %v5566_v38  ;;  %v839_v59 = vld [vmem:[#allocation2 + $0x178] sm:$0xff] }
 0x18c   : > { %v1073_v4 = vpop.f32.mrf.mxu2 }
 0x18d   : > { %929 = vst.msk [vmem:[#allocation2 + $0x148] sm:$0xff] %vm480_vm4, %v881_v11  ;;  %v5816_v10 = vadd.f32 %v1073_v4, %v852_v34  ;;  %4584 = vmatmul.msk.bf16.gmra.mxu3 %vm296_vm1, %v5677_v20  ;;  %4592 = vmatmul.msk.bf16.gmra.mxu0 %vm296_vm1, %v5677_v20  ;;  %v2171_v54 = vld.sshfl [vmem:[#allocation1 + $0x8] sm:$0xff pattern:$0x75316420] }
 0x18e   : > { %v2177_v11 = vpack.c.bf16 %v2171_v54, %v2171_v54  ;;  %v2170_v4 = vld.sshfl [vmem:[#allocation1] sm:$0xff pattern:$0x75316420] }
 0x18f   : > { %v2176_v56 = vpack.c.bf16 %v2170_v4, %v2170_v4  ;;  %2576 = vst [vmem:[#allocation1] ss:$2 sm:$0xff] %v5812_v43  ;;  %v2172_v4 = vld.sshfl [vmem:[#allocation1 + $0x10] sm:$0xff pattern:$0x75316420] }
 0x190   : > { %v5822_v24 = vpop.f32.mrf.mxu3  ;;  %2241 = vrot.lane.b32.xlu1 %v2177_v11, %s5265_s23 }
 0x191   : > { %2239 = vrot.lane.b32.xlu0 %v2176_v56, %s5265_s23 }
 0x192   : > { %v787_v36 = vpop.f32.mrf.mxu1  ;;  %v5829_v41 = vpop.f32.mrf.mxu0 }
 0x193   : > { %7301 = vst [vmem:[#allocation15_spill] sm:$0xff] %v5829_v41  ;;  %v884_v23 = vadd.f32 %v836_v42, %v787_v36  ;;  %v858_v42 = vadd.f32 %v5722_v29, %v5586_v46 }
 0x194   : > { %v1075_v34 = vpop.f32.mrf.mxu2 }
 0x195   : > { %932 = vst.msk [vmem:[#allocation2 + $0x160] sm:$0xff] %vm480_vm4, %v884_v23  ;;  %v5834_v20 = vadd.f32 %v1075_v34, %v855_v21  ;;  %4649 = vmatmul.msk.bf16.gmra.mxu1 %vm296_vm1, %v5827_v30  ;;  %v5859_v34 = vld [vmem:[%s7281_s1 + $0x100] sm:$0xff] }
 0x198   : > { %v5839_v41 = vpop.f32.mrf.mxu3 }
 0x199   : > { %4653 = vmatmul.msk.bf16.gmra.mxu2 %vm296_vm1, %v5697_v40 }
 0x19a   : > { %v789_v38 = vpop.f32.mrf.mxu1  ;;  %v5843_v36 = vpop.f32.mrf.mxu0 }
 0x19b   : > { %v887_v21 = vadd.f32 %v839_v59, %v789_v38  ;;  %v2178_v59 = vpack.c.bf16 %v2172_v4, %v2172_v4  ;;  %v864_v4 = vadd.f32 %v5751_v50, %v5444_v55  ;;  %v5895_v50 = vld [vmem:[%s7281_s1 + $0x108] sm:$0xff] }
 0x19c   : > { %v1078_v23 = vpop.f32.mrf.mxu2 }
 0x19d   : > { %935 = vst.msk [vmem:[#allocation2 + $0x178] sm:$0xff] %vm480_vm4, %v887_v21  ;;  %v5848_v54 = vadd.f32 %v1078_v23, %v858_v42  ;;  %4585 = vmatmul.msk.bf16.gmra.mxu3 %vm296_vm1, %v5707_v33  ;;  %4593 = vmatmul.msk.bf16.gmra.mxu0 %vm296_vm1, %v5707_v33  ;;  %v2573_v33 = vld [vmem:[%s5353_s9 + $0x8] sm:$0xf] }
 0x19e   : > { %2578 = vst [vmem:[#allocation1 + $0x10] ss:$2 sm:$0xff] %v2573_v33  ;;  %2243 = vrot.lane.b32.xlu2 %v2178_v59, %s5265_s23  ;;  %v841_v59 = vadd.f32 %v5620_v17, %v5477_v2  ;;  %v2580_v17 = vld.sshfl [vmem:[#allocation1 + $0x8] sm:$0xff pattern:$0x75316420]  ;;  %s4329_s23 = sshll.u32 %s4325_s16, 4  ;;  %s4330_s23 = int_to_ptr.hbm [resolvable:$true] %s4329_s23 }
 0x19f   : > { %s5211_s22 = sshra.s32 %s4330_s23, 4  ;;  %s5212_s22 = int_to_ptr.hbm [resolvable:$true] %s5211_s22 }
 0x1a0   : > { %v5854_v56 = vpop.f32.mrf.mxu3  ;;  %s5213_s26 = scalar_lea.hbm %s5212_s22, 24  ;;  %p5218_p0 = scmp.lt.s32.totalorder %s5212_s22, %s7285_s5 }
 0x1a1   : > { %p5214_p11 = scmp.ne.s32.totalorder %s5212_s22, %s5213_s26  ;;  %p5219_p1 = scmp.lt.s32.totalorder %s5217_s10, %s5213_s26 }
 0x1a2   : > { %v1472_v46 = vpop.f32.mrf.mxu1  ;;  %v5861_v29 = vpop.f32.mrf.mxu0 }
 0x1a3   : > { %7302 = vst [vmem:[#allocation16_spill] sm:$0xff] %v5861_v29  ;;  %v5864_v11 = vadd.f32 %v1472_v46, %v5745_v49  ;;  %v1203_v46 = vld [vmem:[#allocation2 + $0x10] sm:$0xff]  ;;  %p5215_p12 = pnand %p5214_p11, %p5338_p5  ;;  %p5220_p2 = por %p5219_p1, %p5218_p0 }
 0x1a4   : > { %v1080_v38 = vpop.f32.mrf.mxu2 }
 0x1a5   : > { %7303 = vst [vmem:[#allocation17_spill] sm:$0xff] %v5864_v11  ;;  %v5867_v42 = vadd.f32 %v1080_v38, %v5736_v14  ;;  %4722 = vmatmul.msk.bf16.vlgmr.msrb.gmra.mxu1 %vm296_vm1, %v5859_v34  ;;  %p5216_p13 = pneg %p5215_p12 }
 0x1a7   : > { %p5221_p3 = pnand %p5220_p2, %p5216_p13 }
 0x1a8   : > { %v5872_v21 = vpop.f32.mrf.mxu3 }
 0x1a9   : > { %4654 = vmatmul.msk.bf16.gmra.mxu2 %vm296_vm1, %v5727_v35 }
 0x1aa   : > { %v1474_v23 = vpop.f32.mrf.mxu1  ;;  %v1161_v49 = vpop.f32.mrf.mxu0 }
 0x1ab   : > { %v5879_v14 = vadd.f32 %v1474_v23, %v5763_v44  ;;  %v1251_v38 = vadd.f32 %v1203_v46, %v1161_v49  ;;  %v1206_v23 = vld [vmem:[#allocation2 + $0x28] sm:$0xff] }
 0x1ac   : > { %v1083_v11 = vpop.f32.mrf.mxu2 }
 0x1ad   : > { %7304 = vst [vmem:[#allocation18_spill] sm:$0xff] %v5879_v14  ;;  %v5882_v33 = vadd.f32 %v1083_v11, %v864_v4  ;;  %4658 = vmatmul.msk.bf16.vlgmr.msrb.gmra.mxu3 %vm296_vm1, %v5603_v51  ;;  %4714 = vmatmul.msk.bf16.vlgmr.msrb.gmra.mxu0 %vm296_vm1, %v5859_v34  ;;  %v867_v51 = vadd.f32 %v5767_v60, %v5451_v57 }
 0x1ae   : > { %1299 = vst.msk [vmem:[#allocation2 + $0x10] sm:$0xff] %vm480_vm4, %v1251_v38  ;;  %v2579_v38 = vld.sshfl [vmem:[#allocation1] sm:$0xff pattern:$0x75316420] }
 0x1af   : > { %v2585_v14 = vpack.c.bf16 %v2579_v38, %v2579_v38  ;;  %2985 = vst [vmem:[#allocation1] ss:$2 sm:$0xff] %v5812_v43 }
 0x1b0   : > { %v1112_v29 = vpop.f32.mrf.mxu3 }
 0x1b1   : > { %v5890_v55 = vadd.f32 %v1112_v29, %v841_v59  ;;  %v2586_v29 = vpack.c.bf16 %v2580_v17, %v2580_v17  ;;  %v844_v59 = vadd.f32 %v5639_v37, %v5488_v6  ;;  %2648 = vrot.lane.b32.xlu0 %v2585_v14, %s5266_s7  ;;  %v870_v6 = vadd.f32 %v5782_v27, %v5458_v61  ;;  %v1212_v17 = vld [vmem:[#allocation2 + $0x58] sm:$0xff] }
 0x1b2   : > { %v1477_v44 = vpop.f32.mrf.mxu1  ;;  %v1163_v11 = vpop.f32.mrf.mxu0  ;;  %v847_v14 = vadd.f32 %v5654_v52, %v5507_v12  ;;  %v850_v52 = vadd.f32 %v5669_v8, %v5518_v16  ;;  %v2581_v8 = vld.sshfl [vmem:[#allocation1 + $0x10] sm:$0xff pattern:$0x75316420] }
 0x1b3   : > { %v5900_v49 = vadd.f32 %v1477_v44, %v5776_v31  ;;  %v1254_v46 = vadd.f32 %v1206_v23, %v1163_v11  ;;  %2650 = vrot.lane.b32.xlu1 %v2586_v29, %s5266_s7  ;;  %v1209_v11 = vld [vmem:[#allocation2 + $0x40] sm:$0xff] }
 0x1b4   : > { %v1085_v4 = vpop.f32.mrf.mxu2 }
 0x1b5   : > { %1302 = vst.msk [vmem:[#allocation2 + $0x28] sm:$0xff] %vm480_vm4, %v1254_v46  ;;  %v5903_v2 = vadd.f32 %v1085_v4, %v867_v51  ;;  %4723 = vmatmul.msk.bf16.gmra.mxu1 %vm296_vm1, %v5895_v50 }
 0x1b8   : > { %v1114_v57 = vpop.f32.mrf.mxu3 }
 0x1b9   : > { %v5911_v60 = vadd.f32 %v1114_v57, %v844_v59  ;;  %4655 = vmatmul.msk.bf16.gmra.mxu2 %vm296_vm1, %v5756_v62 }
 0x1ba   : > { %v1479_v31 = vpop.f32.mrf.mxu1  ;;  %v1166_v44 = vpop.f32.mrf.mxu0 }
 0x1bb   : > { %v5919_v37 = vadd.f32 %v1479_v31, %v5797_v19  ;;  %v1257_v43 = vadd.f32 %v1209_v11, %v1166_v44  ;;  %v5935_v19 = vld [vmem:[%s7281_s1 + $0x110] sm:$0xff]  ;;  %v876_v44 = vadd.f32 %v5822_v24, %v5470_v0  ;;  %v853_v0 = vadd.f32 %v5684_v28, %v5536_v22 }
 0x1bc   : > { %v1088_v23 = vpop.f32.mrf.mxu2 }
 0x1bd   : > { %1305 = vst.msk [vmem:[#allocation2 + $0x40] sm:$0xff] %vm480_vm4, %v1257_v43  ;;  %v5922_v51 = vadd.f32 %v1088_v23, %v870_v6  ;;  %4659 = vmatmul.msk.bf16.gmra.mxu3 %vm296_vm1, %v5637_v26  ;;  %4715 = vmatmul.msk.bf16.gmra.mxu0 %vm296_vm1, %v5895_v50  ;;  %v873_v26 = vadd.f32 %v5801_v25, %v5465_v63  ;;  %v1215_v25 = vld [vmem:[#allocation2 + $0x70] sm:$0xff]  ;;  %v2982_v23 = vld [vmem:[%s5353_s9 + $0x8] sm:$0xf] }
 0x1be   : > { %2987 = vst [vmem:[#allocation1 + $0x10] ss:$2 sm:$0xff] %v2982_v23 }
 0x1c0   : > { %v1117_v46 = vpop.f32.mrf.mxu3 }
 0x1c1   : > { %v5930_v61 = vadd.f32 %v1117_v46, %v847_v14  ;;  %v2587_v14 = vpack.c.bf16 %v2581_v8, %v2581_v8  ;;  %v5974_v46 = vld [vmem:[%s7281_s1 + $0x118] sm:$0xff]  ;;  %v1224_v8 = vld [vmem:[#allocation2 + $0xb8] sm:$0xff] }
 0x1c2   : > { %v1482_v27 = vpop.f32.mrf.mxu1  ;;  %v1168_v4 = vpop.f32.mrf.mxu0 }
 0x1c3   : > { %v5940_v29 = vadd.f32 %v1482_v27, %v5816_v10  ;;  %v1260_v38 = vadd.f32 %v1212_v17, %v1168_v4  ;;  %2652 = vrot.lane.b32.xlu2 %v2587_v14, %s5266_s7  ;;  %v1218_v4 = vld [vmem:[#allocation2 + $0x88] sm:$0xff]  ;;  %v879_v17 = vadd.f32 %v5839_v41, %v5479_v3  ;;  %s5143_s7 = smul.u32 24, %s215_s6 }
 0x1c4   : > { %v1090_v59 = vpop.f32.mrf.mxu2 }
 0x1c5   : > { %1308 = vst.msk [vmem:[#allocation2 + $0x58] sm:$0xff] %vm480_vm4, %v1260_v38  ;;  %v5943_v12 = vadd.f32 %v1090_v59, %v873_v26  ;;  %4724 = vmatmul.msk.bf16.gmra.mxu1 %vm296_vm1, %v5935_v19  ;;  %v856_v59 = vadd.f32 %v5699_v48, %v5553_v32  ;;  %v859_v48 = vadd.f32 %v5714_v18, %v5571_v39  ;;  %s7234_s8 = scalar_lea.vmem [#allocation3], %s5143_s7 }
 0x1c6   : > { %v862_v18 = vadd.f32 %v5729_v53, %v5589_v47  ;;  %v865_v47 = vadd.f32 %v5740_v1, %v5492_v7  ;;  %v868_v1 = vadd.f32 %v5758_v45, %v5511_v13  ;;  %v7305_v13 = vld [vmem:[#allocation6_spill] sm:$0xff]  ;;  %v7306_v45 = vld [vmem:[#allocation12_spill] sm:$0xff]  ;;  %s4327_s17 = sshll.u32 %s7234_s8, 4  ;;  %s4328_s17 = int_to_ptr.vmem [resolvable:$true] %s4327_s17 }
 0x1c8   : > { %v1119_v57 = vpop.f32.mrf.mxu3 }
 0x1c9   : > { %v5949_v31 = vadd.f32 %v1119_v57, %v850_v52  ;;  %4656 = vmatmul.msk.bf16.gmra.mxu2 %vm296_vm1, %v5788_v15 }
 0x1ca   : > { %v1484_v63 = vpop.f32.mrf.mxu1  ;;  %v1171_v10 = vpop.f32.mrf.mxu0 }
 0x1cb   : > { %v5956_v11 = vadd.f32 %v1484_v63, %v5834_v20  ;;  %v1263_v6 = vadd.f32 %v1215_v25, %v1171_v10  ;;  %v882_v63 = vadd.f32 %v5854_v56, %v5486_v5  ;;  %v6011_v56 = vld [vmem:[%s7281_s1 + $0x120] sm:$0xff] }
 0x1cc   : > { %v1093_v43 = vpop.f32.mrf.mxu2 }
 0x1cd   : > { %1311 = vst.msk [vmem:[#allocation2 + $0x70] sm:$0xff] %vm480_vm4, %v1263_v6  ;;  %v5959_v16 = vadd.f32 %v1093_v43, %v876_v44  ;;  %4660 = vmatmul.msk.bf16.gmra.mxu3 %vm296_vm1, %v5667_v58  ;;  %4716 = vmatmul.msk.bf16.gmra.mxu0 %vm296_vm1, %v5935_v19 }
 0x1d0   : > { %v1122_v24 = vpop.f32.mrf.mxu3 }
 0x1d1   : > { %v5969_v20 = vadd.f32 %v1122_v24, %v853_v0 }
 0x1d2   : > { %v1487_v58 = vpop.f32.mrf.mxu1  ;;  %v1173_v27 = vpop.f32.mrf.mxu0 }
 0x1d3   : > { %v5979_v26 = vadd.f32 %v1487_v58, %v5848_v54  ;;  %v1266_v22 = vadd.f32 %v1218_v4, %v1173_v27  ;;  %v1221_v54 = vld [vmem:[#allocation2 + $0xa0] sm:$0xff] }
 0x1d4   : > { %v1095_v28 = vpop.f32.mrf.mxu2 }
 0x1d5   : > { %1314 = vst.msk [vmem:[#allocation2 + $0x88] sm:$0xff] %vm480_vm4, %v1266_v22  ;;  %v5982_v38 = vadd.f32 %v1095_v28, %v879_v17  ;;  %4725 = vmatmul.msk.bf16.gmra.mxu1 %vm296_vm1, %v5974_v46 }
 0x1d8   : > { %v1124_v52 = vpop.f32.mrf.mxu3 }
 0x1d9   : > { %v5988_v57 = vadd.f32 %v1124_v52, %v856_v59  ;;  %4657 = vmatmul.msk.bf16.gmra.mxu2 %vm296_vm1, %v5827_v30  ;;  %v1230_v59 = vld [vmem:[#allocation2 + $0xe8] sm:$0xff] }
 0x1da   : > { %v1489_v3 = vpop.f32.mrf.mxu1  ;;  %v1176_v41 = vpop.f32.mrf.mxu0 }
 0x1db   : > { %v5995_v10 = vadd.f32 %v1489_v3, %v5867_v42  ;;  %v1269_v25 = vadd.f32 %v1221_v54, %v1176_v41 }
 0x1dc   : > { %v1098_v44 = vpop.f32.mrf.mxu2 }
 0x1dd   : > { %1317 = vst.msk [vmem:[#allocation2 + $0xa0] sm:$0xff] %vm480_vm4, %v1269_v25  ;;  %v5998_v32 = vadd.f32 %v1098_v44, %v882_v63  ;;  %4661 = vmatmul.msk.bf16.gmra.mxu3 %vm296_vm1, %v5697_v40  ;;  %4717 = vmatmul.msk.bf16.gmra.mxu0 %vm296_vm1, %v5974_v46  ;;  %v885_v40 = vadd.f32 %v5872_v21, %v5497_v9  ;;  %v1233_v25 = vld [vmem:[#allocation2 + $0x100] sm:$0xff] }
 0x1e0   : > { %v1127_v6 = vpop.f32.mrf.mxu3 }
 0x1e1   : > { %v6006_v5 = vadd.f32 %v1127_v6, %v859_v48 }
 0x1e2   : > { %v1492_v42 = vpop.f32.mrf.mxu1  ;;  %v1178_v43 = vpop.f32.mrf.mxu0 }
 0x1e3   : > { %v6016_v23 = vadd.f32 %v1492_v42, %v5882_v33  ;;  %v1272_v14 = vadd.f32 %v1224_v8, %v1178_v43  ;;  %v1227_v33 = vld [vmem:[#allocation2 + $0xd0] sm:$0xff]  ;;  %v6082_v8 = vld [vmem:[%s7281_s1 + $0x130] sm:$0xff] }
 0x1e4   : > { %v1100_v0 = vpop.f32.mrf.mxu2 }
 0x1e5   : > { %1320 = vst.msk [vmem:[#allocation2 + $0xb8] sm:$0xff] %vm480_vm4, %v1272_v14  ;;  %v6019_v39 = vadd.f32 %v1100_v0, %v885_v40  ;;  %4726 = vmatmul.msk.bf16.gmra.mxu1 %vm296_vm1, %v6011_v56 }
 0x1e8   : > { %v1129_v24 = vpop.f32.mrf.mxu3 }
 0x1e9   : > { %v6025_v58 = vadd.f32 %v1129_v24, %v862_v18  ;;  %4730 = vmatmul.msk.bf16.vlgmr.msra.gmra.mxu2 %vm296_vm1, %v5859_v34 }
 0x1ea   : > { %v1494_v9 = vpop.f32.mrf.mxu1  ;;  %v1181_v21 = vpop.f32.mrf.mxu0 }
 0x1eb   : > { %v6030_v27 = vadd.f32 %v1494_v9, %v5903_v2  ;;  %v1275_v4 = vadd.f32 %v1227_v33, %v1181_v21  ;;  %v6047_v2 = vld [vmem:[%s7281_s1 + $0x128] sm:$0xff]  ;;  %v7307_v21 = vld [vmem:[#allocation7_spill] sm:$0xff]  ;;  %v7308_v33 = vld [vmem:[#allocation13_spill] sm:$0xff] }
 0x1ec   : > { %v1521_v17 = vpop.f32.mrf.mxu2 }
 0x1ed   : > { %1323 = vst.msk [vmem:[#allocation2 + $0xd0] sm:$0xff] %vm480_vm4, %v1275_v4  ;;  %v6034_v22 = vadd.f32 %v1521_v17, %v5890_v55  ;;  %4662 = vmatmul.msk.bf16.gmra.mxu3 %vm296_vm1, %v5727_v35  ;;  %4718 = vmatmul.msk.bf16.gmra.mxu0 %vm296_vm1, %v6011_v56  ;;  %v874_v4 = vadd.f32 %v7308_v33, %v7307_v21 }
 0x1f0   : > { %v1132_v53 = vpop.f32.mrf.mxu3 }
 0x1f1   : > { %v6042_v34 = vadd.f32 %v1132_v53, %v865_v47 }
 0x1f2   : > { %v1497_v28 = vpop.f32.mrf.mxu1  ;;  %v1183_v55 = vpop.f32.mrf.mxu0 }
 0x1f3   : > { %v6050_v52 = vadd.f32 %v1497_v28, %v5922_v51  ;;  %v1278_v35 = vadd.f32 %v1230_v59, %v1183_v55 }
 0x1f4   : > { %v1523_v3 = vpop.f32.mrf.mxu2 }
 0x1f5   : > { %1326 = vst.msk [vmem:[#allocation2 + $0xe8] sm:$0xff] %vm480_vm4, %v1278_v35  ;;  %v6054_v7 = vadd.f32 %v1523_v3, %v5911_v60  ;;  %4727 = vmatmul.msk.bf16.gmra.mxu1 %vm296_vm1, %v6047_v2 }
 0x1f8   : > { %v1134_v41 = vpop.f32.mrf.mxu3  ;;  %v2244_v43 = vpop.permute.xlu2 %2243 }
 0x1f9   : > { %v6060_v54 = vadd.f32 %v1134_v41, %v868_v1  ;;  %4731 = vmatmul.msk.bf16.gmra.mxu2 %vm296_vm1, %v5895_v50  ;;  %v871_v50 = vadd.f32 %v7306_v45, %v7305_v13  ;;  %v2989_v1 = vld.sshfl [vmem:[#allocation1 + $0x8] sm:$0xff pattern:$0x75316420] }
 0x1fa   : > { %v1499_v51 = vpop.f32.mrf.mxu1  ;;  %v1186_v63 = vpop.f32.mrf.mxu0 }
 0x1fb   : > { %v6065_v44 = vadd.f32 %v1499_v51, %v5943_v12  ;;  %v1281_v60 = vadd.f32 %v1233_v25, %v1186_v63  ;;  %v2995_v25 = vpack.c.bf16 %v2989_v1, %v2989_v1 }
 0x1fc   : > { %v1526_v48 = vpop.f32.mrf.mxu2 }
 0x1fd   : > { %1329 = vst.msk [vmem:[#allocation2 + $0x100] sm:$0xff] %vm480_vm4, %v1281_v60  ;;  %v6069_v6 = vadd.f32 %v1526_v48, %v5930_v61  ;;  %4663 = vmatmul.msk.bf16.gmra.mxu3 %vm296_vm1, %v5756_v62  ;;  %4719 = vmatmul.msk.bf16.gmra.mxu0 %vm296_vm1, %v6047_v2  ;;  %v2279_v61 = vsel %vm321_vm0, %v2244_v43, 0  ;;  %v1236_v62 = vld [vmem:[#allocation2 + $0x118] sm:$0xff]  ;;  %v7310_v48 = vld [vmem:[#allocation14_spill] sm:$0xff] }
 0x1fe   : > { %2386 = vmatpush.bf16.msra.mxu1 %v2279_v61  ;;  %3059 = vrot.lane.b32.xlu0 %v2995_v25, %s5267_s25 }
 0x200   : > { %v1137_v42 = vpop.f32.mrf.mxu3 }
 0x201   : > { %v6077_v12 = vadd.f32 %v1137_v42, %v871_v50 }
 0x202   : > { %v1502_v40 = vpop.f32.mrf.mxu1  ;;  %v1188_v14 = vpop.f32.mrf.mxu0 }
 0x203   : > { %v6086_v0 = vadd.f32 %v1502_v40, %v5959_v16  ;;  %v1284_v18 = vadd.f32 %v1236_v62, %v1188_v14  ;;  %v2242_v47 = vpop.permute.xlu1 %2241  ;;  %v2240_v28 = vpop.permute.xlu0 %2239 }
 0x204   : > { %v1528_v24 = vpop.f32.mrf.mxu2  ;;  %v2247_v16 = vsel %vm2245_vm7, %v2242_v47, %v2244_v43  ;;  %v2246_v3 = vsel %vm2245_vm7, %v2240_v28, %v2242_v47  ;;  %v1245_v47 = vld [vmem:[#allocation2 + $0x160] sm:$0xff] }
 0x205   : > { %1332 = vst.msk [vmem:[#allocation2 + $0x118] sm:$0xff] %vm480_vm4, %v1284_v18  ;;  %v6090_v9 = vadd.f32 %v1528_v24, %v5949_v31  ;;  %4728 = vmatmul.msk.bf16.gmra.mxu1 %vm296_vm1, %v6082_v8  ;;  %v1239_v31 = vld [vmem:[#allocation2 + $0x130] sm:$0xff]  ;;  %v2276_v35 = vsel %vm321_vm0, %v2247_v16, 0  ;;  %v2273_v63 = vsel %vm321_vm0, %v2246_v3, 0  ;;  %v7311_v18 = vld [vmem:[#allocation9_spill] sm:$0xff]  ;;  %v7312_v24 = vld [vmem:[#allocation15_spill] sm:$0xff] }
 0x206   : > { %2337 = vmatpush.bf16.msra.mxu0 %v2276_v35  ;;  %2288 = vmatpush.bf16.msra.mxu3 %v2273_v63  ;;  %v880_v21 = vadd.f32 %v7312_v24, %v7311_v18 }
 0x208   : > { %v1139_v17 = vpop.f32.mrf.mxu3 }
 0x209   : > { %v6096_v53 = vadd.f32 %v1139_v17, %v874_v4  ;;  %4732 = vmatmul.msk.bf16.gmra.mxu2 %vm296_vm1, %v5935_v19 }
 0x20a   : > { %v1504_v55 = vpop.f32.mrf.mxu1  ;;  %v1191_v59 = vpop.f32.mrf.mxu0 }
 0x20b   : > { %v6102_v41 = vadd.f32 %v1504_v55, %v5982_v38  ;;  %v1287_v51 = vadd.f32 %v1239_v31, %v1191_v59  ;;  %v7309_v38 = vld [vmem:[#allocation8_spill] sm:$0xff] }
 0x20c   : > { %v1531_v60 = vpop.f32.mrf.mxu2  ;;  %v877_v13 = vadd.f32 %v7310_v48, %v7309_v38  ;;  %v7314_v38 = vld [vmem:[#allocation11_spill] sm:$0xff]  ;;  %v7315_v48 = vld [vmem:[#allocation16_spill] sm:$0xff] }
 0x20d   : > { %1335 = vst.msk [vmem:[#allocation2 + $0x130] sm:$0xff] %vm480_vm4, %v1287_v51  ;;  %v6107_v19 = vadd.f32 %v1531_v60, %v5969_v20  ;;  %4664 = vmatmul.msk.bf16.gmra.mxu3 %vm296_vm1, %v5788_v15  ;;  %4720 = vmatmul.msk.bf16.gmra.mxu0 %vm296_vm1, %v6082_v8  ;;  %v6121_v20 = vld [vmem:[%s7281_s1 + $0x138] sm:$0xff]  ;;  %v1242_v15 = vld [vmem:[#allocation2 + $0x148] sm:$0xff]  ;;  %v2988_v51 = vld.sshfl [vmem:[#allocation1] sm:$0xff pattern:$0x75316420] }
 0x20e   : > { %v2994_v25 = vpack.c.bf16 %v2988_v51, %v2988_v51 }
 0x210   : > { %v1142_v45 = vpop.f32.mrf.mxu3  ;;  %3057 = vrot.lane.b32.xlu2 %v2994_v25, %s5267_s25  ;;  %v3391_v25 = vld [vmem:[%s5353_s9 + $0x8] sm:$0xf] }
 0x211   : > { %v6116_v50 = vadd.f32 %v1142_v45, %v877_v13  ;;  %v886_v13 = vadd.f32 %v7315_v48, %v7314_v38  ;;  %v1615_v48 = vld [vmem:[#allocation2 + $0x28] sm:$0xff] }
 0x212   : > { %v1507_v42 = vpop.f32.mrf.mxu1  ;;  %v1193_v43 = vpop.f32.mrf.mxu0 }
 0x213   : > { %v6124_v61 = vadd.f32 %v1507_v42, %v5998_v32  ;;  %v1290_v40 = vadd.f32 %v1242_v15, %v1193_v43 }
 0x214   : > { %v1533_v14 = vpop.f32.mrf.mxu2 }
 0x215   : > { %1338 = vst.msk [vmem:[#allocation2 + $0x148] sm:$0xff] %vm480_vm4, %v1290_v40  ;;  %v6128_v62 = vadd.f32 %v1533_v14, %v5988_v57  ;;  %4729 = vmatmul.msk.bf16.gmra.mxu1 %vm296_vm1, %v6121_v20 }
 0x218   : > { %v1144_v33 = vpop.f32.mrf.mxu3 }
 0x219   : > { %v6134_v4 = vadd.f32 %v1144_v33, %v880_v21  ;;  %4733 = vmatmul.msk.bf16.gmra.mxu2 %vm296_vm1, %v5974_v46  ;;  %v7313_v46 = vld [vmem:[#allocation10_spill] sm:$0xff] }
 0x21a   : > { %v1509_v32 = vpop.f32.mrf.mxu1  ;;  %v1196_v17 = vpop.f32.mrf.mxu0  ;;  %v883_v59 = vadd.f32 %v5843_v36, %v7313_v46 }
 0x21b   : > { %v6139_v16 = vadd.f32 %v1509_v32, %v6019_v39  ;;  %v1293_v57 = vadd.f32 %v1245_v47, %v1196_v17  ;;  %v5101_v39 = vld [vmem:[%s7281_s1 + $0x140] sm:$0xff] }
 0x21c   : > { %v1536_v28 = vpop.f32.mrf.mxu2 }
 0x21d   : > { %1341 = vst.msk [vmem:[#allocation2 + $0x160] sm:$0xff] %vm480_vm4, %v1293_v57  ;;  %v6143_v55 = vadd.f32 %v1536_v28, %v6006_v5  ;;  %4665 = vmatmul.msk.bf16.gmra.mxu3 %vm296_vm1, %v5827_v30  ;;  %4721 = vmatmul.msk.bf16.gmra.mxu0 %vm296_vm1, %v6121_v20  ;;  %v1248_v5 = vld [vmem:[#allocation2 + $0x178] sm:$0xff]  ;;  %v2653_v14 = vpop.permute.xlu2 %2652  ;;  %v1612_v28 = vld [vmem:[#allocation2 + $0x10] sm:$0xff] }
 0x21e   : > { %v2688_v21 = vsel %vm321_vm0, %v2653_v14, 0 }
 0x21f   : > { %2795 = vmatpush.bf16.msrb.mxu0 %v2688_v21 }
 0x220   : > { %v1147_v31 = vpop.f32.mrf.mxu3 }
 0x221   : > { %v6151_v35 = vadd.f32 %v1147_v31, %v883_v59 }
 0x222   : > { %v1930_v3 = vpop.f32.mrf.mxu1  ;;  %v1198_v1 = vpop.f32.mrf.mxu0 }
 0x223   : > { %v6157_v63 = vadd.f32 %v1930_v3, %v6034_v22  ;;  %v1296_v30 = vadd.f32 %v1248_v5, %v1198_v1  ;;  %v2649_v32 = vpop.permute.xlu0 %2648  ;;  %v7317_v3 = vld [vmem:[#allocation18_spill] sm:$0xff] }
 0x224   : > { %v1538_v60 = vpop.f32.mrf.mxu2 }
 0x225   : > { %1344 = vst.msk [vmem:[#allocation2 + $0x178] sm:$0xff] %vm480_vm4, %v1296_v30  ;;  %v6161_v36 = vadd.f32 %v1538_v60, %v6025_v58  ;;  %4802 = vmatmul.msk.bf16.vlgmr.msra.gmra.mxu1 %vm296_vm1, %v5101_v39  ;;  %v7316_v58 = vld [vmem:[#allocation17_spill] sm:$0xff]  ;;  %v2651_v18 = vpop.permute.xlu1 %2650 }
 0x226   : > { %v2656_v33 = vsel %vm2654_vm8, %v2651_v18, %v2653_v14  ;;  %v2990_v30 = vld.sshfl [vmem:[#allocation1 + $0x10] sm:$0xff pattern:$0x75316420] }
 0x227   : > { %v2996_v60 = vpack.c.bf16 %v2990_v30, %v2990_v30  ;;  %3396 = vst [vmem:[#allocation1 + $0x10] ss:$2 sm:$0xff] %v3391_v25 }
 0x228   : > { %v1149_v45 = vpop.f32.mrf.mxu3 }
 0x229   : > { %v6167_v42 = vadd.f32 %v1149_v45, %v886_v13  ;;  %4734 = vmatmul.msk.bf16.gmra.mxu2 %vm296_vm1, %v6011_v56  ;;  %v2685_v56 = vsel %vm321_vm0, %v2656_v33, 0  ;;  %3061 = vrot.lane.b32.xlu1 %v2996_v60, %s5267_s25  ;;  %v1627_v60 = vld [vmem:[#allocation2 + $0x88] sm:$0xff]  ;;  %s4314_s25 = scalar_lea.sflag [#allocation4], %s215_s6 }
 0x22a   : > { %v1932_v22 = vpop.f32.mrf.mxu1  ;;  %v1881_v43 = vpop.f32.mrf.mxu0  ;;  %2746 = vmatpush.bf16.msrb.mxu3 %v2685_v56 }
 0x22b   : > { %v6172_v15 = vadd.f32 %v1932_v22, %v6054_v7  ;;  %v6175_v40 = vadd.f32 %v1881_v43, %v7316_v58  ;;  %v2655_v7 = vsel %vm2654_vm8, %v2649_v32, %v2651_v18 }
 0x22c   : > { %v1541_v24 = vpop.f32.mrf.mxu2  ;;  %v2682_v47 = vsel %vm321_vm0, %v2655_v7, 0  ;;  %v1621_v7 = vld [vmem:[#allocation2 + $0x58] sm:$0xff] }
 0x22d   : > { %v6179_v17 = vadd.f32 %v1541_v24, %v6042_v34  ;;  %4786 = vmatmul.msk.bf16.vlgmr.msra.gmra.mxu3 %vm296_vm1, %v5101_v39  ;;  %4794 = vmatmul.msk.bf16.vlgmr.msra.gmra.mxu0 %vm296_vm1, %v5101_v39  ;;  %v5102_v34 = vld [vmem:[%s7281_s1 + $0x148] sm:$0xff]  ;;  %v5103_v24 = vld [vmem:[%s7281_s1 + $0x150] sm:$0xff] }
 0x22e   : > { %2697 = vmatpush.bf16.msrb.mxu2 %v2682_v47 }
 0x230   : > { %v1570_v57 = vpop.f32.mrf.mxu3 }
 0x231   : > { %v1660_v46 = vadd.f32 %v1612_v28, %v1570_v57 }
 0x232   : > { %v1935_v59 = vpop.f32.mrf.mxu1  ;;  %v1883_v31 = vpop.f32.mrf.mxu0 }
 0x233   : > { %1708 = vst.msk [vmem:[#allocation2 + $0x10] sm:$0xff] %vm480_vm4, %v1660_v46  ;;  %v6190_v39 = vadd.f32 %v1935_v59, %v6069_v6  ;;  %v6193_v1 = vadd.f32 %v1883_v31, %v7317_v3  ;;  %v5104_v31 = vld [vmem:[%s7281_s1 + $0x158] sm:$0xff] }
 0x234   : > { %v1543_v5 = vpop.f32.mrf.mxu2 }
 0x235   : > { %v6196_v51 = vadd.f32 %v1543_v5, %v6060_v54  ;;  %4803 = vmatmul.msk.bf16.gmra.mxu1 %vm296_vm1, %v5102_v34 }
 0x238   : > { %v1572_v38 = vpop.f32.mrf.mxu3 }
 0x239   : > { %v1663_v13 = vadd.f32 %v1615_v48, %v1572_v38  ;;  %4735 = vmatmul.msk.bf16.gmra.mxu2 %vm296_vm1, %v6047_v2  ;;  %v1618_v2 = vld [vmem:[#allocation2 + $0x40] sm:$0xff] }
 0x23a   : > { %v1937_v6 = vpop.f32.mrf.mxu1  ;;  %v1886_v45 = vpop.f32.mrf.mxu0 }
 0x23b   : > { %1711 = vst.msk [vmem:[#allocation2 + $0x28] sm:$0xff] %vm480_vm4, %v1663_v13  ;;  %v6205_v54 = vadd.f32 %v1937_v6, %v6090_v9  ;;  %v6208_v22 = vadd.f32 %v1886_v45, %v5900_v49 }
 0x23c   : > { %v1546_v43 = vpop.f32.mrf.mxu2 }
 0x23d   : > { %v6211_v58 = vadd.f32 %v1546_v43, %v6077_v12  ;;  %4787 = vmatmul.msk.bf16.gmra.mxu3 %vm296_vm1, %v5102_v34  ;;  %4795 = vmatmul.msk.bf16.gmra.mxu0 %vm296_vm1, %v5102_v34 }
 0x240   : > { %v1575_v14 = vpop.f32.mrf.mxu3 }
 0x241   : > { %v1666_v18 = vadd.f32 %v1618_v2, %v1575_v14  ;;  %v5105_v14 = vld [vmem:[%s7281_s1 + $0x160] sm:$0xff] }
 0x242   : > { %v1940_v9 = vpop.f32.mrf.mxu1  ;;  %v1888_v21 = vpop.f32.mrf.mxu0 }
 0x243   : > { %1714 = vst.msk [vmem:[#allocation2 + $0x40] sm:$0xff] %vm480_vm4, %v1666_v18  ;;  %v6220_v49 = vadd.f32 %v1940_v9, %v6107_v19  ;;  %v6223_v12 = vadd.f32 %v1888_v21, %v5919_v37  ;;  %v6288_v9 = vld [vmem:[%s7281_s1 + $0x180] sm:$0xff] }
 0x244   : > { %v1548_v33 = vpop.f32.mrf.mxu2 }
 0x245   : > { %v6226_v32 = vadd.f32 %v1548_v33, %v6096_v53  ;;  %4804 = vmatmul.msk.bf16.gmra.mxu1 %vm296_vm1, %v5103_v24  ;;  %v1633_v33 = vld [vmem:[#allocation2 + $0xb8] sm:$0xff] }
 0x248   : > { %v1577_v56 = vpop.f32.mrf.mxu3 }
 0x249   : > { %v1669_v47 = vadd.f32 %v1621_v7, %v1577_v56  ;;  %4736 = vmatmul.msk.bf16.gmra.mxu2 %vm296_vm1, %v6082_v8  ;;  %v1624_v8 = vld [vmem:[#allocation2 + $0x70] sm:$0xff] }
 0x24a   : > { %v1942_v57 = vpop.f32.mrf.mxu1  ;;  %v1891_v28 = vpop.f32.mrf.mxu0 }
 0x24b   : > { %1717 = vst.msk [vmem:[#allocation2 + $0x58] sm:$0xff] %vm480_vm4, %v1669_v47  ;;  %v6233_v19 = vadd.f32 %v1942_v57, %v6128_v62  ;;  %v6236_v37 = vadd.f32 %v1891_v28, %v5940_v29  ;;  %v2021_v57 = vld [vmem:[#allocation2 + $0x10] sm:$0xff] }
 0x24c   : > { %v1551_v53 = vpop.f32.mrf.mxu2 }
 0x24d   : > { %v6239_v46 = vadd.f32 %v1551_v53, %v6116_v50  ;;  %4788 = vmatmul.msk.bf16.gmra.mxu3 %vm296_vm1, %v5103_v24  ;;  %4796 = vmatmul.msk.bf16.gmra.mxu0 %vm296_vm1, %v5103_v24 }
 0x250   : > { %v1580_v34 = vpop.f32.mrf.mxu3 }
 0x251   : > { %v1672_v59 = vadd.f32 %v1624_v8, %v1580_v34  ;;  %v1636_v34 = vld [vmem:[#allocation2 + $0xd0] sm:$0xff] }
 0x252   : > { %v1945_v62 = vpop.f32.mrf.mxu1  ;;  %v1893_v3 = vpop.f32.mrf.mxu0 }
 0x253   : > { %1720 = vst.msk [vmem:[#allocation2 + $0x70] sm:$0xff] %vm480_vm4, %v1672_v59  ;;  %v6248_v29 = vadd.f32 %v1945_v62, %v6143_v55  ;;  %v6251_v50 = vadd.f32 %v1893_v3, %v5956_v11 }
 0x254   : > { %v1553_v5 = vpop.f32.mrf.mxu2 }
 0x255   : > { %v6254_v30 = vadd.f32 %v1553_v5, %v6134_v4  ;;  %4805 = vmatmul.msk.bf16.gmra.mxu1 %vm296_vm1, %v5104_v31  ;;  %v2024_v5 = vld [vmem:[#allocation2 + $0x28] sm:$0xff] }
 0x258   : > { %v1582_v25 = vpop.f32.mrf.mxu3 }
 0x259   : > { %v1675_v38 = vadd.f32 %v1627_v60, %v1582_v25  ;;  %4737 = vmatmul.msk.bf16.gmra.mxu2 %vm296_vm1, %v6121_v20  ;;  %v1630_v20 = vld [vmem:[#allocation2 + $0xa0] sm:$0xff] }
 0x25a   : > { %v1947_v48 = vpop.f32.mrf.mxu1  ;;  %v1896_v13 = vpop.f32.mrf.mxu0  ;;  %v6316_v60 = vld [vmem:[%s7281_s1 + $0x188] sm:$0xff] }
 0x25b   : > { %1723 = vst.msk [vmem:[#allocation2 + $0x88] sm:$0xff] %vm480_vm4, %v1675_v38  ;;  %v6261_v55 = vadd.f32 %v1947_v48, %v6161_v36  ;;  %v6264_v11 = vadd.f32 %v1896_v13, %v5979_v26  ;;  %v1639_v48 = vld [vmem:[#allocation2 + $0xe8] sm:$0xff] }
 0x25c   : > { %v1556_v4 = vpop.f32.mrf.mxu2 }
 0x25d   : > { %v6267_v6 = vadd.f32 %v1556_v4, %v6151_v35  ;;  %4789 = vmatmul.msk.bf16.gmra.mxu3 %vm296_vm1, %v5104_v31  ;;  %4797 = vmatmul.msk.bf16.gmra.mxu0 %vm296_vm1, %v5104_v31 }
 0x260   : > { %v1585_v45 = vpop.f32.mrf.mxu3 }
 0x261   : > { %v1678_v43 = vadd.f32 %v1630_v20, %v1585_v45 }
 0x262   : > { %v1950_v36 = vpop.f32.mrf.mxu1  ;;  %v1898_v2 = vpop.f32.mrf.mxu0 }
 0x263   : > { %1726 = vst.msk [vmem:[#allocation2 + $0xa0] sm:$0xff] %vm480_vm4, %v1678_v43  ;;  %v6276_v26 = vadd.f32 %v1950_v36, %v6179_v17  ;;  %v6279_v35 = vadd.f32 %v1898_v2, %v5995_v10  ;;  %v2027_v43 = vld [vmem:[#allocation2 + $0x40] sm:$0xff] }
 0x264   : > { %v1558_v18 = vpop.f32.mrf.mxu2 }
 0x265   : > { %v6282_v24 = vadd.f32 %v1558_v18, %v6167_v42  ;;  %4806 = vmatmul.msk.bf16.gmra.mxu1 %vm296_vm1, %v5105_v14  ;;  %v1642_v18 = vld [vmem:[#allocation2 + $0x100] sm:$0xff] }
 0x268   : > { %v1587_v21 = vpop.f32.mrf.mxu3 }
 0x269   : > { %v1681_v56 = vadd.f32 %v1633_v33, %v1587_v21  ;;  %4858 = vmatmul.msk.bf16.vlgmr.msrb.gmra.mxu2 %vm296_vm1, %v6288_v9 }
 0x26a   : > { %v1952_v17 = vpop.f32.mrf.mxu1  ;;  %v1901_v10 = vpop.f32.mrf.mxu0 }
 0x26b   : > { %1729 = vst.msk [vmem:[#allocation2 + $0xb8] sm:$0xff] %vm480_vm4, %v1681_v56  ;;  %v6294_v42 = vadd.f32 %v1952_v17, %v6196_v51  ;;  %v6297_v7 = vadd.f32 %v1901_v10, %v6016_v23  ;;  %v5106_v51 = vld [vmem:[%s7281_s1 + $0x168] sm:$0xff]  ;;  %v3058_v36 = vpop.permute.xlu2 %3057 }
 0x26c   : > { %v1979_v47 = vpop.f32.mrf.mxu2 }
 0x26d   : > { %v2069_v28 = vadd.f32 %v2021_v57, %v1979_v47  ;;  %4790 = vmatmul.msk.bf16.gmra.mxu3 %vm296_vm1, %v5105_v14  ;;  %4798 = vmatmul.msk.bf16.gmra.mxu0 %vm296_vm1, %v5105_v14  ;;  %v3390_v47 = vld [vmem:[%s5353_s9] sm:$0xff]  ;;  %s5268_s9 = smov 90  }
 0x26e   : > { %3394 = vst [vmem:[#allocation1] ss:$2 sm:$0xff] %v3390_v47  ;;  %v1651_v47 = vld [vmem:[#allocation2 + $0x148] sm:$0xff] }
 0x26f   : > { %2117 = vst.msk [vmem:[#allocation2 + $0x10] sm:$0xff] %vm480_vm4, %v2069_v28 }
 0x270   : > { %v1590_v53 = vpop.f32.mrf.mxu3  ;;  %v6331_v21 = vpop.permute.xlu0 %3059 }
 0x271   : > { %v1684_v8 = vadd.f32 %v1636_v34, %v1590_v53  ;;  %v3064_v33 = vsel %vm3063_vm9, %v3058_v36, %v6331_v21  ;;  %v2030_v34 = vld [vmem:[#allocation2 + $0x58] sm:$0xff] }
 0x272   : > { %v1955_v59 = vpop.f32.mrf.mxu1  ;;  %v1903_v31 = vpop.f32.mrf.mxu0  ;;  %v3091_v10 = vsel %vm321_vm0, %v3064_v33, 0  ;;  %v2036_v33 = vld [vmem:[#allocation2 + $0x88] sm:$0xff] }
 0x273   : > { %1732 = vst.msk [vmem:[#allocation2 + $0xd0] sm:$0xff] %vm480_vm4, %v1684_v8  ;;  %v6307_v23 = vadd.f32 %v1955_v59, %v6211_v58  ;;  %v6310_v62 = vadd.f32 %v1903_v31, %v6030_v27  ;;  %3106 = vmatpush.bf16.msrb.mxu1 %v3091_v10  ;;  %v6381_v10 = vld [vmem:[%s7281_s1 + $0x198] sm:$0xff] }
 0x274   : > { %v1981_v3 = vpop.f32.mrf.mxu2 }
 0x275   : > { %v2072_v25 = vadd.f32 %v2024_v5, %v1981_v3  ;;  %4807 = vmatmul.msk.bf16.gmra.mxu1 %vm296_vm1, %v5106_v51 }
 0x277   : > { %2120 = vst.msk [vmem:[#allocation2 + $0x28] sm:$0xff] %vm480_vm4, %v2072_v25 }
 0x278   : > { %v1592_v38 = vpop.f32.mrf.mxu3 }
 0x279   : > { %v1687_v13 = vadd.f32 %v1639_v48, %v1592_v38  ;;  %4859 = vmatmul.msk.bf16.gmra.mxu2 %vm296_vm1, %v6316_v60  ;;  %v3398_v38 = vld.sshfl [vmem:[#allocation1 + $0x8] sm:$0xff pattern:$0x75316420] }
 0x27a   : > { %v1957_v27 = vpop.f32.mrf.mxu1  ;;  %v1906_v58 = vpop.f32.mrf.mxu0 }
 0x27b   : > { %1735 = vst.msk [vmem:[#allocation2 + $0xe8] sm:$0xff] %vm480_vm4, %v1687_v13  ;;  %v6323_v4 = vadd.f32 %v1957_v27, %v6226_v32  ;;  %v6326_v45 = vadd.f32 %v1906_v58, %v6050_v52  ;;  %v5107_v52 = vld [vmem:[%s7281_s1 + $0x170] sm:$0xff]  ;;  %v2033_v13 = vld [vmem:[#allocation2 + $0x70] sm:$0xff]  ;;  %v3404_v27 = vpack.c.bf16 %v3398_v38, %v3398_v38  ;;  %v1654_v38 = vld [vmem:[#allocation2 + $0x160] sm:$0xff] }
 0x27c   : > { %v1984_v20 = vpop.f32.mrf.mxu2 }
 0x27d   : > { %v2075_v14 = vadd.f32 %v2027_v43, %v1984_v20  ;;  %4791 = vmatmul.msk.bf16.gmra.mxu3 %vm296_vm1, %v5106_v51  ;;  %4799 = vmatmul.msk.bf16.gmra.mxu0 %vm296_vm1, %v5106_v51  ;;  %v6351_v51 = vld [vmem:[%s7281_s1 + $0x190] sm:$0xff] }
 0x27e   : > { %3468 = vrot.lane.b32.xlu1 %v3404_v27, %s5268_s9 }
 0x27f   : > { %2123 = vst.msk [vmem:[#allocation2 + $0x40] sm:$0xff] %vm480_vm4, %v2075_v14 }
 0x280   : > { %v1595_v2 = vpop.f32.mrf.mxu3 }
 0x281   : > { %v1690_v32 = vadd.f32 %v1642_v18, %v1595_v2 }
 0x282   : > { %v1960_v56 = vpop.f32.mrf.mxu1  ;;  %v1908_v17 = vpop.f32.mrf.mxu0 }
 0x283   : > { %1738 = vst.msk [vmem:[#allocation2 + $0x100] sm:$0xff] %vm480_vm4, %v1690_v32  ;;  %v6342_v57 = vadd.f32 %v1960_v56, %v6239_v46  ;;  %v6345_v28 = vadd.f32 %v1908_v17, %v6065_v44  ;;  %v1645_v46 = vld [vmem:[#allocation2 + $0x118] sm:$0xff] }
 0x284   : > { %v1986_v53 = vpop.f32.mrf.mxu2  ;;  %v3397_v32 = vld.sshfl [vmem:[#allocation1] sm:$0xff pattern:$0x75316420] }
 0x285   : > { %v2078_v8 = vadd.f32 %v2030_v34, %v1986_v53  ;;  %4808 = vmatmul.msk.bf16.gmra.mxu1 %vm296_vm1, %v5107_v52  ;;  %v3403_v56 = vpack.c.bf16 %v3397_v32, %v3397_v32  ;;  %v6412_v32 = vld [vmem:[%s7281_s1 + $0x1a0] sm:$0xff] }
 0x287   : > { %2126 = vst.msk [vmem:[#allocation2 + $0x58] sm:$0xff] %vm480_vm4, %v2078_v8  ;;  %3466 = vrot.lane.b32.xlu0 %v3403_v56, %s5268_s9 }
 0x288   : > { %v1597_v59 = vpop.f32.mrf.mxu3 }
 0x289   : > { %v1693_v31 = vadd.f32 %v1645_v46, %v1597_v59  ;;  %4860 = vmatmul.msk.bf16.gmra.mxu2 %vm296_vm1, %v6351_v51 }
 0x28a   : > { %v1962_v44 = vpop.f32.mrf.mxu1  ;;  %v1911_v3 = vpop.f32.mrf.mxu0 }
 0x28b   : > { %1741 = vst.msk [vmem:[#allocation2 + $0x118] sm:$0xff] %vm480_vm4, %v1693_v31  ;;  %v6358_v5 = vadd.f32 %v1962_v44, %v6254_v30  ;;  %v6361_v25 = vadd.f32 %v1911_v3, %v6086_v0  ;;  %v1648_v30 = vld [vmem:[#allocation2 + $0x130] sm:$0xff]  ;;  %v2039_v31 = vld [vmem:[#allocation2 + $0xa0] sm:$0xff] }
 0x28c   : > { %v1989_v48 = vpop.f32.mrf.mxu2  ;;  %v5108_v0 = vld [vmem:[%s7281_s1 + $0x178] sm:$0xff] }
 0x28d   : > { %v2081_v58 = vadd.f32 %v2033_v13, %v1989_v48  ;;  %4792 = vmatmul.msk.bf16.gmra.mxu3 %vm296_vm1, %v5107_v52  ;;  %4800 = vmatmul.msk.bf16.gmra.mxu0 %vm296_vm1, %v5107_v52 }
 0x28f   : > { %2129 = vst.msk [vmem:[#allocation2 + $0x70] sm:$0xff] %vm480_vm4, %v2081_v58  ;;  %v3399_v58 = vld.sshfl [vmem:[#allocation1 + $0x10] sm:$0xff pattern:$0x75316420] }
 0x290   : > { %v1600_v20 = vpop.f32.mrf.mxu3 }
 0x291   : > { %v1696_v43 = vadd.f32 %v1648_v30, %v1600_v20 }
 0x292   : > { %v1965_v14 = vpop.f32.mrf.mxu1  ;;  %v1913_v36 = vpop.f32.mrf.mxu0 }
 0x293   : > { %1744 = vst.msk [vmem:[#allocation2 + $0x130] sm:$0xff] %vm480_vm4, %v1696_v43  ;;  %v6372_v2 = vadd.f32 %v1965_v14, %v6267_v6  ;;  %v6375_v18 = vadd.f32 %v1913_v36, %v6102_v41  ;;  %v3405_v43 = vpack.c.bf16 %v3399_v58, %v3399_v58  ;;  %v2042_v14 = vld [vmem:[#allocation2 + $0xb8] sm:$0xff] }
 0x294   : > { %v1991_v52 = vpop.f32.mrf.mxu2 }
 0x295   : > { %v2084_v17 = vadd.f32 %v2036_v33, %v1991_v52  ;;  %4809 = vmatmul.msk.bf16.gmra.mxu1 %vm296_vm1, %v5108_v0  ;;  %3470 = vrot.lane.b32.xlu2 %v3405_v43, %s5268_s9  ;;  %v1657_v52 = vld [vmem:[#allocation2 + $0x178] sm:$0xff]  ;;  %v2048_v43 = vld [vmem:[#allocation2 + $0xe8] sm:$0xff] }
 0x297   : > { %2132 = vst.msk [vmem:[#allocation2 + $0x88] sm:$0xff] %vm480_vm4, %v2084_v17  ;;  %v2433_v17 = vld [vmem:[#allocation2 + $0x28] sm:$0xff] }
 0x298   : > { %v1602_v6 = vpop.f32.mrf.mxu3 }
 0x299   : > { %v1699_v41 = vadd.f32 %v1651_v47, %v1602_v6  ;;  %4861 = vmatmul.msk.bf16.gmra.mxu2 %vm296_vm1, %v6381_v10 }
 0x29a   : > { %v1967_v53 = vpop.f32.mrf.mxu1  ;;  %v1916_v34 = vpop.f32.mrf.mxu0 }
 0x29b   : > { %1747 = vst.msk [vmem:[#allocation2 + $0x148] sm:$0xff] %vm480_vm4, %v1699_v41  ;;  %v6389_v8 = vadd.f32 %v1967_v53, %v6282_v24  ;;  %v6392_v59 = vadd.f32 %v1916_v34, %v6124_v61  ;;  %v6400_v24 = vld [vmem:[%s7281_s1 + $0x1c0] sm:$0xff]  ;;  %v2430_v61 = vld [vmem:[#allocation2 + $0x10] sm:$0xff]  ;;  %v3062_v53 = vpop.permute.xlu1 %3061 }
 0x29c   : > { %v1994_v46 = vpop.f32.mrf.mxu2 }
 0x29d   : > { %v2087_v44 = vadd.f32 %v2039_v31, %v1994_v46  ;;  %4793 = vmatmul.msk.bf16.gmra.mxu3 %vm296_vm1, %v5108_v0  ;;  %4801 = vmatmul.msk.bf16.gmra.mxu0 %vm296_vm1, %v5108_v0  ;;  %v2045_v46 = vld [vmem:[#allocation2 + $0xd0] sm:$0xff]  ;;  %v3065_v31 = vsel %vm3063_vm9, %v6331_v21, %v3062_v53 }
 0x29f   : > { %2135 = vst.msk [vmem:[#allocation2 + $0xa0] sm:$0xff] %vm480_vm4, %v2087_v44  ;;  %v3097_v44 = vsel %vm321_vm0, %v3062_v53, 0 }
 0x2a0   : > { %v1605_v3 = vpop.f32.mrf.mxu3  ;;  %3204 = vmatpush.bf16.msra.mxu3 %v3097_v44 }
 0x2a1   : > { %v1702_v48 = vadd.f32 %v1654_v38, %v1605_v3 }
 0x2a2   : > { %v2388_v13 = vpop.f32.mrf.mxu1  ;;  %v1918_v27 = vpop.f32.mrf.mxu0 }
 0x2a3   : > { %1750 = vst.msk [vmem:[#allocation2 + $0x160] sm:$0xff] %vm480_vm4, %v1702_v48  ;;  %v2478_v20 = vadd.f32 %v2430_v61, %v2388_v13  ;;  %v6404_v30 = vadd.f32 %v1918_v27, %v6139_v16  ;;  %v6438_v48 = vld [vmem:[%s7281_s1 + $0x1c8] sm:$0xff] }
 0x2a4   : > { %v1996_v0 = vpop.f32.mrf.mxu2  ;;  %v2436_v61 = vld [vmem:[#allocation2 + $0x40] sm:$0xff] }
 0x2a5   : > { %2526 = vst.msk [vmem:[#allocation2 + $0x10] sm:$0xff] %vm480_vm4, %v2478_v20  ;;  %v2090_v36 = vadd.f32 %v2042_v14, %v1996_v0  ;;  %4930 = vmatmul.msk.bf16.vlgmr.msrb.gmra.mxu1 %vm296_vm1, %v6400_v24 }
 0x2a7   : > { %2138 = vst.msk [vmem:[#allocation2 + $0xb8] sm:$0xff] %vm480_vm4, %v2090_v36 }
 0x2a8   : > { %v1607_v16 = vpop.f32.mrf.mxu3 }
 0x2a9   : > { %v1705_v33 = vadd.f32 %v1657_v52, %v1607_v16  ;;  %4862 = vmatmul.msk.bf16.gmra.mxu2 %vm296_vm1, %v6412_v32  ;;  %v2439_v16 = vld [vmem:[#allocation2 + $0x58] sm:$0xff] }
 0x2aa   : > { %v2390_v56 = vpop.f32.mrf.mxu1  ;;  %v2339_v6 = vpop.f32.mrf.mxu0 }
 0x2ab   : > { %1753 = vst.msk [vmem:[#allocation2 + $0x178] sm:$0xff] %vm480_vm4, %v1705_v33  ;;  %v2481_v47 = vadd.f32 %v2433_v17, %v2390_v56  ;;  %v6420_v41 = vadd.f32 %v2339_v6, %v6157_v63  ;;  %v3094_v63 = vsel %vm321_vm0, %v3065_v31, 0  ;;  %v2051_v6 = vld [vmem:[#allocation2 + $0x100] sm:$0xff] }
 0x2ac   : > { %v1999_v34 = vpop.f32.mrf.mxu2  ;;  %3155 = vmatpush.bf16.msra.mxu2 %v3094_v63 }
 0x2ad   : > { %2529 = vst.msk [vmem:[#allocation2 + $0x28] sm:$0xff] %vm480_vm4, %v2481_v47  ;;  %v2093_v3 = vadd.f32 %v2045_v46, %v1999_v34  ;;  %4866 = vmatmul.msk.bf16.vlgmr.msrb.gmra.mxu3 %vm296_vm1, %v6288_v9  ;;  %4874 = vmatmul.msk.bf16.vlgmr.msrb.gmra.mxu0 %vm296_vm1, %v6288_v9  ;;  %v2442_v46 = vld [vmem:[#allocation2 + $0x70] sm:$0xff] }
 0x2af   : > { %2141 = vst.msk [vmem:[#allocation2 + $0xd0] sm:$0xff] %vm480_vm4, %v2093_v3 }
 0x2b0   : > { %v2290_v38 = vpop.f32.mrf.mxu3 }
 0x2b1   : > { %v6433_v21 = vadd.f32 %v2290_v38, %v6175_v40  ;;  %v6449_v40 = vld [vmem:[%s7281_s1 + $0x1a8] sm:$0xff] }
 0x2b2   : > { %v2393_v13 = vpop.f32.mrf.mxu1  ;;  %v2341_v27 = vpop.f32.mrf.mxu0 }
 0x2b3   : > { %v2484_v58 = vadd.f32 %v2436_v61, %v2393_v13  ;;  %v6441_v9 = vadd.f32 %v2341_v27, %v6172_v15  ;;  %v2445_v27 = vld [vmem:[#allocation2 + $0x88] sm:$0xff] }
 0x2b4   : > { %v2001_v20 = vpop.f32.mrf.mxu2 }
 0x2b5   : > { %2532 = vst.msk [vmem:[#allocation2 + $0x40] sm:$0xff] %vm480_vm4, %v2484_v58  ;;  %v2096_v0 = vadd.f32 %v2048_v43, %v2001_v20  ;;  %4931 = vmatmul.msk.bf16.gmra.mxu1 %vm296_vm1, %v6438_v48 }
 0x2b7   : > { %2144 = vst.msk [vmem:[#allocation2 + $0xe8] sm:$0xff] %vm480_vm4, %v2096_v0 }
 0x2b8   : > { %v2292_v14 = vpop.f32.mrf.mxu3 }
 0x2b9   : > { %v6453_v36 = vadd.f32 %v2292_v14, %v6193_v1  ;;  %4863 = vmatmul.msk.bf16.gmra.mxu2 %vm296_vm1, %v6449_v40  ;;  %v2057_v14 = vld [vmem:[#allocation2 + $0x130] sm:$0xff] }
 0x2ba   : > { %v2395_v15 = vpop.f32.mrf.mxu1  ;;  %v2344_v52 = vpop.f32.mrf.mxu0 }
 0x2bb   : > { %v2487_v33 = vadd.f32 %v2439_v16, %v2395_v15  ;;  %v6458_v56 = vadd.f32 %v2344_v52, %v6190_v39  ;;  %v6472_v39 = vld [vmem:[%s7281_s1 + $0x1d0] sm:$0xff] }
 0x2bc   : > { %v2004_v17 = vpop.f32.mrf.mxu2 }
 0x2bd   : > { %2535 = vst.msk [vmem:[#allocation2 + $0x58] sm:$0xff] %vm480_vm4, %v2487_v33  ;;  %v2099_v47 = vadd.f32 %v2051_v6, %v2004_v17  ;;  %4867 = vmatmul.msk.bf16.gmra.mxu3 %vm296_vm1, %v6316_v60  ;;  %4875 = vmatmul.msk.bf16.gmra.mxu0 %vm296_vm1, %v6316_v60  ;;  %v2054_v60 = vld [vmem:[#allocation2 + $0x118] sm:$0xff]  ;;  %v2448_v33 = vld [vmem:[#allocation2 + $0xa0] sm:$0xff] }
 0x2bf   : > { %2147 = vst.msk [vmem:[#allocation2 + $0x100] sm:$0xff] %vm480_vm4, %v2099_v47 }
 0x2c0   : > { %v2295_v1 = vpop.f32.mrf.mxu3 }
 0x2c1   : > { %v6467_v53 = vadd.f32 %v2295_v1, %v6208_v22  ;;  %v6483_v22 = vld [vmem:[%s7281_s1 + $0x1b0] sm:$0xff] }
 0x2c2   : > { %v2398_v34 = vpop.f32.mrf.mxu1  ;;  %v2346_v31 = vpop.f32.mrf.mxu0 }
 0x2c3   : > { %v2490_v44 = vadd.f32 %v2442_v46, %v2398_v34  ;;  %v6475_v3 = vadd.f32 %v2346_v31, %v6205_v54 }
 0x2c4   : > { %v2006_v63 = vpop.f32.mrf.mxu2 }
 0x2c5   : > { %2538 = vst.msk [vmem:[#allocation2 + $0x70] sm:$0xff] %vm480_vm4, %v2490_v44  ;;  %v2102_v38 = vadd.f32 %v2054_v60, %v2006_v63  ;;  %4932 = vmatmul.msk.bf16.gmra.mxu1 %vm296_vm1, %v6472_v39  ;;  %v2451_v44 = vld [vmem:[#allocation2 + $0xb8] sm:$0xff] }
 0x2c7   : > { %2150 = vst.msk [vmem:[#allocation2 + $0x118] sm:$0xff] %vm480_vm4, %v2102_v38 }
 0x2c8   : > { %v2297_v13 = vpop.f32.mrf.mxu3 }
 0x2c9   : > { %v6487_v61 = vadd.f32 %v2297_v13, %v6223_v12  ;;  %4864 = vmatmul.msk.bf16.gmra.mxu2 %vm296_vm1, %v6483_v22 }
 0x2ca   : > { %v2400_v54 = vpop.f32.mrf.mxu1  ;;  %v2349_v58 = vpop.f32.mrf.mxu0 }
 0x2cb   : > { %v2493_v20 = vadd.f32 %v2445_v27, %v2400_v54  ;;  %v6492_v43 = vadd.f32 %v2349_v58, %v6220_v49  ;;  %v6506_v49 = vld [vmem:[%s7281_s1 + $0x1d8] sm:$0xff]  ;;  %v2063_v54 = vld [vmem:[#allocation2 + $0x160] sm:$0xff] }
 0x2cc   : > { %v2009_v0 = vpop.f32.mrf.mxu2 }
 0x2cd   : > { %2541 = vst.msk [vmem:[#allocation2 + $0x88] sm:$0xff] %vm480_vm4, %v2493_v20  ;;  %v2105_v15 = vadd.f32 %v2057_v14, %v2009_v0  ;;  %4868 = vmatmul.msk.bf16.gmra.mxu3 %vm296_vm1, %v6351_v51  ;;  %4876 = vmatmul.msk.bf16.gmra.mxu0 %vm296_vm1, %v6351_v51  ;;  %v2060_v51 = vld [vmem:[#allocation2 + $0x148] sm:$0xff]  ;;  %v2454_v0 = vld [vmem:[#allocation2 + $0xd0] sm:$0xff] }
 0x2cf   : > { %2153 = vst.msk [vmem:[#allocation2 + $0x130] sm:$0xff] %vm480_vm4, %v2105_v15 }
 0x2d0   : > { %v2300_v12 = vpop.f32.mrf.mxu3 }
 0x2d1   : > { %v6501_v16 = vadd.f32 %v2300_v12, %v6236_v37  ;;  %v6517_v37 = vld [vmem:[%s7281_s1 + $0x1b8] sm:$0xff] }
 0x2d2   : > { %v2403_v52 = vpop.f32.mrf.mxu1  ;;  %v2351_v17 = vpop.f32.mrf.mxu0 }
 0x2d3   : > { %v2496_v6 = vadd.f32 %v2448_v33, %v2403_v52  ;;  %v6509_v47 = vadd.f32 %v2351_v17, %v6233_v19 }
 0x2d4   : > { %v2011_v1 = vpop.f32.mrf.mxu2 }
 0x2d5   : > { %2544 = vst.msk [vmem:[#allocation2 + $0xa0] sm:$0xff] %vm480_vm4, %v2496_v6  ;;  %v2108_v34 = vadd.f32 %v2060_v51, %v2011_v1  ;;  %4933 = vmatmul.msk.bf16.gmra.mxu1 %vm296_vm1, %v6506_v49 }
 0x2d7   : > { %2156 = vst.msk [vmem:[#allocation2 + $0x148] sm:$0xff] %vm480_vm4, %v2108_v34 }
 0x2d8   : > { %v2302_v46 = vpop.f32.mrf.mxu3 }
 0x2d9   : > { %v6521_v31 = vadd.f32 %v2302_v46, %v6251_v50  ;;  %4865 = vmatmul.msk.bf16.gmra.mxu2 %vm296_vm1, %v6517_v37 }
 0x2da   : > { %v2405_v19 = vpop.f32.mrf.mxu1  ;;  %v2354_v63 = vpop.f32.mrf.mxu0 }
 0x2db   : > { %v2499_v60 = vadd.f32 %v2451_v44, %v2405_v19  ;;  %v6526_v38 = vadd.f32 %v2354_v63, %v6248_v29  ;;  %v6540_v29 = vld [vmem:[%s7281_s1 + $0x1e0] sm:$0xff]  ;;  %v5269_v63 = vmov 0  }
 0x2dc   : > { %v2014_v13 = vpop.f32.mrf.mxu2  ;;  %5195 = vset.pattern.permute.xlu1 %v5269_v63  ;;  %5194 = vset.pattern.permute.xlu0 %v5269_v63 }
 0x2dd   : > { %2547 = vst.msk [vmem:[#allocation2 + $0xb8] sm:$0xff] %vm480_vm4, %v2499_v60  ;;  %v2111_v27 = vadd.f32 %v2063_v54, %v2014_v13  ;;  %4869 = vmatmul.msk.bf16.gmra.mxu3 %vm296_vm1, %v6381_v10  ;;  %4877 = vmatmul.msk.bf16.gmra.mxu0 %vm296_vm1, %v6381_v10  ;;  %v2066_v10 = vld [vmem:[#allocation2 + $0x178] sm:$0xff]  ;;  %v2460_v13 = vld [vmem:[#allocation2 + $0x100] sm:$0xff] }
 0x2de   : > { %5196 = vset.pattern.permute.xlu2 %v5269_v63  ;;  %v3853_v63 = vld [vmem:[%s7282_s2 + $0x30] sm:$0xff] }
 0x2df   : > { %2159 = vst.msk [vmem:[#allocation2 + $0x160] sm:$0xff] %vm480_vm4, %v2111_v27 }
 0x2e0   : > { %v2305_v50 = vpop.f32.mrf.mxu3 }
 0x2e1   : > { %v6535_v58 = vadd.f32 %v2305_v50, %v6264_v11 }
 0x2e2   : > { %v2408_v20 = vpop.f32.mrf.mxu1  ;;  %v2356_v14 = vpop.f32.mrf.mxu0 }
 0x2e3   : > { %v2502_v15 = vadd.f32 %v2454_v0, %v2408_v20  ;;  %v6543_v12 = vadd.f32 %v2356_v14, %v6261_v55  ;;  %v2457_v55 = vld [vmem:[#allocation2 + $0xe8] sm:$0xff] }
 0x2e4   : > { %v2016_v52 = vpop.f32.mrf.mxu2 }
 0x2e5   : > { %2550 = vst.msk [vmem:[#allocation2 + $0xd0] sm:$0xff] %vm480_vm4, %v2502_v15  ;;  %v2114_v33 = vadd.f32 %v2066_v10, %v2016_v52  ;;  %4934 = vmatmul.msk.bf16.gmra.mxu1 %vm296_vm1, %v6540_v29  ;;  %v3858_v15 = vld [vmem:[%s7282_s2 + $0x58] sm:$0xff]  ;;  %v2463_v52 = vld [vmem:[#allocation2 + $0x118] sm:$0xff] }
 0x2e7   : > { %2162 = vst.msk [vmem:[#allocation2 + $0x178] sm:$0xff] %vm480_vm4, %v2114_v33 }
 0x2e8   : > { %v2307_v11 = vpop.f32.mrf.mxu3 }
 0x2e9   : > { %v6550_v17 = vadd.f32 %v2307_v11, %v6279_v35  ;;  %4938 = vmatmul.msk.bf16.vlgmr.msra.gmra.mxu2 %vm296_vm1, %v6400_v24 }
 0x2ea   : > { %v2410_v6 = vpop.f32.mrf.mxu1  ;;  %v2359_v1 = vpop.f32.mrf.mxu0 }
 0x2eb   : > { %v2505_v51 = vadd.f32 %v2457_v55, %v2410_v6  ;;  %v6555_v34 = vadd.f32 %v2359_v1, %v6276_v26  ;;  %v6571_v26 = vld [vmem:[%s7281_s1 + $0x1e8] sm:$0xff] }
 0x2ec   : > { %v2699_v46 = vpop.f32.mrf.mxu2 }
 0x2ed   : > { %2553 = vst.msk [vmem:[#allocation2 + $0xe8] sm:$0xff] %vm480_vm4, %v2505_v51  ;;  %v6559_v19 = vadd.f32 %v2699_v46, %v6433_v21  ;;  %4870 = vmatmul.msk.bf16.gmra.mxu3 %vm296_vm1, %v6412_v32  ;;  %4878 = vmatmul.msk.bf16.gmra.mxu0 %vm296_vm1, %v6412_v32  ;;  %v3862_v21 = vld [vmem:[%s7282_s2 + $0x78] sm:$0xff]  ;;  %v3861_v32 = vld [vmem:[%s7282_s2 + $0x70] sm:$0xff] }
 0x2ee   : > { %3940 = vperm.xlu1 %5195, %v3862_v21   ;;  %3935 = vperm.xlu0 %5194, %v3861_v32   ;;  %v2466_v32 = vld [vmem:[#allocation2 + $0x130] sm:$0xff] }
 0x2ef   : > { %v3471_v55 = vpop.permute.xlu2 %3470 }
 0x2f0   : > { %v2310_v35 = vpop.f32.mrf.mxu3  ;;  %v3506_v51 = vsel %vm321_vm0, %v3471_v55, 0  ;;  %v3469_v46 = vpop.permute.xlu1 %3468 }
 0x2f1   : > { %v6566_v44 = vadd.f32 %v2310_v35, %v6297_v7  ;;  %v3474_v35 = vsel %vm3472_vm10, %v3469_v46, %v3471_v55  ;;  %3613 = vmatpush.bf16.msrb.mxu2 %v3506_v51 }
 0x2f2   : > { %v2413_v60 = vpop.f32.mrf.mxu1  ;;  %v2361_v7 = vpop.f32.mrf.mxu0 }
 0x2f3   : > { %v2508_v54 = vadd.f32 %v2460_v13, %v2413_v60  ;;  %v6580_v27 = vadd.f32 %v2361_v7, %v6294_v42  ;;  %v3860_v42 = vld [vmem:[%s7282_s2 + $0x68] sm:$0xff]  ;;  %v3503_v60 = vsel %vm321_vm0, %v3474_v35, 0 }
 0x2f4   : > { %v2701_v50 = vpop.f32.mrf.mxu2  ;;  %3564 = vmatpush.bf16.msra.mxu1 %v3503_v60 }
 0x2f5   : > { %2556 = vst.msk [vmem:[#allocation2 + $0x100] sm:$0xff] %vm480_vm4, %v2508_v54  ;;  %v6584_v20 = vadd.f32 %v2701_v50, %v6453_v36  ;;  %4935 = vmatmul.msk.bf16.gmra.mxu1 %vm296_vm1, %v6571_v26 }
 0x2f6   : > { %3930 = vperm.xlu1 %5195, %v3860_v42   ;;  %3920 = vperm.xlu0 %5194, %v3858_v15  }
 0x2f8   : > { %v2312_v0 = vpop.f32.mrf.mxu3 }
 0x2f9   : > { %v6589_v14 = vadd.f32 %v2312_v0, %v6310_v62  ;;  %4939 = vmatmul.msk.bf16.gmra.mxu2 %vm296_vm1, %v6438_v48  ;;  %v3467_v42 = vpop.permute.xlu0 %3466 }
 0x2fa   : > { %v2415_v36 = vpop.f32.mrf.mxu1  ;;  %v2364_v10 = vpop.f32.mrf.mxu0 }
 0x2fb   : > { %v2511_v33 = vadd.f32 %v2463_v52, %v2415_v36  ;;  %v6600_v62 = vadd.f32 %v2364_v10, %v6307_v23  ;;  %v3854_v36 = vld [vmem:[%s7282_s2 + $0x38] sm:$0xff]  ;;  %v2469_v10 = vld [vmem:[#allocation2 + $0x148] sm:$0xff] }
 0x2fc   : > { %v2704_v11 = vpop.f32.mrf.mxu2 }
 0x2fd   : > { %2559 = vst.msk [vmem:[#allocation2 + $0x118] sm:$0xff] %vm480_vm4, %v2511_v33  ;;  %v6604_v6 = vadd.f32 %v2704_v11, %v6467_v53  ;;  %4871 = vmatmul.msk.bf16.gmra.mxu3 %vm296_vm1, %v6449_v40  ;;  %4879 = vmatmul.msk.bf16.gmra.mxu0 %vm296_vm1, %v6449_v40  ;;  %v6617_v53 = vld [vmem:[%s7281_s1 + $0x1f0] sm:$0xff]  ;;  %v3855_v40 = vld [vmem:[%s7282_s2 + $0x40] sm:$0xff] }
 0x2fe   : > { %3905 = vperm.xlu1 %5195, %v3855_v40   ;;  %3895 = vperm.xlu0 %5194, %v3853_v63   ;;  %v3847_v40 = vld [vmem:[%s7282_s2] sm:$0xff] }
 0x300   : > { %v2315_v1 = vpop.f32.mrf.mxu3 }
 0x301   : > { %v6612_v23 = vadd.f32 %v2315_v1, %v6326_v45 }
 0x302   : > { %v2418_v21 = vpop.f32.mrf.mxu1  ;;  %v2366_v45 = vpop.f32.mrf.mxu0 }
 0x303   : > { %v2514_v13 = vadd.f32 %v2466_v32, %v2418_v21  ;;  %v6628_v7 = vadd.f32 %v2366_v45, %v6323_v4  ;;  %v3473_v4 = vsel %vm3472_vm10, %v3467_v42, %v3469_v46  ;;  %v2472_v21 = vld [vmem:[#allocation2 + $0x160] sm:$0xff]  ;;  %v2475_v42 = vld [vmem:[#allocation2 + $0x178] sm:$0xff] }
 0x304   : > { %v2706_v54 = vpop.f32.mrf.mxu2  ;;  %v3500_v11 = vsel %vm321_vm0, %v3473_v4, 0 }
 0x305   : > { %2562 = vst.msk [vmem:[#allocation2 + $0x130] sm:$0xff] %vm480_vm4, %v2514_v13  ;;  %v6632_v50 = vadd.f32 %v2706_v54, %v6487_v61  ;;  %4936 = vmatmul.msk.bf16.gmra.mxu1 %vm296_vm1, %v6617_v53  ;;  %v3852_v61 = vld [vmem:[%s7282_s2 + $0x28] sm:$0xff]  ;;  %3515 = vmatpush.bf16.msra.mxu0 %v3500_v11 }
 0x306   : > { %3900 = vperm.xlu1 %5195, %v3854_v36   ;;  %3890 = vperm.xlu0 %5194, %v3852_v61  }
 0x308   : > { %v2317_v0 = vpop.f32.mrf.mxu3 }
 0x309   : > { %v6637_v15 = vadd.f32 %v2317_v0, %v6345_v28  ;;  %4940 = vmatmul.msk.bf16.gmra.mxu2 %vm296_vm1, %v6472_v39 }
 0x30a   : > { %v2420_v52 = vpop.f32.mrf.mxu1  ;;  %v2369_v33 = vpop.f32.mrf.mxu0 }
 0x30b   : > { %v2517_v28 = vadd.f32 %v2469_v10, %v2420_v52  ;;  %v6650_v55 = vadd.f32 %v2369_v33, %v6342_v57  ;;  %v6666_v57 = vld [vmem:[%s7281_s1 + $0x1f8] sm:$0xff] }
 0x30c   : > { %v2709_v1 = vpop.f32.mrf.mxu2 }
 0x30d   : > { %2565 = vst.msk [vmem:[#allocation2 + $0x148] sm:$0xff] %vm480_vm4, %v2517_v28  ;;  %v6654_v51 = vadd.f32 %v2709_v1, %v6501_v16  ;;  %4872 = vmatmul.msk.bf16.gmra.mxu3 %vm296_vm1, %v6483_v22  ;;  %4880 = vmatmul.msk.bf16.gmra.mxu0 %vm296_vm1, %v6483_v22  ;;  %v3849_v16 = vld [vmem:[%s7282_s2 + $0x10] sm:$0xff] }
 0x30e   : > { %3875 = vperm.xlu1 %5195, %v3849_v16   ;;  %3865 = vperm.xlu0 %5194, %v3847_v40  }
 0x310   : > { %v2320_v46 = vpop.f32.mrf.mxu3 }
 0x311   : > { %v6661_v35 = vadd.f32 %v2320_v46, %v6361_v25 }
 0x312   : > { %v2423_v63 = vpop.f32.mrf.mxu1  ;;  %v2371_v22 = vpop.f32.mrf.mxu0 }
 0x313   : > { %v2520_v25 = vadd.f32 %v2472_v21, %v2423_v63  ;;  %v6675_v32 = vadd.f32 %v2371_v22, %v6358_v5  ;;  %v3848_v5 = vld [vmem:[%s7282_s2 + $0x8] sm:$0xff]  ;;  %v2839_v63 = vld [vmem:[#allocation2 + $0x10] sm:$0xff] }
 0x314   : > { %v2711_v45 = vpop.f32.mrf.mxu2 }
 0x315   : > { %7318 = vst [vmem:[#allocation6_spill] sm:$0xff] %v6675_v32  ;;  %v6679_v60 = vadd.f32 %v2711_v45, %v6521_v31  ;;  %4937 = vmatmul.msk.bf16.gmra.mxu1 %vm296_vm1, %v6666_v57 }
 0x316   : > { %2568 = vst.msk [vmem:[#allocation2 + $0x160] sm:$0xff] %vm480_vm4, %v2520_v25  ;;  %3870 = vperm.xlu1 %5195, %v3848_v5  }
 0x318   : > { %v2322_v13 = vpop.f32.mrf.mxu3 }
 0x319   : > { %v6684_v54 = vadd.f32 %v2322_v13, %v6375_v18  ;;  %4941 = vmatmul.msk.bf16.gmra.mxu2 %vm296_vm1, %v6506_v49 }
 0x31a   : > { %v2425_v0 = vpop.f32.mrf.mxu1  ;;  %v2374_v4 = vpop.f32.mrf.mxu0 }
 0x31b   : > { %v2523_v31 = vadd.f32 %v2475_v42, %v2425_v0  ;;  %v6692_v36 = vadd.f32 %v2374_v4, %v6372_v2  ;;  %v6708_v2 = vld [vmem:[%s7281_s1 + $0x200] sm:$0xff]  ;;  %v2842_v0 = vld [vmem:[#allocation2 + $0x28] sm:$0xff] }
 0x31c   : > { %v2714_v61 = vpop.f32.mrf.mxu2 }
 0x31d   : > { %2571 = vst.msk [vmem:[#allocation2 + $0x178] sm:$0xff] %vm480_vm4, %v2523_v31  ;;  %v6696_v18 = vadd.f32 %v2714_v61, %v6535_v58  ;;  %4873 = vmatmul.msk.bf16.gmra.mxu3 %vm296_vm1, %v6517_v37  ;;  %4881 = vmatmul.msk.bf16.gmra.mxu0 %vm296_vm1, %v6517_v37  ;;  %v3859_v58 = vld [vmem:[%s7282_s2 + $0x60] sm:$0xff] }
 0x31e   : > { %3925 = vperm.xlu2 %5196, %v3859_v58  }
 0x320   : > { %v2325_v52 = vpop.f32.mrf.mxu3 }
 0x321   : > { %v6703_v10 = vadd.f32 %v2325_v52, %v6392_v59 }
 0x322   : > { %v3108_v33 = vpop.f32.mrf.mxu1  ;;  %v2376_v11 = vpop.f32.mrf.mxu0 }
 0x323   : > { %v6714_v28 = vadd.f32 %v3108_v33, %v6559_v19  ;;  %v6717_v37 = vadd.f32 %v2376_v11, %v6389_v8  ;;  %v3857_v19 = vld [vmem:[%s7282_s2 + $0x50] sm:$0xff]  ;;  %v2845_v33 = vld [vmem:[#allocation2 + $0x40] sm:$0xff] }
 0x324   : > { %v2716_v59 = vpop.f32.mrf.mxu2 }
 0x325   : > { %7319 = vst [vmem:[#allocation12_spill] sm:$0xff] %v6717_v37  ;;  %v6720_v1 = vadd.f32 %v2716_v59, %v6550_v17  ;;  %5010 = vmatmul.msk.bf16.vlgmr.msra.gmra.mxu1 %vm296_vm1, %v6708_v2 }
 0x326   : > { %3915 = vperm.xlu2 %5196, %v3857_v19  }
 0x328   : > { %v2327_v46 = vpop.f32.mrf.mxu3 }
 0x329   : > { %v6725_v16 = vadd.f32 %v2327_v46, %v6404_v30  ;;  %4942 = vmatmul.msk.bf16.gmra.mxu2 %vm296_vm1, %v6540_v29 }
 0x32a   : > { %v3110_v8 = vpop.f32.mrf.mxu1  ;;  %v2797_v40 = vpop.f32.mrf.mxu0 }
 0x32b   : > { %v6733_v17 = vadd.f32 %v3110_v8, %v6584_v20  ;;  %v2887_v21 = vadd.f32 %v2839_v63, %v2797_v40  ;;  %v6749_v20 = vld [vmem:[%s7281_s1 + $0x208] sm:$0xff]  ;;  %v2848_v63 = vld [vmem:[#allocation2 + $0x58] sm:$0xff] }
 0x32c   : > { %v2719_v22 = vpop.f32.mrf.mxu2 }
 0x32d   : > { %2935 = vst.msk [vmem:[#allocation2 + $0x10] sm:$0xff] %vm480_vm4, %v2887_v21  ;;  %v6737_v30 = vadd.f32 %v2719_v22, %v6566_v44  ;;  %4946 = vmatmul.msk.bf16.vlgmr.msra.gmra.mxu3 %vm296_vm1, %v6400_v24  ;;  %5002 = vmatmul.msk.bf16.vlgmr.msra.gmra.mxu0 %vm296_vm1, %v6708_v2  ;;  %v3856_v44 = vld [vmem:[%s7282_s2 + $0x48] sm:$0xff] }
 0x32e   : > { %3910 = vperm.xlu2 %5196, %v3856_v44  }
 0x330   : > { %v2748_v25 = vpop.f32.mrf.mxu3 }
 0x331   : > { %v6744_v45 = vadd.f32 %v2748_v25, %v6420_v41 }
 0x332   : > { %v3113_v13 = vpop.f32.mrf.mxu1  ;;  %v2799_v5 = vpop.f32.mrf.mxu0 }
 0x333   : > { %v6755_v24 = vadd.f32 %v3113_v13, %v6604_v6  ;;  %v2890_v42 = vadd.f32 %v2842_v0, %v2799_v5  ;;  %v3851_v6 = vld [vmem:[%s7282_s2 + $0x20] sm:$0xff]  ;;  %v2851_v5 = vld [vmem:[#allocation2 + $0x70] sm:$0xff] }
 0x334   : > { %v2721_v4 = vpop.f32.mrf.mxu2 }
 0x335   : > { %2938 = vst.msk [vmem:[#allocation2 + $0x28] sm:$0xff] %vm480_vm4, %v2890_v42  ;;  %v6759_v41 = vadd.f32 %v2721_v4, %v6589_v14  ;;  %5011 = vmatmul.msk.bf16.gmra.mxu1 %vm296_vm1, %v6749_v20 }
 0x336   : > { %3885 = vperm.xlu2 %5196, %v3851_v6  }
 0x338   : > { %v2750_v31 = vpop.f32.mrf.mxu3 }
 0x339   : > { %v6764_v61 = vadd.f32 %v2750_v31, %v6441_v9  ;;  %4943 = vmatmul.msk.bf16.gmra.mxu2 %vm296_vm1, %v6571_v26 }
 0x33a   : > { %v3115_v52 = vpop.f32.mrf.mxu1  ;;  %v2802_v58 = vpop.f32.mrf.mxu0 }
 0x33b   : > { %v6772_v14 = vadd.f32 %v3115_v52, %v6632_v50  ;;  %v2893_v11 = vadd.f32 %v2845_v33, %v2802_v58  ;;  %v6788_v50 = vld [vmem:[%s7281_s1 + $0x210] sm:$0xff] }
 0x33c   : > { %v2724_v59 = vpop.f32.mrf.mxu2  ;;  %v2854_v58 = vld [vmem:[#allocation2 + $0x88] sm:$0xff] }
 0x33d   : > { %2941 = vst.msk [vmem:[#allocation2 + $0x40] sm:$0xff] %vm480_vm4, %v2893_v11  ;;  %v6776_v9 = vadd.f32 %v2724_v59, %v6612_v23  ;;  %4947 = vmatmul.msk.bf16.gmra.mxu3 %vm296_vm1, %v6438_v48  ;;  %5003 = vmatmul.msk.bf16.gmra.mxu0 %vm296_vm1, %v6749_v20  ;;  %v3850_v23 = vld [vmem:[%s7282_s2 + $0x18] sm:$0xff] }
 0x33e   : > { %3880 = vperm.xlu2 %5196, %v3850_v23   ;;  %v2857_v23 = vld [vmem:[#allocation2 + $0xa0] sm:$0xff] }
 0x340   : > { %v2753_v46 = vpop.f32.mrf.mxu3 }
 0x341   : > { %v6783_v19 = vadd.f32 %v2753_v46, %v6458_v56 }
 0x342   : > { %v3118_v8 = vpop.f32.mrf.mxu1  ;;  %v2804_v40 = vpop.f32.mrf.mxu0 }
 0x343   : > { %v6794_v48 = vadd.f32 %v3118_v8, %v6654_v51  ;;  %v2896_v21 = vadd.f32 %v2848_v63, %v2804_v40 }
 0x344   : > { %v2726_v22 = vpop.f32.mrf.mxu2 }
 0x345   : > { %2944 = vst.msk [vmem:[#allocation2 + $0x58] sm:$0xff] %vm480_vm4, %v2896_v21  ;;  %v6798_v56 = vadd.f32 %v2726_v22, %v6637_v15  ;;  %5012 = vmatmul.msk.bf16.gmra.mxu1 %vm296_vm1, %v6788_v50 }
 0x348   : > { %v2755_v25 = vpop.f32.mrf.mxu3 }
 0x349   : > { %v6803_v44 = vadd.f32 %v2755_v25, %v6475_v3  ;;  %4944 = vmatmul.msk.bf16.gmra.mxu2 %vm296_vm1, %v6617_v53 }
 0x34a   : > { %v3120_v13 = vpop.f32.mrf.mxu1  ;;  %v2807_v51 = vpop.f32.mrf.mxu0 }
 0x34b   : > { %v6808_v0 = vadd.f32 %v3120_v13, %v6679_v60  ;;  %v2899_v42 = vadd.f32 %v2851_v5, %v2807_v51  ;;  %v6824_v60 = vld [vmem:[%s7281_s1 + $0x218] sm:$0xff]  ;;  %v2860_v13 = vld [vmem:[#allocation2 + $0xb8] sm:$0xff] }
 0x34c   : > { %v2729_v4 = vpop.f32.mrf.mxu2 }
 0x34d   : > { %2947 = vst.msk [vmem:[#allocation2 + $0x70] sm:$0xff] %vm480_vm4, %v2899_v42  ;;  %v6812_v15 = vadd.f32 %v2729_v4, %v6661_v35  ;;  %4948 = vmatmul.msk.bf16.gmra.mxu3 %vm296_vm1, %v6472_v39  ;;  %5004 = vmatmul.msk.bf16.gmra.mxu0 %vm296_vm1, %v6788_v50 }
 0x350   : > { %v2758_v3 = vpop.f32.mrf.mxu3 }
 0x351   : > { %v6819_v31 = vadd.f32 %v2758_v3, %v6492_v43  ;;  %v2863_v3 = vld [vmem:[#allocation2 + $0xd0] sm:$0xff] }
 0x352   : > { %v3123_v6 = vpop.f32.mrf.mxu1  ;;  %v2809_v52 = vpop.f32.mrf.mxu0 }
 0x353   : > { %v6827_v35 = vadd.f32 %v3123_v6, %v6696_v18  ;;  %v2902_v33 = vadd.f32 %v2854_v58, %v2809_v52 }
 0x354   : > { %v2731_v39 = vpop.f32.mrf.mxu2 }
 0x355   : > { %2950 = vst.msk [vmem:[#allocation2 + $0x88] sm:$0xff] %vm480_vm4, %v2902_v33  ;;  %v6831_v11 = vadd.f32 %v2731_v39, %v6684_v54  ;;  %5013 = vmatmul.msk.bf16.gmra.mxu1 %vm296_vm1, %v6824_v60  ;;  %v2866_v39 = vld [vmem:[#allocation2 + $0xe8] sm:$0xff] }
 0x357   : > { %7320 = vst [vmem:[#allocation7_spill] sm:$0xff] %v6831_v11 }
 0x358   : > { %v2760_v43 = vpop.f32.mrf.mxu3 }
 0x359   : > { %v6836_v59 = vadd.f32 %v2760_v43, %v6509_v47  ;;  %4945 = vmatmul.msk.bf16.gmra.mxu2 %vm296_vm1, %v6666_v57 }
 0x35a   : > { %v3125_v46 = vpop.f32.mrf.mxu1  ;;  %v2812_v18 = vpop.f32.mrf.mxu0 }
 0x35b   : > { %v6841_v8 = vadd.f32 %v3125_v46, %v6720_v1  ;;  %v2905_v40 = vadd.f32 %v2857_v23, %v2812_v18  ;;  %v6857_v1 = vld [vmem:[%s7281_s1 + $0x220] sm:$0xff] }
 0x35c   : > { %v2734_v63 = vpop.f32.mrf.mxu2 }
 0x35d   : > { %2953 = vst.msk [vmem:[#allocation2 + $0xa0] sm:$0xff] %vm480_vm4, %v2905_v40  ;;  %v6845_v54 = vadd.f32 %v2734_v63, %v6703_v10  ;;  %4949 = vmatmul.msk.bf16.gmra.mxu3 %vm296_vm1, %v6506_v49  ;;  %5005 = vmatmul.msk.bf16.gmra.mxu0 %vm296_vm1, %v6824_v60 }
 0x360   : > { %v2763_v47 = vpop.f32.mrf.mxu3 }
 0x361   : > { %v6852_v21 = vadd.f32 %v2763_v47, %v6526_v38 }
 0x362   : > { %v3128_v22 = vpop.f32.mrf.mxu1  ;;  %v2814_v25 = vpop.f32.mrf.mxu0 }
 0x363   : > { %v6860_v10 = vadd.f32 %v3128_v22, %v6737_v30  ;;  %v2908_v51 = vadd.f32 %v2860_v13, %v2814_v25  ;;  %v6913_v22 = vpop.permute.xlu0 %3935  ;;  %v6921_v13 = vld [vmem:[%s7281_s1 + $0x230] sm:$0xff] }
 0x364   : > { %v2736_v49 = vpop.f32.mrf.mxu2  ;;  %7323 = vst [vmem:[#allocation14_spill] sm:$0xff] %v6913_v22 }
 0x365   : > { %2956 = vst.msk [vmem:[#allocation2 + $0xb8] sm:$0xff] %vm480_vm4, %v2908_v51  ;;  %v6864_v5 = vadd.f32 %v2736_v49, %v6725_v16  ;;  %5014 = vmatmul.msk.bf16.gmra.mxu1 %vm296_vm1, %v6857_v1 }
 0x367   : > { %7321 = vst [vmem:[#allocation13_spill] sm:$0xff] %v6864_v5 }
 0x368   : > { %v2765_v38 = vpop.f32.mrf.mxu3 }
 0x369   : > { %v6869_v42 = vadd.f32 %v2765_v38, %v6543_v12  ;;  %5018 = vmatmul.msk.bf16.vlgmr.msrb.gmra.mxu2 %vm296_vm1, %v6708_v2  ;;  %v6888_v2 = vld [vmem:[%s7281_s1 + $0x228] sm:$0xff] }
 0x36a   : > { %v6873_v4 = vpop.f32.mrf.mxu1  ;;  %v2817_v30 = vpop.f32.mrf.mxu0 }
 0x36b   : > { %v2911_v6 = vadd.f32 %v2863_v3, %v2817_v30  ;;  %v2872_v30 = vld [vmem:[#allocation2 + $0x118] sm:$0xff] }
 0x36c   : > { %v6875_v52 = vpop.f32.mrf.mxu2 }
 0x36d   : > { %2959 = vst.msk [vmem:[#allocation2 + $0xd0] sm:$0xff] %vm480_vm4, %v2911_v6  ;;  %4950 = vmatmul.msk.bf16.gmra.mxu3 %vm296_vm1, %v6540_v29  ;;  %5006 = vmatmul.msk.bf16.gmra.mxu0 %vm296_vm1, %v6857_v1 }
 0x370   : > { %v2768_v12 = vpop.f32.mrf.mxu3 }
 0x371   : > { %v6883_v16 = vadd.f32 %v2768_v12, %v6555_v34  ;;  %v6898_v34 = vpop.permute.xlu1 %3940  ;;  %v6937_v12 = vpop.permute.xlu0 %3920 }
 0x372   : > { %v3133_v58 = vpop.f32.mrf.mxu1  ;;  %v2819_v33 = vpop.f32.mrf.mxu0  ;;  %7322 = vst [vmem:[#allocation8_spill] sm:$0xff] %v6898_v34 }
 0x373   : > { %v6891_v43 = vadd.f32 %v3133_v58, %v6776_v9  ;;  %v2914_v46 = vadd.f32 %v2866_v39, %v2819_v33  ;;  %v2869_v9 = vld [vmem:[#allocation2 + $0x100] sm:$0xff] }
 0x374   : > { %v6893_v29 = vpop.f32.mrf.mxu2 }
 0x375   : > { %2962 = vst.msk [vmem:[#allocation2 + $0xe8] sm:$0xff] %vm480_vm4, %v2914_v46  ;;  %5015 = vmatmul.msk.bf16.gmra.mxu1 %vm296_vm1, %v6888_v2 }
 0x378   : > { %v6900_v18 = vpop.f32.mrf.mxu3 }
 0x379   : > { %5019 = vmatmul.msk.bf16.gmra.mxu2 %vm296_vm1, %v6749_v20  ;;  %v6923_v51 = vpop.permute.xlu1 %3930 }
 0x37a   : > { %v6904_v23 = vpop.f32.mrf.mxu1  ;;  %v2822_v40 = vpop.f32.mrf.mxu0  ;;  %7324 = vst [vmem:[#allocation9_spill] sm:$0xff] %v6923_v51 }
 0x37b   : > { %v2917_v63 = vadd.f32 %v2869_v9, %v2822_v40 }
 0x37c   : > { %v6906_v47 = vpop.f32.mrf.mxu2 }
 0x37d   : > { %2965 = vst.msk [vmem:[#allocation2 + $0x100] sm:$0xff] %vm480_vm4, %v2917_v63  ;;  %4951 = vmatmul.msk.bf16.gmra.mxu3 %vm296_vm1, %v6571_v26  ;;  %5007 = vmatmul.msk.bf16.gmra.mxu0 %vm296_vm1, %v6888_v2  ;;  %v6956_v63 = vld [vmem:[%s7281_s1 + $0x238] sm:$0xff] }
 0x380   : > { %v2773_v25 = vpop.f32.mrf.mxu3 }
 0x381   : > { %v6916_v20 = vadd.f32 %v2773_v25, %v6600_v62  ;;  %v6941_v46 = vpop.permute.xlu1 %3905  ;;  %v6958_v25 = vpop.permute.xlu2 %3925 }
 0x382   : > { %v3138_v49 = vpop.f32.mrf.mxu1  ;;  %v2824_v38 = vpop.f32.mrf.mxu0  ;;  %7328 = vst [vmem:[#allocation16_spill] sm:$0xff] %v6958_v25 }
 0x383   : > { %v6926_v26 = vadd.f32 %v3138_v49, %v6812_v15  ;;  %v2920_v3 = vadd.f32 %v2872_v30, %v2824_v38  ;;  %v2875_v15 = vld [vmem:[#allocation2 + $0x130] sm:$0xff]  ;;  %v2878_v30 = vld [vmem:[#allocation2 + $0x148] sm:$0xff] }
 0x384   : > { %v6928_v6 = vpop.f32.mrf.mxu2 }
 0x385   : > { %7325 = vst [vmem:[#allocation15_spill] sm:$0xff] %v6926_v26  ;;  %5016 = vmatmul.msk.bf16.gmra.mxu1 %vm296_vm1, %v6921_v13 }
 0x386   : > { %2968 = vst.msk [vmem:[#allocation2 + $0x118] sm:$0xff] %vm480_vm4, %v2920_v3 }
 0x388   : > { %v6933_v62 = vpop.f32.mrf.mxu3 }
 0x389   : > { %5020 = vmatmul.msk.bf16.gmra.mxu2 %vm296_vm1, %v6788_v50 }
 0x38a   : > { %v6939_v58 = vpop.f32.mrf.mxu1  ;;  %v2827_v33 = vpop.f32.mrf.mxu0 }
 0x38b   : > { %7326 = vst [vmem:[#allocation10_spill] sm:$0xff] %v6939_v58  ;;  %v2923_v39 = vadd.f32 %v2875_v15, %v2827_v33  ;;  %v6965_v15 = vpop.permute.xlu0 %3895 }
 0x38c   : > { %v6943_v40 = vpop.f32.mrf.mxu2 }
 0x38d   : > { %2971 = vst.msk [vmem:[#allocation2 + $0x130] sm:$0xff] %vm480_vm4, %v2923_v39  ;;  %4952 = vmatmul.msk.bf16.gmra.mxu3 %vm296_vm1, %v6617_v53  ;;  %5008 = vmatmul.msk.bf16.gmra.mxu0 %vm296_vm1, %v6921_v13 }
 0x390   : > { %v2778_v50 = vpop.f32.mrf.mxu3 }
 0x391   : > { %v6951_v9 = vadd.f32 %v2778_v50, %v6650_v55  ;;  %v6970_v55 = vpop.permute.xlu1 %3900 }
 0x392   : > { %v3143_v49 = vpop.f32.mrf.mxu1  ;;  %v2829_v38 = vpop.f32.mrf.mxu0 }
 0x393   : > { %7327 = vst [vmem:[#allocation11_spill] sm:$0xff] %v6951_v9  ;;  %v6961_v3 = vadd.f32 %v3143_v49, %v6845_v54  ;;  %v2926_v53 = vadd.f32 %v2878_v30, %v2829_v38  ;;  %v2881_v49 = vld [vmem:[#allocation2 + $0x160] sm:$0xff]  ;;  %v6978_v30 = vpop.permute.xlu2 %3915 }
 0x394   : > { %v6963_v33 = vpop.f32.mrf.mxu2 }
 0x395   : > { %7329 = vst [vmem:[#allocation17_spill] sm:$0xff] %v6961_v3  ;;  %5017 = vmatmul.msk.bf16.gmra.mxu1 %vm296_vm1, %v6956_v63 }
 0x396   : > { %2974 = vst.msk [vmem:[#allocation2 + $0x148] sm:$0xff] %vm480_vm4, %v2926_v53  ;;  %v6987_v53 = vpop.permute.xlu0 %3890 }
 0x398   : > { %v6972_v39 = vpop.f32.mrf.mxu3 }
 0x399   : > { %7330 = vst [vmem:[#allocation18_spill] sm:$0xff] %v6972_v39  ;;  %5021 = vmatmul.msk.bf16.gmra.mxu2 %vm296_vm1, %v6824_v60  ;;  %v6989_v60 = vpop.permute.xlu1 %3875 }
 0x39a   : > { %v6976_v50 = vpop.f32.mrf.mxu1  ;;  %v2832_v54 = vpop.f32.mrf.mxu0 }
 0x39b   : > { %7331 = vst [vmem:[#allocation19_spill] sm:$0xff] %v6976_v50  ;;  %v2929_v38 = vadd.f32 %v2881_v49, %v2832_v54  ;;  %v3295_v54 = vadd.f32 %v6875_v52, %v6744_v45  ;;  %v6998_v58 = vpop.permute.xlu2 %3910  ;;  %v3298_v45 = vadd.f32 %v6893_v29, %v6764_v61  ;;  %v3248_v29 = vld [vmem:[#allocation2 + $0x10] sm:$0xff] }
 0x39c   : > { %v6980_v5 = vpop.f32.mrf.mxu2 }
 0x39d   : > { %2977 = vst.msk [vmem:[#allocation2 + $0x160] sm:$0xff] %vm480_vm4, %v2929_v38  ;;  %4953 = vmatmul.msk.bf16.gmra.mxu3 %vm296_vm1, %v6666_v57  ;;  %5009 = vmatmul.msk.bf16.gmra.mxu0 %vm296_vm1, %v6956_v63  ;;  %v2884_v38 = vld [vmem:[#allocation2 + $0x178] sm:$0xff] }
 0x39e   : > { %v7003_v51 = vpop.permute.xlu0 %3865 }
 0x3a0   : > { %v2783_v50 = vpop.f32.mrf.mxu3 }
 0x3a1   : > { %v6994_v49 = vadd.f32 %v2783_v50, %v6692_v36  ;;  %v7009_v36 = vpop.permute.xlu1 %3870 }
 0x3a2   : > { %v3566_v34 = vpop.f32.mrf.mxu1  ;;  %v2834_v22 = vpop.f32.mrf.mxu0 }
 0x3a3   : > { %7332 = vst [vmem:[#allocation20_spill] sm:$0xff] %v6994_v49  ;;  %v3704_v3 = vadd.f32 %v3566_v34, %v3295_v54  ;;  %v2932_v37 = vadd.f32 %v2884_v38, %v2834_v22  ;;  %v7016_v25 = vpop.permute.xlu2 %3885 }
 0x3a4   : > { %v6996_v57 = vpop.f32.mrf.mxu2 }
 0x3a5   : > { %2980 = vst.msk [vmem:[#allocation2 + $0x178] sm:$0xff] %vm480_vm4, %v2932_v37  ;;  %v3944_v54 = vadd.f32 %v7003_v51, %v3704_v3 }
 0x3a8   : > { %v7001_v11 = vpop.f32.mrf.mxu3 }
 0x3a9   : > { %7333 = vst [vmem:[#allocation21_spill] sm:$0xff] %v7001_v11  ;;  %5022 = vmatmul.msk.bf16.gmra.mxu2 %vm296_vm1, %v6857_v1  ;;  %v3992_v11 = vmax.f32 %v3944_v54, 0.0  ;;  %v3301_v1 = vadd.f32 %v6906_v47, %v6783_v19  ;;  %v3251_v19 = vld [vmem:[#allocation2 + $0x28] sm:$0xff] }
 0x3aa   : > { %v3568_v52 = vpop.f32.mrf.mxu1  ;;  %v3517_v34 = vpop.f32.mrf.mxu0 }
 0x3ab   : > { %v3707_v22 = vadd.f32 %v3568_v52, %v3298_v45  ;;  %v3703_v50 = vadd.f32 %v3517_v34, %v6714_v28 }
 0x3ac   : > { %v7013_v37 = vpop.f32.mrf.mxu2 }
 0x3ad   : > { %v3947_v38 = vadd.f32 %v7009_v36, %v3707_v22  ;;  %v3943_v3 = vadd.f32 %v7003_v51, %v3703_v50 }
 0x3af   : > { %v3995_v49 = vmax.f32 %v3947_v38, 0.0  ;;  %v3991_v38 = vmax.f32 %v3943_v3, 0.0 }
 0x3b0   : > { %v3206_v61 = vpop.f32.mrf.mxu3 }
 0x3b1   : > { %v3296_v26 = vadd.f32 %v3248_v29, %v3206_v61  ;;  %v7020_v39 = vpack.c.bf16 %v3995_v49, %v3992_v11  ;;  %v3304_v11 = vadd.f32 %v6928_v6, %v6803_v44  ;;  %v7032_v49 = vpop.permute.xlu2 %3880 }
 0x3b2   : > { %v3571_v45 = vpop.f32.mrf.mxu1  ;;  %v3519_v28 = vpop.f32.mrf.mxu0 }
 0x3b3   : > { %3344 = vst.msk [vmem:[#allocation2 + $0x10] sm:$0xff] %vm480_vm4, %v3296_v26  ;;  %v3710_v52 = vadd.f32 %v3571_v45, %v3301_v1  ;;  %v3706_v34 = vadd.f32 %v3519_v28, %v6733_v17  ;;  %v3254_v28 = vld [vmem:[#allocation2 + $0x40] sm:$0xff] }
 0x3b4   : > { %v7025_v22 = vpop.f32.mrf.mxu2 }
 0x3b5   : > { %v3946_v54 = vadd.f32 %v7009_v36, %v3706_v34  ;;  %v3950_v1 = vadd.f32 %v6989_v60, %v3710_v52 }
 0x3b7   : > { %v3994_v32 = vmax.f32 %v3946_v54, 0.0 }
 0x3b8   : > { %v3208_v9 = vpop.f32.mrf.mxu3 }
 0x3b9   : > { %v3299_v47 = vadd.f32 %v3251_v19, %v3208_v9  ;;  %5023 = vmatmul.msk.bf16.gmra.mxu2 %vm296_vm1, %v6888_v2  ;;  %v7034_v26 = vpack.c.bf16 %v3994_v32, %v3991_v38  ;;  %v3998_v9 = vmax.f32 %v3950_v1, 0.0  ;;  %v3307_v32 = vadd.f32 %v6943_v40, %v6819_v31  ;;  %v3257_v31 = vld [vmem:[#allocation2 + $0x58] sm:$0xff] }
 0x3ba   : > { %v3573_v17 = vpop.f32.mrf.mxu1  ;;  %v3522_v50 = vpop.f32.mrf.mxu0  ;;  %v3310_v40 = vadd.f32 %v6963_v33, %v6836_v59 }
 0x3bb   : > { %3347 = vst.msk [vmem:[#allocation2 + $0x28] sm:$0xff] %vm480_vm4, %v3299_v47  ;;  %v3713_v61 = vadd.f32 %v3573_v17, %v3304_v11  ;;  %v3709_v29 = vadd.f32 %v3522_v50, %v6755_v24 }
 0x3bc   : > { %v7039_v45 = vpop.f32.mrf.mxu2 }
 0x3bd   : > { %v3953_v44 = vadd.f32 %v7032_v49, %v3713_v61  ;;  %v3949_v19 = vadd.f32 %v6989_v60, %v3709_v29 }
 0x3bf   : > { %v4001_v6 = vmax.f32 %v3953_v44, 0.0  ;;  %v3997_v50 = vmax.f32 %v3949_v19, 0.0 }
 0x3c0   : > { %v3211_v2 = vpop.f32.mrf.mxu3 }
 0x3c1   : > { %v3302_v3 = vadd.f32 %v3254_v28, %v3211_v2  ;;  %v7044_v34 = vpack.c.bf16 %v4001_v6, %v3998_v9 }
 0x3c2   : > { %v3576_v54 = vpop.f32.mrf.mxu1  ;;  %v3524_v38 = vpop.f32.mrf.mxu0 }
 0x3c3   : > { %3350 = vst.msk [vmem:[#allocation2 + $0x40] sm:$0xff] %vm480_vm4, %v3302_v3  ;;  %v3716_v24 = vadd.f32 %v3576_v54, %v3307_v32  ;;  %v3712_v52 = vadd.f32 %v3524_v38, %v6772_v14  ;;  %v3260_v54 = vld [vmem:[#allocation2 + $0x70] sm:$0xff] }
 0x3c4   : > { %v7049_v11 = vpop.f32.mrf.mxu2 }
 0x3c5   : > { %v3952_v47 = vadd.f32 %v7032_v49, %v3712_v52  ;;  %v3956_v2 = vadd.f32 %v7016_v25, %v3716_v24 }
 0x3c7   : > { %v4000_v17 = vmax.f32 %v3952_v47, 0.0  ;;  %v4004_v59 = vmax.f32 %v3956_v2, 0.0 }
 0x3c8   : > { %v3213_v61 = vpop.f32.mrf.mxu3 }
 0x3c9   : > { %v3305_v1 = vadd.f32 %v3257_v31, %v3213_v61  ;;  %5024 = vmatmul.msk.bf16.gmra.mxu2 %vm296_vm1, %v6921_v13  ;;  %v7056_v44 = vpack.c.bf16 %v4000_v17, %v3997_v50  ;;  %v3313_v13 = vadd.f32 %v6980_v5, %v6852_v21  ;;  %v3263_v21 = vld [vmem:[#allocation2 + $0x88] sm:$0xff]  ;;  %v3316_v5 = vadd.f32 %v6996_v57, %v6869_v42 }
 0x3ca   : > { %v3578_v14 = vpop.f32.mrf.mxu1  ;;  %v3527_v6 = vpop.f32.mrf.mxu0 }
 0x3cb   : > { %3353 = vst.msk [vmem:[#allocation2 + $0x58] sm:$0xff] %vm480_vm4, %v3305_v1  ;;  %v3719_v29 = vadd.f32 %v3578_v14, %v3310_v40  ;;  %v3715_v9 = vadd.f32 %v3527_v6, %v6794_v48 }
 0x3cc   : > { %v7061_v28 = vpop.f32.mrf.mxu2 }
 0x3cd   : > { %v3959_v32 = vadd.f32 %v6987_v53, %v3719_v29  ;;  %v3955_v17 = vadd.f32 %v7016_v25, %v3715_v9 }
 0x3cf   : > { %v4007_v33 = vmax.f32 %v3959_v32, 0.0  ;;  %v4003_v31 = vmax.f32 %v3955_v17, 0.0 }
 0x3d0   : > { %v3216_v3 = vpop.f32.mrf.mxu3 }
 0x3d1   : > { %v3308_v38 = vadd.f32 %v3260_v54, %v3216_v3  ;;  %v7066_v52 = vpack.c.bf16 %v4007_v33, %v4004_v59  ;;  %v3266_v54 = vld [vmem:[#allocation2 + $0xa0] sm:$0xff] }
 0x3d2   : > { %v3581_v19 = vpop.f32.mrf.mxu1  ;;  %v3529_v47 = vpop.f32.mrf.mxu0 }
 0x3d3   : > { %3356 = vst.msk [vmem:[#allocation2 + $0x70] sm:$0xff] %vm480_vm4, %v3308_v38  ;;  %v3722_v48 = vadd.f32 %v3581_v19, %v3313_v13  ;;  %v3718_v24 = vadd.f32 %v3529_v47, %v6808_v0 }
 0x3d4   : > { %v7071_v50 = vpop.f32.mrf.mxu2 }
 0x3d5   : > { %v3958_v61 = vadd.f32 %v6987_v53, %v3718_v24  ;;  %v3962_v32 = vadd.f32 %v6965_v15, %v3722_v48 }
 0x3d7   : > { %v4006_v40 = vmax.f32 %v3958_v61, 0.0  ;;  %v4010_v42 = vmax.f32 %v3962_v32, 0.0 }
 0x3d8   : > { %v3218_v1 = vpop.f32.mrf.mxu3 }
 0x3d9   : > { %v3311_v14 = vadd.f32 %v3263_v21, %v3218_v1  ;;  %5025 = vmatmul.msk.bf16.gmra.mxu2 %vm296_vm1, %v6956_v63  ;;  %v7078_v6 = vpack.c.bf16 %v4006_v40, %v4003_v31  ;;  %v3319_v63 = vadd.f32 %v7013_v37, %v6883_v16  ;;  %v4079_v16 = vld [vmem:[%s7284_s4] sm:$0xff]  ;;  %v2913_v37 = vadd.f32 %v6900_v18, %v6580_v27  ;;  %v3657_v18 = vld [vmem:[#allocation2 + $0x10] sm:$0xff] }
 0x3da   : > { %v3583_v0 = vpop.f32.mrf.mxu1  ;;  %v3532_v29 = vpop.f32.mrf.mxu0  ;;  %4097 = vperm.xlu2 %5196, %v4079_v16   ;;  %v3269_v21 = vld [vmem:[#allocation2 + $0xb8] sm:$0xff] }
 0x3db   : > { %3359 = vst.msk [vmem:[#allocation2 + $0x88] sm:$0xff] %vm480_vm4, %v3311_v14  ;;  %v3725_v9 = vadd.f32 %v3583_v0, %v3316_v5  ;;  %v3721_v2 = vadd.f32 %v3532_v29, %v6827_v35 }
 0x3dc   : > { %v7083_v59 = vpop.f32.mrf.mxu2 }
 0x3dd   : > { %v3965_v33 = vadd.f32 %v6970_v55, %v3725_v9  ;;  %v3961_v24 = vadd.f32 %v6965_v15, %v3721_v2 }
 0x3df   : > { %v4013_v57 = vmax.f32 %v3965_v33, 0.0  ;;  %v4009_v31 = vmax.f32 %v3961_v24, 0.0 }
 0x3e0   : > { %v3221_v3 = vpop.f32.mrf.mxu3 }
 0x3e1   : > { %v3314_v13 = vadd.f32 %v3266_v54, %v3221_v3  ;;  %v7088_v38 = vpack.c.bf16 %v4013_v57, %v4010_v42  ;;  %v3272_v54 = vld [vmem:[#allocation2 + $0xd0] sm:$0xff] }
 0x3e2   : > { %v3586_v19 = vpop.f32.mrf.mxu1  ;;  %v3534_v47 = vpop.f32.mrf.mxu0 }
 0x3e3   : > { %3362 = vst.msk [vmem:[#allocation2 + $0xa0] sm:$0xff] %vm480_vm4, %v3314_v13  ;;  %v3728_v35 = vadd.f32 %v3586_v19, %v3319_v63  ;;  %v3724_v48 = vadd.f32 %v3534_v47, %v6841_v8  ;;  %v3322_v8 = vadd.f32 %v7025_v22, %v2913_v37  ;;  %v3321_v63 = vadd.f32 %v6873_v4, %v6759_v41  ;;  %v3660_v37 = vld [vmem:[#allocation2 + $0x28] sm:$0xff] }
 0x3e4   : > { %v7093_v17 = vpop.f32.mrf.mxu2  ;;  %v3325_v13 = vadd.f32 %v7039_v45, %v6916_v20  ;;  %v2919_v41 = vadd.f32 %v6933_v62, %v6628_v7 }
 0x3e5   : > { %v3964_v61 = vadd.f32 %v6970_v55, %v3724_v48  ;;  %v3968_v32 = vadd.f32 %v6941_v46, %v3728_v35 }
 0x3e7   : > { %v4012_v40 = vmax.f32 %v3964_v61, 0.0  ;;  %v4016_v22 = vmax.f32 %v3968_v32, 0.0  ;;  %v3663_v32 = vld [vmem:[#allocation2 + $0x40] sm:$0xff] }
 0x3e8   : > { %v3223_v1 = vpop.f32.mrf.mxu3 }
 0x3e9   : > { %v3317_v5 = vadd.f32 %v3269_v21, %v3223_v1  ;;  %v7102_v14 = vpack.c.bf16 %v4012_v40, %v4009_v31  ;;  %v3275_v1 = vld [vmem:[#allocation2 + $0xe8] sm:$0xff]  ;;  %v3328_v21 = vadd.f32 %v7049_v11, %v2919_v41 }
 0x3ea   : > { %v3588_v0 = vpop.f32.mrf.mxu1  ;;  %v3537_v29 = vpop.f32.mrf.mxu0 }
 0x3eb   : > { %3365 = vst.msk [vmem:[#allocation2 + $0xb8] sm:$0xff] %vm480_vm4, %v3317_v5  ;;  %v3731_v9 = vadd.f32 %v3588_v0, %v3322_v8  ;;  %v3727_v2 = vadd.f32 %v3537_v29, %v6860_v10 }
 0x3ec   : > { %v3615_v27 = vpop.f32.mrf.mxu2 }
 0x3ed   : > { %v3705_v33 = vadd.f32 %v3657_v18, %v3615_v27  ;;  %v3971_v42 = vadd.f32 %v6998_v58, %v3731_v9  ;;  %v3967_v61 = vadd.f32 %v6941_v46, %v3727_v2 }
 0x3ef   : > { %3753 = vst.msk [vmem:[#allocation2 + $0x10] sm:$0xff] %vm480_vm4, %v3705_v33  ;;  %v4019_v57 = vmax.f32 %v3971_v42, 0.0  ;;  %v4015_v4 = vmax.f32 %v3967_v61, 0.0  ;;  %v3666_v61 = vld [vmem:[#allocation2 + $0x58] sm:$0xff] }
 0x3f0   : > { %v3226_v3 = vpop.f32.mrf.mxu3 }
 0x3f1   : > { %v3320_v10 = vadd.f32 %v3272_v54, %v3226_v3  ;;  %v7113_v19 = vpack.c.bf16 %v4019_v57, %v4016_v22  ;;  %v3278_v22 = vld [vmem:[#allocation2 + $0x100] sm:$0xff]  ;;  %v3327_v57 = vadd.f32 %v6904_v23, %v6798_v56  ;;  %v7334_v3 = vld [vmem:[#allocation11_spill] sm:$0xff]  ;;  %v7335_v56 = vld [vmem:[#allocation6_spill] sm:$0xff] }
 0x3f2   : > { %v3591_v47 = vpop.f32.mrf.mxu1  ;;  %v3539_v35 = vpop.f32.mrf.mxu0  ;;  %v3331_v54 = vadd.f32 %v7061_v28, %v7334_v3  ;;  %v7336_v23 = vld [vmem:[#allocation18_spill] sm:$0xff] }
 0x3f3   : > { %3368 = vst.msk [vmem:[#allocation2 + $0xd0] sm:$0xff] %vm480_vm4, %v3320_v10  ;;  %v3734_v48 = vadd.f32 %v3591_v47, %v3325_v13  ;;  %v3730_v24 = vadd.f32 %v3539_v35, %v3321_v63  ;;  %v7341_v3 = vld [vmem:[#allocation10_spill] sm:$0xff] }
 0x3f4   : > { %v3617_v16 = vpop.f32.mrf.mxu2 }
 0x3f5   : > { %v3708_v31 = vadd.f32 %v3660_v37, %v3617_v16  ;;  %v3970_v40 = vadd.f32 %v6998_v58, %v3730_v24  ;;  %v3974_v7 = vadd.f32 %v6978_v30, %v3734_v48 }
 0x3f7   : > { %3756 = vst.msk [vmem:[#allocation2 + $0x28] sm:$0xff] %vm480_vm4, %v3708_v31  ;;  %v4018_v20 = vmax.f32 %v3970_v40, 0.0  ;;  %v4022_v11 = vmax.f32 %v3974_v7, 0.0  ;;  %v2925_v31 = vadd.f32 %v7336_v23, %v7335_v56  ;;  %v3672_v56 = vld [vmem:[#allocation2 + $0x88] sm:$0xff] }
 0x3f8   : > { %v3228_v45 = vpop.f32.mrf.mxu3 }
 0x3f9   : > { %v3323_v8 = vadd.f32 %v3275_v1, %v3228_v45  ;;  %v7122_v5 = vpack.c.bf16 %v4018_v20, %v4015_v4  ;;  %v3281_v4 = vld [vmem:[#allocation2 + $0x118] sm:$0xff]  ;;  %v3334_v20 = vadd.f32 %v7071_v50, %v2925_v31 }
 0x3fa   : > { %v3593_v0 = vpop.f32.mrf.mxu1  ;;  %v3542_v29 = vpop.f32.mrf.mxu0 }
 0x3fb   : > { %3371 = vst.msk [vmem:[#allocation2 + $0xe8] sm:$0xff] %vm480_vm4, %v3323_v8  ;;  %v3737_v9 = vadd.f32 %v3593_v0, %v3328_v21  ;;  %v3733_v2 = vadd.f32 %v3542_v29, %v6891_v43  ;;  %v7337_v29 = vld [vmem:[#allocation15_spill] sm:$0xff] }
 0x3fc   : > { %v3620_v62 = vpop.f32.mrf.mxu2 }
 0x3fd   : > { %v3711_v27 = vadd.f32 %v3663_v32, %v3620_v62  ;;  %v3977_v18 = vadd.f32 %v6937_v12, %v3737_v9  ;;  %v3973_v48 = vadd.f32 %v6978_v30, %v3733_v2  ;;  %v7338_v2 = vld [vmem:[#allocation16_spill] sm:$0xff]  ;;  %v3669_v32 = vld [vmem:[#allocation2 + $0x70] sm:$0xff] }
 0x3ff   : > { %3759 = vst.msk [vmem:[#allocation2 + $0x40] sm:$0xff] %vm480_vm4, %v3711_v27  ;;  %v4025_v33 = vmax.f32 %v3977_v18, 0.0  ;;  %v4021_v28 = vmax.f32 %v3973_v48, 0.0  ;;  %v7339_v18 = vld [vmem:[#allocation9_spill] sm:$0xff] }
 0x400   : > { %v3231_v42 = vpop.f32.mrf.mxu3 }
 0x401   : > { %v3326_v43 = vadd.f32 %v3278_v22, %v3231_v42  ;;  %v7133_v63 = vpack.c.bf16 %v4025_v33, %v4022_v11  ;;  %v3284_v22 = vld [vmem:[#allocation2 + $0x130] sm:$0xff] }
 0x402   : > { %v3596_v13 = vpop.f32.mrf.mxu1  ;;  %v3544_v10 = vpop.f32.mrf.mxu0 }
 0x403   : > { %3374 = vst.msk [vmem:[#allocation2 + $0x100] sm:$0xff] %vm480_vm4, %v3326_v43  ;;  %v3740_v47 = vadd.f32 %v3596_v13, %v3331_v54  ;;  %v3736_v35 = vadd.f32 %v3544_v10, %v3327_v57  ;;  %v7340_v57 = vld [vmem:[#allocation7_spill] sm:$0xff]  ;;  %v7342_v43 = vld [vmem:[#allocation20_spill] sm:$0xff] }
 0x404   : > { %v3622_v24 = vpop.f32.mrf.mxu2  ;;  %v3333_v54 = vadd.f32 %v7341_v3, %v7340_v57  ;;  %v3337_v13 = vadd.f32 %v7083_v59, %v7342_v43  ;;  %v3290_v43 = vld [vmem:[#allocation2 + $0x160] sm:$0xff] }
 0x405   : > { %v3714_v16 = vadd.f32 %v3666_v61, %v3622_v24  ;;  %v3976_v37 = vadd.f32 %v6937_v12, %v3736_v35  ;;  %v3980_v7 = vadd.f32 %v7338_v2, %v3740_v47 }
 0x407   : > { %3762 = vst.msk [vmem:[#allocation2 + $0x58] sm:$0xff] %vm480_vm4, %v3714_v16  ;;  %v4024_v40 = vmax.f32 %v3976_v37, 0.0  ;;  %v4028_v50 = vmax.f32 %v3980_v7, 0.0 }
 0x408   : > { %v3233_v41 = vpop.f32.mrf.mxu3 }
 0x409   : > { %v3329_v45 = vadd.f32 %v3281_v4, %v3233_v41  ;;  %v7142_v1 = vpack.c.bf16 %v4024_v40, %v4021_v28  ;;  %v7343_v28 = vld [vmem:[#allocation12_spill] sm:$0xff]  ;;  %v7344_v40 = vld [vmem:[#allocation21_spill] sm:$0xff] }
 0x40a   : > { %v3598_v21 = vpop.f32.mrf.mxu1  ;;  %v3547_v8 = vpop.f32.mrf.mxu0  ;;  %v2931_v41 = vadd.f32 %v7344_v40, %v7343_v28 }
 0x40b   : > { %3377 = vst.msk [vmem:[#allocation2 + $0x118] sm:$0xff] %vm480_vm4, %v3329_v45  ;;  %v3743_v0 = vadd.f32 %v3598_v21, %v3334_v20  ;;  %v3739_v9 = vadd.f32 %v3547_v8, %v7337_v29  ;;  %v3287_v45 = vld [vmem:[#allocation2 + $0x148] sm:$0xff] }
 0x40c   : > { %v3625_v62 = vpop.f32.mrf.mxu2  ;;  %v3340_v21 = vadd.f32 %v7093_v17, %v2931_v41 }
 0x40d   : > { %v3717_v27 = vadd.f32 %v3669_v32, %v3625_v62  ;;  %v3983_v11 = vadd.f32 %v7339_v18, %v3743_v0  ;;  %v3979_v16 = vadd.f32 %v7338_v2, %v3739_v9  ;;  %v7345_v62 = vld [vmem:[#allocation17_spill] sm:$0xff] }
 0x40f   : > { %3765 = vst.msk [vmem:[#allocation2 + $0x70] sm:$0xff] %vm480_vm4, %v3717_v27  ;;  %v4031_v33 = vmax.f32 %v3983_v11, 0.0  ;;  %v4027_v59 = vmax.f32 %v3979_v16, 0.0  ;;  %v7346_v27 = vld [vmem:[#allocation14_spill] sm:$0xff] }
 0x410   : > { %v3236_v42 = vpop.f32.mrf.mxu3 }
 0x411   : > { %v3332_v10 = vadd.f32 %v3284_v22, %v3236_v42  ;;  %v4058_v35 = vpack.c.bf16 %v4031_v33, %v4028_v50  ;;  %v3675_v33 = vld [vmem:[#allocation2 + $0xa0] sm:$0xff] }
 0x412   : > { %v3601_v47 = vpop.f32.mrf.mxu1  ;;  %v3549_v48 = vpop.f32.mrf.mxu0  ;;  %v7347_v22 = vld [vmem:[#allocation8_spill] sm:$0xff] }
 0x413   : > { %3380 = vst.msk [vmem:[#allocation2 + $0x130] sm:$0xff] %vm480_vm4, %v3332_v10  ;;  %v3746_v24 = vadd.f32 %v3601_v47, %v3337_v13  ;;  %v3742_v61 = vadd.f32 %v3549_v48, %v3333_v54  ;;  %v7348_v13 = vld [vmem:[#allocation13_spill] sm:$0xff]  ;;  %v7349_v10 = vld [vmem:[#allocation19_spill] sm:$0xff] }
 0x414   : > { %v3627_v37 = vpop.f32.mrf.mxu2  ;;  %v3339_v47 = vadd.f32 %v7349_v10, %v7348_v13 }
 0x415   : > { %v3720_v23 = vadd.f32 %v3672_v56, %v3627_v37  ;;  %v3982_v31 = vadd.f32 %v7339_v18, %v3742_v61  ;;  %v3986_v11 = vadd.f32 %v7346_v27, %v3746_v24 }
 0x417   : > { %3768 = vst.msk [vmem:[#allocation2 + $0x88] sm:$0xff] %vm480_vm4, %v3720_v23  ;;  %v4030_v4 = vmax.f32 %v3982_v31, 0.0  ;;  %v4034_v3 = vmax.f32 %v3986_v11, 0.0  ;;  %v3678_v23 = vld [vmem:[#allocation2 + $0xb8] sm:$0xff] }
 0x418   : > { %v3238_v20 = vpop.f32.mrf.mxu3 }
 0x419   : > { %v3335_v8 = vadd.f32 %v3287_v45, %v3238_v20  ;;  %v4057_v0 = vpack.c.bf16 %v4030_v4, %v4027_v59  ;;  %v3293_v4 = vld [vmem:[#allocation2 + $0x178] sm:$0xff] }
 0x41a   : > { %v3603_v29 = vpop.f32.mrf.mxu1  ;;  %v3552_v9 = vpop.f32.mrf.mxu0 }
 0x41b   : > { %3383 = vst.msk [vmem:[#allocation2 + $0x148] sm:$0xff] %vm480_vm4, %v3335_v8  ;;  %v3749_v7 = vadd.f32 %v3603_v29, %v3340_v21  ;;  %v3745_v32 = vadd.f32 %v3552_v9, %v7345_v62  ;;  %v3681_v8 = vld [vmem:[#allocation2 + $0xd0] sm:$0xff]  ;;  %v3684_v9 = vld [vmem:[#allocation2 + $0xe8] sm:$0xff] }
 0x41c   : > { %v3630_v50 = vpop.f32.mrf.mxu2 }
 0x41d   : > { %v3723_v42 = vadd.f32 %v3675_v33, %v3630_v50  ;;  %v3989_v57 = vadd.f32 %v7347_v22, %v3749_v7  ;;  %v3985_v37 = vadd.f32 %v7346_v27, %v3745_v32 }
 0x41f   : > { %3771 = vst.msk [vmem:[#allocation2 + $0xa0] sm:$0xff] %vm480_vm4, %v3723_v42  ;;  %v4037_v17 = vmax.f32 %v3989_v57, 0.0  ;;  %v4033_v40 = vmax.f32 %v3985_v37, 0.0 }
 0x420   : > { %v3241_v54 = vpop.f32.mrf.mxu3 }
 0x421   : > { %v3338_v48 = vadd.f32 %v3290_v43, %v3241_v54  ;;  %v4061_v61 = vpack.c.bf16 %v4037_v17, %v4034_v3 }
 0x422   : > { %v3554_v16 = vpop.f32.mrf.mxu0 }
 0x423   : > { %3386 = vst.msk [vmem:[#allocation2 + $0x160] sm:$0xff] %vm480_vm4, %v3338_v48  ;;  %v3748_v24 = vadd.f32 %v3554_v16, %v3339_v47  ;;  %4242 = vmatpush.bf16.msrb.mxu0 %v4061_v61 }
 0x424   : > { %v3632_v56 = vpop.f32.mrf.mxu2 }
 0x425   : > { %v3726_v31 = vadd.f32 %v3678_v23, %v3632_v56  ;;  %v3988_v28 = vadd.f32 %v7347_v22, %v3748_v24 }
 0x427   : > { %3774 = vst.msk [vmem:[#allocation2 + $0xb8] sm:$0xff] %vm480_vm4, %v3726_v31  ;;  %4243 = vmatpush.bf16.msrb.mxu0 %v4058_v35  ;;  %v4036_v41 = vmax.f32 %v3988_v28, 0.0 }
 0x428   : > { %v3243_v59 = vpop.f32.mrf.mxu3 }
 0x429   : > { %v3341_v20 = vadd.f32 %v3293_v4, %v3243_v59  ;;  %v4060_v45 = vpack.c.bf16 %v4036_v41, %v4033_v40 }
 0x42a   : > { %v3699_v11 = vld [vmem:[#allocation2 + $0x160] sm:$0xff] }
 0x42b   : > { %3389 = vst.msk [vmem:[#allocation2 + $0x178] sm:$0xff] %vm480_vm4, %v3341_v20  ;;  %4244 = vmatpush.bf16.msrb.mxu0 %v7133_v63  ;;  %4208 = vmatpush.bf16.msrb.mxu3 %v4060_v45  ;;  %v3819_v20 = vld [vmem:[#allocation2 + $0xa0] sm:$0xff] }
 0x42c   : > { %v3635_v21 = vpop.f32.mrf.mxu2 }
 0x42d   : > { %v3729_v29 = vadd.f32 %v3681_v8, %v3635_v21  ;;  %v3816_v8 = vld [vmem:[#allocation2 + $0x88] sm:$0xff] }
 0x42f   : > { %3777 = vst.msk [vmem:[#allocation2 + $0xd0] sm:$0xff] %vm480_vm4, %v3729_v29  ;;  %4245 = vmatpush.bf16.msrb.mxu0 %v7113_v19  ;;  %4209 = vmatpush.bf16.msrb.mxu3 %v4057_v0  ;;  %v3687_v19 = vld [vmem:[#allocation2 + $0x100] sm:$0xff] }
 0x432   : > { %v3702_v42 = vld [vmem:[#allocation2 + $0x178] sm:$0xff] }
 0x433   : > { %4246 = vmatpush.bf16.msrb.mxu0 %v7088_v38  ;;  %4210 = vmatpush.bf16.msrb.mxu3 %v7142_v1  ;;  %v7185_v38 = vld [vmem:[%s7283_s3] sm:$0xff]  ;;  %v3693_v1 = vld [vmem:[#allocation2 + $0x130] sm:$0xff] }
 0x434   : > { %v3637_v35 = vpop.f32.mrf.mxu2 }
 0x435   : > { %v3732_v7 = vadd.f32 %v3684_v9, %v3637_v35  ;;  %v3963_v35 = vadd.f32 %v6965_v15, %v3819_v20  ;;  %v3813_v9 = vld [vmem:[#allocation2 + $0x70] sm:$0xff] }
 0x437   : > { %3780 = vst.msk [vmem:[#allocation2 + $0xe8] sm:$0xff] %vm480_vm4, %v3732_v7  ;;  %4247 = vmatpush.bf16.msrb.mxu0 %v7066_v52  ;;  %4211 = vmatpush.bf16.msrb.mxu3 %v7122_v5  ;;  %v3690_v52 = vld [vmem:[#allocation2 + $0x118] sm:$0xff] }
 0x43b   : > { %4248 = vmatpush.bf16.msrb.mxu0 %v7044_v34  ;;  %4212 = vmatpush.bf16.msrb.mxu3 %v7102_v14 }
 0x43c   : > { %v3640_v63 = vpop.f32.mrf.mxu2 }
 0x43d   : > { %v3735_v0 = vadd.f32 %v3687_v19, %v3640_v63  ;;  %v3960_v63 = vadd.f32 %v6987_v53, %v3816_v8  ;;  %v3810_v19 = vld [vmem:[#allocation2 + $0x58] sm:$0xff]  ;;  %v3801_v53 = vld [vmem:[#allocation2 + $0x10] sm:$0xff] }
 0x43e   : > { %v3828_v31 = vld [vmem:[#allocation2 + $0xe8] sm:$0xff] }
 0x43f   : > { %3783 = vst.msk [vmem:[#allocation2 + $0x100] sm:$0xff] %vm480_vm4, %v3735_v0  ;;  %4249 = vmatpush.bf16.msrb.mxu0 %v7020_v39  ;;  %4213 = vmatpush.bf16.msrb.mxu3 %v7078_v6  ;;  %v3696_v6 = vld [vmem:[#allocation2 + $0x148] sm:$0xff]  ;;  %v3972_v59 = vadd.f32 %v6998_v58, %v3828_v31  ;;  %v4011_v0 = vmax.f32 %v3963_v35, 0.0 }
 0x441   : > { %v4020_v21 = vmax.f32 %v3972_v59, 0.0 }
 0x442   : > { %4250 = vmatmul.bf16.vlgmr.msrb.gmra.mxu0 %v7185_v38 }
 0x443   : > { %4214 = vmatpush.bf16.msrb.mxu3 %v7056_v44 }
 0x444   : > { %v3642_v34 = vpop.f32.mrf.mxu2 }
 0x445   : > { %v3738_v14 = vadd.f32 %v3690_v52, %v3642_v34  ;;  %v3807_v34 = vld [vmem:[#allocation2 + $0x40] sm:$0xff] }
 0x446   : > { %v3831_v24 = vld [vmem:[#allocation2 + $0x100] sm:$0xff]  ;;  %v3951_v15 = vadd.f32 %v6989_v60, %v3807_v34 }
 0x447   : > { %3786 = vst.msk [vmem:[#allocation2 + $0x118] sm:$0xff] %vm480_vm4, %v3738_v14  ;;  %4215 = vmatpush.bf16.msrb.mxu3 %v7034_v26  ;;  %v4008_v14 = vmax.f32 %v3960_v63, 0.0 }
 0x44a   : > { %4216 = vmatmul.bf16.vlgmr.msrb.gmra.mxu3 %v7185_v38 }
 0x44c   : > { %v3645_v5 = vpop.f32.mrf.mxu2 }
 0x44d   : > { %v3741_v62 = vadd.f32 %v3693_v1, %v3645_v5  ;;  %v3804_v5 = vld [vmem:[#allocation2 + $0x28] sm:$0xff] }
 0x44e   : > { %v3834_v47 = vld [vmem:[#allocation2 + $0x118] sm:$0xff] }
 0x44f   : > { %3789 = vst.msk [vmem:[#allocation2 + $0x130] sm:$0xff] %vm480_vm4, %v3741_v62  ;;  %v3978_v23 = vadd.f32 %v6937_v12, %v3834_v47  ;;  %v5135_v62 = vld [vmem:[%s7283_s3 + $0x10] sm:$0xff] }
 0x451   : > { %v4026_v41 = vmax.f32 %v3978_v23, 0.0 }
 0x454   : > { %v3647_v39 = vpop.f32.mrf.mxu2 }
 0x455   : > { %v3744_v32 = vadd.f32 %v3696_v6, %v3647_v39 }
 0x456   : > { %v3837_v43 = vld [vmem:[#allocation2 + $0x130] sm:$0xff] }
 0x457   : > { %3792 = vst.msk [vmem:[#allocation2 + $0x148] sm:$0xff] %vm480_vm4, %v3744_v32  ;;  %v3981_v16 = vadd.f32 %v7338_v2, %v3837_v43  ;;  %v3822_v2 = vld [vmem:[#allocation2 + $0xb8] sm:$0xff]  ;;  %v3948_v32 = vadd.f32 %v7009_v36, %v3804_v5  ;;  %v5136_v36 = vld [vmem:[%s7283_s3 + $0x18] sm:$0xff] }
 0x458   : > { %v5140_v43 = vld [vmem:[%s7283_s3 + $0x38] sm:$0xff] }
 0x459   : > { %v4029_v28 = vmax.f32 %v3981_v16, 0.0 }
 0x45c   : > { %v3650_v44 = vpop.f32.mrf.mxu2 }
 0x45d   : > { %v3747_v50 = vadd.f32 %v3699_v11, %v3650_v44  ;;  %v3996_v11 = vmax.f32 %v3948_v32, 0.0 }
 0x45e   : > { %v3840_v3 = vld [vmem:[#allocation2 + $0x148] sm:$0xff] }
 0x45f   : > { %3795 = vst.msk [vmem:[#allocation2 + $0x160] sm:$0xff] %vm480_vm4, %v3747_v50  ;;  %v3984_v10 = vadd.f32 %v7339_v18, %v3840_v3  ;;  %v3825_v18 = vld [vmem:[#allocation2 + $0xd0] sm:$0xff] }
 0x460   : > { %v3969_v12 = vadd.f32 %v6941_v46, %v3825_v18  ;;  %v3957_v46 = vadd.f32 %v7016_v25, %v3813_v9  ;;  %v3999_v25 = vmax.f32 %v3951_v15, 0.0 }
 0x461   : > { %v4032_v56 = vmax.f32 %v3984_v10, 0.0 }
 0x462   : > { %v4017_v29 = vmax.f32 %v3969_v12, 0.0  ;;  %v4005_v1 = vmax.f32 %v3957_v46, 0.0 }
 0x463   : > { %v4059_v40 = vpack.c.bf16 %v4032_v56, %v4029_v28 }
 0x464   : > { %v3652_v33 = vpop.f32.mrf.mxu2  ;;  %v4053_v7 = vpack.c.bf16 %v4020_v21, %v4017_v29  ;;  %v4047_v39 = vpack.c.bf16 %v4008_v14, %v4005_v1 }
 0x465   : > { %v3750_v26 = vadd.f32 %v3702_v42, %v3652_v33  ;;  %v5138_v33 = vld [vmem:[%s7283_s3 + $0x28] sm:$0xff] }
 0x466   : > { %v3843_v57 = vld [vmem:[#allocation2 + $0x160] sm:$0xff] }
 0x467   : > { %3798 = vst.msk [vmem:[#allocation2 + $0x178] sm:$0xff] %vm480_vm4, %v3750_v26  ;;  %v3987_v17 = vadd.f32 %v7346_v27, %v3843_v57  ;;  %v3975_v27 = vadd.f32 %v6978_v30, %v3831_v24  ;;  %v3966_v30 = vadd.f32 %v6970_v55, %v3822_v2  ;;  %v3954_v55 = vadd.f32 %v7032_v49, %v3810_v19  ;;  %v5139_v57 = vld [vmem:[%s7283_s3 + $0x30] sm:$0xff] }
 0x468   : > { %v3945_v49 = vadd.f32 %v7003_v51, %v3801_v53  ;;  %v5137_v51 = vld [vmem:[%s7283_s3 + $0x20] sm:$0xff] }
 0x469   : > { %v4035_v48 = vmax.f32 %v3987_v17, 0.0  ;;  %v4023_v4 = vmax.f32 %v3975_v27, 0.0  ;;  %v4014_v58 = vmax.f32 %v3966_v30, 0.0  ;;  %v4002_v6 = vmax.f32 %v3954_v55, 0.0 }
 0x46a   : > { %v3993_v60 = vmax.f32 %v3945_v49, 0.0 }
 0x46b   : > { %v4056_v45 = vpack.c.bf16 %v4026_v41, %v4023_v4  ;;  %v4050_v52 = vpack.c.bf16 %v4014_v58, %v4011_v0  ;;  %v4044_v44 = vpack.c.bf16 %v4002_v6, %v3999_v25 }
 0x46c   : > { %v4041_v50 = vpack.c.bf16 %v3996_v11, %v3993_v60 }
 0x46e   : > { %v3846_v54 = vld [vmem:[#allocation2 + $0x178] sm:$0xff] }
 0x46f   : > { %v3990_v13 = vadd.f32 %v7347_v22, %v3846_v54  ;;  %v5134_v22 = vld [vmem:[%s7283_s3 + $0x8] sm:$0xff] }
 0x470   : > { %4220 = vmatmul.bf16.gmra.mxu3 %v5134_v22  ;;  %4254 = vmatmul.bf16.gmra.mxu0 %v5134_v22 }
 0x471   : > { %v4038_v61 = vmax.f32 %v3990_v13, 0.0 }
 0x473   : > { %v4062_v37 = vpack.c.bf16 %v4038_v61, %v4035_v48 }
 0x475   : > { %4276 = vmatpush.bf16.msrb.mxu1 %v4062_v37 }
 0x479   : > { %4277 = vmatpush.bf16.msrb.mxu1 %v4059_v40 }
 0x47d   : > { %4278 = vmatpush.bf16.msrb.mxu1 %v4056_v45 }
 0x480   : > { %4223 = vmatmul.bf16.gmra.mxu3 %v5135_v62  ;;  %4257 = vmatmul.bf16.gmra.mxu0 %v5135_v62 }
 0x481   : > { %4279 = vmatpush.bf16.msrb.mxu1 %v4053_v7 }
 0x485   : > { %4280 = vmatpush.bf16.msrb.mxu1 %v4050_v52 }
 0x489   : > { %4281 = vmatpush.bf16.msrb.mxu1 %v4047_v39 }
 0x48d   : > { %4282 = vmatpush.bf16.msrb.mxu1 %v4044_v44 }
 0x490   : > { %4226 = vmatmul.bf16.gmra.mxu3 %v5136_v36  ;;  %4260 = vmatmul.bf16.gmra.mxu0 %v5136_v36 }
 0x491   : > { %4283 = vmatpush.bf16.msrb.mxu1 %v4041_v50 }
 0x494   : > { %4284 = vmatmul.bf16.vlgmr.msrb.gmra.mxu1 %v7185_v38  ;;  %v4098_v38 = vpop.permute.xlu2 %4097 }
 0x4a0   : > { %4229 = vmatmul.bf16.gmra.mxu3 %v5137_v51  ;;  %4263 = vmatmul.bf16.gmra.mxu0 %v5137_v51 }
 0x4a4   : > { %4288 = vmatmul.bf16.gmra.mxu1 %v5134_v22 }
 0x4b0   : > { %4232 = vmatmul.bf16.gmra.mxu3 %v5138_v33  ;;  %4266 = vmatmul.bf16.gmra.mxu0 %v5138_v33 }
 0x4b4   : > { %4291 = vmatmul.bf16.gmra.mxu1 %v5135_v62 }
 0x4bf   : > { %v4251_v42 = vpop.f32.mrf.mxu0 }
 0x4c0   : > { %v4252_v26 = vadd.f32 %v4251_v42, %v4098_v38  ;;  %4235 = vmatmul.bf16.gmra.mxu3 %v5139_v57  ;;  %4269 = vmatmul.bf16.gmra.mxu0 %v5139_v57 }
 0x4c2   : > { %4311 = vst [vmem:[%s7234_s8 + $0x8] sm:$0xff] %v4252_v26 }
 0x4c4   : > { %4294 = vmatmul.bf16.gmra.mxu1 %v5136_v36 }
 0x4c7   : > { %v4253_v3 = vpop.f32.mrf.mxu0 }
 0x4cd   : > { %v4217_v17 = vpop.f32.mrf.mxu3 }
 0x4ce   : > { %v4218_v54 = vadd.f32 %v4217_v17, %v4098_v38 }
 0x4d0   : > { %4310 = vst [vmem:[%s7234_s8] sm:$0xff] %v4218_v54  ;;  %4238 = vmatmul.bf16.gmra.mxu3 %v5140_v43  ;;  %4272 = vmatmul.bf16.gmra.mxu0 %v5140_v43 }
 0x4d4   : > { %4297 = vmatmul.bf16.gmra.mxu1 %v5137_v51 }
 0x4d5   : > { %v4219_v13 = vpop.f32.mrf.mxu3 }
 0x4e4   : > { %4300 = vmatmul.bf16.gmra.mxu1 %v5138_v33 }
 0x4ed   : > { %v4255_v10 = vpop.f32.mrf.mxu0 }
 0x4f3   : > { %v4221_v47 = vpop.f32.mrf.mxu3 }
 0x4f4   : > { %4303 = vmatmul.bf16.gmra.mxu1 %v5139_v57 }
 0x4f5   : > { %v4256_v48 = vpop.f32.mrf.mxu0 }
 0x4fb   : > { %v4222_v61 = vpop.f32.mrf.mxu3 }
 0x4fd   : > { %v4258_v16 = vpop.f32.mrf.mxu0 }
 0x503   : > { %v4224_v24 = vpop.f32.mrf.mxu3 }
 0x504   : > { %4306 = vmatmul.bf16.gmra.mxu1 %v5140_v43 }
 0x505   : > { %v4259_v37 = vpop.f32.mrf.mxu0 }
 0x50b   : > { %v4225_v31 = vpop.f32.mrf.mxu3 }
 0x50d   : > { %v4261_v28 = vpop.f32.mrf.mxu0 }
 0x511   : > { %v4285_v56 = vpop.f32.mrf.mxu1 }
 0x512   : > { %v4286_v23 = vadd.f32 %v4285_v56, %v4098_v38 }
 0x514   : > { %4312 = vst.msk [vmem:[%s7234_s8 + $0x10] sm:$0xff] %vm480_vm4, %v4286_v23 }
 0x515   : > { %5224 = shalt.err (!%p5221_p3)
}
 0x516   : > { %5146 = dma.vmem_to_hbm [thread:$0]  (%p5338_p5), %s4328_s17, 384, %s4330_s23, %s4314_s25   ;;  %v4227_v22 = vpop.f32.mrf.mxu3  ;;  %v4262_v18 = vpop.f32.mrf.mxu0 }
 0x519   : > { %v4287_v27 = vpop.f32.mrf.mxu1 }
 0x51e   : > { %v4228_v41 = vpop.f32.mrf.mxu3  ;;  %v4264_v59 = vpop.f32.mrf.mxu0 }
 0x521   : > { %v4289_v40 = vpop.f32.mrf.mxu1 }
 0x526   : > { %v4230_v4 = vpop.f32.mrf.mxu3  ;;  %v4265_v12 = vpop.f32.mrf.mxu0 }
 0x529   : > { %v4290_v2 = vpop.f32.mrf.mxu1 }
 0x52e   : > { %v4231_v45 = vpop.f32.mrf.mxu3  ;;  %v4267_v21 = vpop.f32.mrf.mxu0 }
 0x531   : > { %v4292_v20 = vpop.f32.mrf.mxu1 }
 0x536   : > { %v4233_v8 = vpop.f32.mrf.mxu3  ;;  %v4268_v29 = vpop.f32.mrf.mxu0 }
 0x539   : > { %v4293_v30 = vpop.f32.mrf.mxu1 }
 0x53e   : > { %v4234_v9 = vpop.f32.mrf.mxu3  ;;  %v4270_v7 = vpop.f32.mrf.mxu0 }
 0x541   : > { %v4295_v35 = vpop.f32.mrf.mxu1 }
 0x546   : > { %v4236_v63 = vpop.f32.mrf.mxu3  ;;  %v4271_v19 = vpop.f32.mrf.mxu0 }
 0x549   : > { %v4296_v58 = vpop.f32.mrf.mxu1 }
 0x54e   : > { %v4237_v46 = vpop.f32.mrf.mxu3  ;;  %v4273_v34 = vpop.f32.mrf.mxu0 }
 0x551   : > { %v4298_v0 = vpop.f32.mrf.mxu1 }
 0x556   : > { %v4239_v14 = vpop.f32.mrf.mxu3  ;;  %v4274_v55 = vpop.f32.mrf.mxu0 }
 0x559   : > { %v4299_v52 = vpop.f32.mrf.mxu1 }
 0x55e   : > { %v4240_v1 = vpop.f32.mrf.mxu3 }
 0x561   : > { %v4301_v5 = vpop.f32.mrf.mxu1 }
 0x569   : > { %v4302_v15 = vpop.f32.mrf.mxu1 }
 0x571   : > { %v4304_v62 = vpop.f32.mrf.mxu1 }
 0x579   : > { %v4305_v53 = vpop.f32.mrf.mxu1 }
 0x581   : > { %v4307_v39 = vpop.f32.mrf.mxu1 }
 0x589   : > { %v4308_v6 = vpop.f32.mrf.mxu1 }
 0x58a PF: > { %p5152_p4 = scmp.ge.s32.totalorder %s5259_s21, 2  ;;  %s4341_s28 = sand.u32 1, %s5247_s18  }
 0x58b   : > { %s4342_s6 = scalar_lea.sflag [#allocation4], %s4341_s28 }
 0x58c   : > { %p5149_p5 = pnand %p5152_p4, %p5342_p6 }
 0x58e   : > { %p5150_p7 = pneg %p5149_p5 }
 0x590   : > { %5242 = dma.done.wait (%p5150_p7), %s4342_s6, 384  }
 0x591   : > { %5244 = vsyncadd (%p5150_p7), %s4342_s6, 4294966912  ;;  %p15_p8 = scmp.ge.s32.totalorder %s5325_s24, 4   ;;  %s7350_s18 = smov %s5251_s19 }
 0x592   : > { %s7351_s19 = smov %s5255_s20  ;;  %s7352_s20 = smov %s5336_s27 }
 0x593   : > { %s7353_s21 = smov %s5325_s24  ;;  %17 = sbr.rel (!%p15_p8) target bundleno = 3 (0x3), region = 92 }
 0x598   :  { %4348 = vsyncpa [#allocation4], 1 }
 0x599   :  { %4350 = vsyncpa [#allocation4 + $0x1], 1 }

</bundles_post_ra>
